<compile_context>
chip_gen: v5e
topology: v5e:2x2
jax: 0.10.0
libtpu: 0.0.40
codegen_flags: <defaults>
</compile_context>

<pallas_src>
import math

import jax
import jax.numpy as jnp
from jax.experimental import pallas as pl
from jax.experimental.pallas import tpu as pltpu


_VMEM_LIMIT = 32 * 1024 * 1024  # raises v5e's 16 MiB default, safe on v6e/v7x


def _largest_divisor_leq(n, cap):
    best = 1
    for t in range(1, min(n, cap) + 1):
        if n % t == 0:
            best = t
    return best


def _pick_out_row_tile(ho, cap=256):
    # Output-row tile of the height-up kernel: multiple of 8 (or full) dividing Ho.
    if ho <= cap:
        return ho
    best = 1
    for t in range(8, cap + 1, 8):
        if ho % t == 0:
            best = t
    return ho if best == 1 else best


# ---------------------------------------------------------------------------
# Kernel 1: 3x3 stride-2 pad-1 conv + bias + ReLU (synthetic base layer),
#           rows batched into 3 MXU matmuls per grid step; variant with the
#           seg 1x1 conv fused on the end (used for the last base layer).
# ---------------------------------------------------------------------------
def _conv_rows_relu(xe_ref, xh_ref, xo_ref, w_ref, b_ref):
    """Shared conv body for one (batch, row-block) grid step.

    xe: (1, TRo, Wo, 3*Cin) even padded rows 2j      (column taps folded)
    xh: (1, 1,   Wo, 3*Cin) even padded row 2*TRo    (1-row halo)
    xo: (1, TRo, Wo, 3*Cin) odd  padded rows 2j+1
    w : (3, 3*Cin, Cout) bf16     b: (1, Cout) f32
    Returns relu(conv + bias) as (TRo*Wo, Cout) float32.
    """
    _, tro, wo, c3 = xe_ref.shape
    xe = xe_ref[0]                                        # (TRo, Wo, 3*Cin)
    top = xe.reshape(tro * wo, c3)                        # rows 2j
    mid = xo_ref[0].reshape(tro * wo, c3)                 # rows 2j+1
    bot = jnp.concatenate([xe[1:], xh_ref[0]], axis=0)    # rows 2j+2 (halo)
    bot = bot.reshape(tro * wo, c3)
    acc = jnp.dot(top, w_ref[0], preferred_element_type=jnp.float32)
    acc = acc + jnp.dot(mid, w_ref[1], preferred_element_type=jnp.float32)
    acc = acc + jnp.dot(bot, w_ref[2], preferred_element_type=jnp.float32)
    return jnp.maximum(acc + b_ref[...], 0.0)


def _conv3x3s2_relu_kernel(xe_ref, xh_ref, xo_ref, w_ref, b_ref, o_ref):
    _, tro, wo, cout = o_ref.shape
    y = _conv_rows_relu(xe_ref, xh_ref, xo_ref, w_ref, b_ref)
    o_ref[...] = y.reshape(1, tro, wo, cout).astype(o_ref.dtype)


def _conv3x3s2_relu_seg_kernel(xe_ref, xh_ref, xo_ref, w_ref, b_ref,
                               wseg_ref, bseg_ref, o_ref):
    """Last base conv with the seg 1x1 conv fused (MXU, weights in VMEM)."""
    _, tro, wo, k_cls = o_ref.shape
    y = _conv_rows_relu(xe_ref, xh_ref, xo_ref, w_ref, b_ref)   # (TRo*Wo, Cb) f32
    s = jnp.dot(y, wseg_ref[...],
                preferred_element_type=jnp.float32) + bseg_ref[...]
    o_ref[...] = s.reshape(1, tro, wo, k_cls).astype(o_ref.dtype)


def _conv_inputs_and_specs(x, w, b):
    """Wrapper-side prep shared by both conv variants (no halo stacking)."""
    n, h, wd, cin = x.shape
    cout = w.shape[-1]
    ho, wo = h // 2, wd // 2
    xp = jnp.pad(x, ((0, 0), (1, 1), (1, 1), (0, 0)))
    # fold the 3 column taps into the channel axis (1.5x copy) and split rows
    # by parity; the per-block halo row is delivered by a second BlockSpec
    # view of the even plane (no stacked halo copies in HBM).
    xe = jnp.concatenate(
        [xp[:, 0:h + 1:2, kj:kj + 2 * wo:2, :] for kj in range(3)], axis=-1)
    xo = jnp.concatenate(
        [xp[:, 1:h + 1:2, kj:kj + 2 * wo:2, :] for kj in range(3)], axis=-1)
    tro = _largest_divisor_leq(ho, 64)
    rb = ho // tro
    c3 = 3 * cin
    in_specs = [
        pl.BlockSpec((1, tro, wo, c3), lambda i, r: (i, r, 0, 0)),
        pl.BlockSpec((1, 1, wo, c3), lambda i, r: (i, (r + 1) * tro, 0, 0)),
        pl.BlockSpec((1, tro, wo, c3), lambda i, r: (i, r, 0, 0)),
        pl.BlockSpec((3, c3, cout), lambda i, r: (0, 0, 0)),
        pl.BlockSpec((1, cout), lambda i, r: (0, 0)),
    ]
    args = (xe, xe, xo, w.reshape(3, c3, cout), b.reshape(1, cout))
    return args, in_specs, (n, ho, wo, cout, tro, rb)


def conv3x3_s2_relu(x, w, b):
    """NHWC 3x3 stride-2 pad-1 conv + bias + ReLU.  x bf16, w (3,3,Cin,Cout) bf16."""
    args, in_specs, (n, ho, wo, cout, tro, rb) = _conv_inputs_and_specs(x, w, b)
    return pl.pallas_call(
        _conv3x3s2_relu_kernel,
        out_shape=jax.ShapeDtypeStruct((n, ho, wo, cout), jnp.bfloat16),
        grid=(n, rb),
        in_specs=in_specs,
        out_specs=pl.BlockSpec((1, tro, wo, cout), lambda i, r: (i, r, 0, 0)),
        compiler_params=pltpu.CompilerParams(
            dimension_semantics=("parallel", "parallel"),
            vmem_limit_bytes=_VMEM_LIMIT),
    )(*args)


def conv3x3_s2_relu_seg(x, w, b, w_seg, b_seg):
    """Last base conv with the seg 1x1 conv fused; output (N, Hi, Wi, K) f32."""
    args, in_specs, (n, ho, wo, cout, tro, rb) = _conv_inputs_and_specs(x, w, b)
    k_cls = w_seg.shape[0]
    in_specs = in_specs + [
        pl.BlockSpec((cout, k_cls), lambda i, r: (0, 0)),
        pl.BlockSpec((1, k_cls), lambda i, r: (0, 0)),
    ]
    return pl.pallas_call(
        _conv3x3s2_relu_seg_kernel,
        out_shape=jax.ShapeDtypeStruct((n, ho, wo, k_cls), jnp.float32),
        grid=(n, rb),
        in_specs=in_specs,
        out_specs=pl.BlockSpec((1, tro, wo, k_cls), lambda i, r: (i, r, 0, 0)),
        compiler_params=pltpu.CompilerParams(
            dimension_semantics=("parallel", "parallel"),
            vmem_limit_bytes=_VMEM_LIMIT),
    )(*args, w_seg.T, b_seg.reshape(1, k_cls))


# ---------------------------------------------------------------------------
# Kernel A: per-class width upsample (p-invariant stage, hoisted / run once)
# ---------------------------------------------------------------------------
def _width_up_kernel(s_ref, uwt_ref, t_ref):
    """s: (1, 1, Hi, Wi) f32; uwt: (Wi, Wo) f32; t: (1, 1, Hi, Wo) f32."""
    t_ref[0, 0] = jnp.dot(s_ref[0, 0], uwt_ref[...],
                          preferred_element_type=jnp.float32)


def width_up(st, uwt):
    """st: (N, K, Hi, Wi) f32 -> T: (N, K, Hi, Wo) f32."""
    n, k, hi, wi = st.shape
    wo = uwt.shape[1]
    return pl.pallas_call(
        _width_up_kernel,
        out_shape=jax.ShapeDtypeStruct((n, k, hi, wo), jnp.float32),
        grid=(n, k),
        in_specs=[
            pl.BlockSpec((1, 1, hi, wi), lambda i, c: (i, c, 0, 0)),
            pl.BlockSpec((wi, wo), lambda i, c: (0, 0)),
        ],
        out_specs=pl.BlockSpec((1, 1, hi, wo), lambda i, c: (i, c, 0, 0)),
        compiler_params=pltpu.CompilerParams(
            dimension_semantics=("parallel", "parallel"),
            vmem_limit_bytes=_VMEM_LIMIT),
    )(st, uwt)


# ---------------------------------------------------------------------------
# Kernel B: per-class height upsample + log_softmax over classes, NCHW output
# ---------------------------------------------------------------------------
def _height_up_logsoftmax_kernel(t_ref, uh_ref, o_ref):
    """t: (1, K, Hi, Wo) f32; uh: (TP, Hi) f32; o: (1, K, TP, Wo) f32 (NCHW)."""
    k_cls = t_ref.shape[1]
    uh = uh_ref[...]
    # height upsample per class; running max folded into the same loop.
    m = None
    for k in range(k_cls):
        yk = jnp.dot(uh, t_ref[0, k], preferred_element_type=jnp.float32)
        o_ref[0, k] = yk
        m = yk if m is None else jnp.maximum(m, yk)
    # log_softmax over the class axis, streamed class-by-class from VMEM.
    se = jnp.zeros_like(m)
    for k in range(k_cls):
        se = se + jnp.exp(o_ref[0, k] - m)
    lse = m + jnp.log(se)
    for k in range(k_cls):
        o_ref[0, k] = o_ref[0, k] - lse


def height_up_logsoftmax(t, uh):
    """t: (N, K, Hi, Wo) f32 -> (N, K, Ho, Wo) f32 log-probabilities (NCHW)."""
    n, k, hi, wo = t.shape
    ho = uh.shape[0]
    tp = _pick_out_row_tile(ho, cap=256)   # output-row tile (parallel axis)
    pb = ho // tp
    return pl.pallas_call(
        _height_up_logsoftmax_kernel,
        out_shape=jax.ShapeDtypeStruct((n, k, ho, wo), jnp.float32),
        grid=(n, pb),
        in_specs=[
            pl.BlockSpec((1, k, hi, wo), lambda i, p: (i, 0, 0, 0)),
            pl.BlockSpec((tp, hi), lambda i, p: (p, 0)),
        ],
        out_specs=pl.BlockSpec((1, k, tp, wo), lambda i, p: (i, 0, p, 0)),
        compiler_params=pltpu.CompilerParams(
            dimension_semantics=("parallel", "parallel"),
            vmem_limit_bytes=_VMEM_LIMIT),
    )(t, uh)


# ---------------------------------------------------------------------------
# Fixed bilinear transposed-conv weights (fill_up_weights), separable 1-D form
# ---------------------------------------------------------------------------
def build_up_matrix(hi, kernel=16, stride=8, pad=4):
    """U[p, i] = bilinear tap linking output row p to input row i.
    conv_transpose output size = (hi-1)*stride - 2*pad + kernel = 8*hi."""
    ho = (hi - 1) * stride - 2 * pad + kernel
    f = math.ceil(kernel / 2)
    c = (2 * f - 1 - f % 2) / (2.0 * f)
    f1d = [(1 - abs(i / f - c)) for i in range(kernel)]
    rows = []
    for p in range(ho):
        row = []
        for i in range(hi):
            kk = p + pad - stride * i
            row.append(f1d[kk] if 0 <= kk < kernel else 0.0)
        rows.append(row)
    return jnp.array(rows, dtype=jnp.float32)           # (Ho, Hi)


# ---------------------------------------------------------------------------
# Parameters (deterministic, synthetic base)
# ---------------------------------------------------------------------------
def init_params(key, in_ch=3, classes=6, out_dim=32):
    chans = [in_ch, 8, 16, out_dim]
    keys = jax.random.split(key, 4)
    base = []
    for li in range(3):
        cin, cout = chans[li], chans[li + 1]
        std = math.sqrt(2.0 / (3 * 3 * cout))
        w = (std * jax.random.normal(keys[li], (3, 3, cin, cout),
                                     jnp.float32)).astype(jnp.bfloat16)
        b = jnp.zeros((cout,), jnp.float32)
        base.append((w, b))
    # seg 1x1 conv init as in DRNSeg.__init__: N(0, sqrt(2/classes)), zero bias
    std = math.sqrt(2.0 / classes)
    w_seg = std * jax.random.normal(keys[3], (classes, out_dim), jnp.float32)
    b_seg = jnp.zeros((classes,), jnp.float32)
    return {"base": base, "w_seg": w_seg, "b_seg": b_seg}


# ---------------------------------------------------------------------------
# Forward (DRNSeg_inference: only the log-softmax branch is returned)
# ---------------------------------------------------------------------------
def drnseg_inference_forward(x_nchw, params):
    # NCHW -> NHWC, bf16 operands for the MXU (f32 accumulation inside kernels)
    x = jnp.transpose(x_nchw, (0, 2, 3, 1)).astype(jnp.bfloat16)
    (w1, b1), (w2, b2), (w3, b3) = params["base"]
    x = conv3x3_s2_relu(x, w1, b1)                       # synthetic /8 base
    x = conv3x3_s2_relu(x, w2, b2)
    # last base conv with the seg 1x1 conv fused on the MXU
    s = conv3x3_s2_relu_seg(x, w3, b3, params["w_seg"], params["b_seg"])
    # tiny class-major transpose of the low-res seg map (N, Hi, Wi, K) -> NCHW
    st = jnp.transpose(s, (0, 3, 1, 2))                  # (N, K, Hi, Wi) f32
    n, k, hi, wi = st.shape
    uwt = build_up_matrix(wi).T                          # (Wi, Wo) f32
    uh = build_up_matrix(hi)                             # (Ho, Hi) f32
    # separable fixed-bilinear ConvTranspose2d(16, s=8, p=4, groups=classes):
    # hoisted, p-invariant width-up kernel, then row-tiled height-up+logsoftmax
    t = width_up(st, uwt)                                # (N, K, Hi, Wo) f32
    return height_up_logsoftmax(t, uh)                   # (N, K, Ho, Wo) f32


if __name__ == "__main__":
    key = jax.random.PRNGKey(0)
    kx, kp = jax.random.split(key)
    N, C, H, W = 2, 3, 64, 64
    classes = 6
    x = jax.random.normal(kx, (N, C, H, W), dtype=jnp.float32)
    params = init_params(kp, in_ch=C, classes=classes, out_dim=32)

    fwd = jax.jit(drnseg_inference_forward)
    out = jax.block_until_ready(fwd(x, params))

    assert out.shape == (N, classes, H, W), out.shape
    assert bool(jnp.all(jnp.isfinite(out))), "non-finite log-probs"
    # log_softmax sanity: exp over the class axis sums to 1 at every pixel
    sums = jnp.sum(jnp.exp(out), axis=1)
    assert bool(jnp.all(jnp.abs(sums - 1.0) < 1e-3)), "log_softmax check failed"
    print("KERNEL_OK")
</pallas_src>

<mosaic_0001>
module attributes {stable_mosaic.version = 11 : i64} {
  func.func @_conv3x3s2_relu_kernel(%arg0: i32, %arg1: i32, %arg2: memref<1x32x32x9xbf16, #tpu.memory_space<vmem>>, %arg3: memref<1x1x32x9xbf16, #tpu.memory_space<vmem>>, %arg4: memref<1x32x32x9xbf16, #tpu.memory_space<vmem>>, %arg5: memref<3x9x8xbf16, #tpu.memory_space<vmem>>, %arg6: memref<1x8xf32, #tpu.memory_space<vmem>>, %arg7: memref<1x32x32x8xbf16, #tpu.memory_space<vmem>>) attributes {dimension_semantics = [#tpu.dimension_semantics<parallel>, #tpu.dimension_semantics<parallel>], iteration_bounds = array<i64: 2, 1>, scalar_prefetch = 0 : i64, scratch_operands = 0 : i64, tpu.core_type = #tpu.core_type<tc>, window_params = [{transform_indices = @transform_0, window_bounds = array<i64: 1, 32, 32, 9>}, {transform_indices = @transform_1, window_bounds = array<i64: 1, 1, 32, 9>}, {transform_indices = @transform_2, window_bounds = array<i64: 1, 32, 32, 9>}, {pipeline_mode = #tpu.pipeline_mode<synchronous>, transform_indices = @transform_3, window_bounds = array<i64: 3, 9, 8>}, {pipeline_mode = #tpu.pipeline_mode<synchronous>, transform_indices = @transform_4, window_bounds = array<i64: 1, 8>}, {transform_indices = @transform_5, window_bounds = array<i64: 1, 32, 32, 8>}]} {
    %c0 = arith.constant 0 : index
    %c0_0 = arith.constant 0 : index
    %c0_1 = arith.constant 0 : index
    %c0_2 = arith.constant 0 : index
    %0 = vector.load %arg2[%c0, %c0_0, %c0_1, %c0_2] : memref<1x32x32x9xbf16, #tpu.memory_space<vmem>>, vector<1x32x32x9xbf16>
    %1 = vector.shape_cast %0 : vector<1x32x32x9xbf16> to vector<32x32x9xbf16>
    %2 = vector.shape_cast %1 : vector<32x32x9xbf16> to vector<1024x9xbf16>
    %c0_3 = arith.constant 0 : index
    %c0_4 = arith.constant 0 : index
    %c0_5 = arith.constant 0 : index
    %c0_6 = arith.constant 0 : index
    %3 = vector.load %arg4[%c0_3, %c0_4, %c0_5, %c0_6] : memref<1x32x32x9xbf16, #tpu.memory_space<vmem>>, vector<1x32x32x9xbf16>
    %4 = vector.shape_cast %3 : vector<1x32x32x9xbf16> to vector<32x32x9xbf16>
    %5 = vector.shape_cast %4 : vector<32x32x9xbf16> to vector<1024x9xbf16>
    %6 = vector.extract_strided_slice %1 {offsets = [1, 0, 0], sizes = [31, 32, 9], strides = [1, 1, 1]} : vector<32x32x9xbf16> to vector<31x32x9xbf16>
    %c0_7 = arith.constant 0 : index
    %c0_8 = arith.constant 0 : index
    %c0_9 = arith.constant 0 : index
    %c0_10 = arith.constant 0 : index
    %7 = vector.load %arg3[%c0_7, %c0_8, %c0_9, %c0_10] : memref<1x1x32x9xbf16, #tpu.memory_space<vmem>>, vector<1x1x32x9xbf16>
    %8 = vector.shape_cast %7 : vector<1x1x32x9xbf16> to vector<1x32x9xbf16>
    %9 = tpu.concatenate %6, %8 in 0 : vector<31x32x9xbf16>, vector<1x32x9xbf16> -> vector<32x32x9xbf16>
    %10 = vector.shape_cast %9 : vector<32x32x9xbf16> to vector<1024x9xbf16>
    %c0_11 = arith.constant 0 : index
    %c0_12 = arith.constant 0 : index
    %c0_13 = arith.constant 0 : index
    %11 = vector.load %arg5[%c0_11, %c0_12, %c0_13] : memref<3x9x8xbf16, #tpu.memory_space<vmem>>, vector<1x9x8xbf16>
    %12 = vector.shape_cast %11 : vector<1x9x8xbf16> to vector<9x8xbf16>
    %cst = arith.constant dense<0.000000e+00> : vector<1024x8xf32>
    %13 = tpu.matmul %2, %12, %cst {dimension_numbers = #tpu.dot_dimension_numbers<[1], [0], [0], [1], [0, 0, 1, 1], [], []>} : vector<1024x9xbf16>, vector<9x8xbf16>, vector<1024x8xf32> -> vector<1024x8xf32>
    %c1 = arith.constant 1 : index
    %c0_14 = arith.constant 0 : index
    %c0_15 = arith.constant 0 : index
    %14 = vector.load %arg5[%c1, %c0_14, %c0_15] : memref<3x9x8xbf16, #tpu.memory_space<vmem>>, vector<1x9x8xbf16>
    %15 = vector.shape_cast %14 : vector<1x9x8xbf16> to vector<9x8xbf16>
    %cst_16 = arith.constant dense<0.000000e+00> : vector<1024x8xf32>
    %16 = tpu.matmul %5, %15, %cst_16 {dimension_numbers = #tpu.dot_dimension_numbers<[1], [0], [0], [1], [0, 0, 1, 1], [], []>} : vector<1024x9xbf16>, vector<9x8xbf16>, vector<1024x8xf32> -> vector<1024x8xf32>
    %17 = arith.addf %13, %16 : vector<1024x8xf32>
    %c2 = arith.constant 2 : index
    %c0_17 = arith.constant 0 : index
    %c0_18 = arith.constant 0 : index
    %18 = vector.load %arg5[%c2, %c0_17, %c0_18] : memref<3x9x8xbf16, #tpu.memory_space<vmem>>, vector<1x9x8xbf16>
    %19 = vector.shape_cast %18 : vector<1x9x8xbf16> to vector<9x8xbf16>
    %cst_19 = arith.constant dense<0.000000e+00> : vector<1024x8xf32>
    %20 = tpu.matmul %10, %19, %cst_19 {dimension_numbers = #tpu.dot_dimension_numbers<[1], [0], [0], [1], [0, 0, 1, 1], [], []>} : vector<1024x9xbf16>, vector<9x8xbf16>, vector<1024x8xf32> -> vector<1024x8xf32>
    %21 = arith.addf %17, %20 : vector<1024x8xf32>
    %c0_20 = arith.constant 0 : index
    %c0_21 = arith.constant 0 : index
    %22 = vector.load %arg6[%c0_20, %c0_21] : memref<1x8xf32, #tpu.memory_space<vmem>>, vector<1x8xf32>
    %23 = vector.broadcast %22 : vector<1x8xf32> to vector<1024x8xf32>
    %24 = arith.addf %21, %23 : vector<1024x8xf32>
    %cst_22 = arith.constant 0.000000e+00 : f32
    %25 = vector.broadcast %cst_22 : f32 to vector<1024x8xf32>
    %26 = arith.maximumf %24, %25 : vector<1024x8xf32>
    %27 = vector.shape_cast %26 : vector<1024x8xf32> to vector<1x32x32x8xf32>
    %28 = arith.truncf %27 : vector<1x32x32x8xf32> to vector<1x32x32x8xbf16>
    %c0_23 = arith.constant 0 : index
    %c0_24 = arith.constant 0 : index
    %c0_25 = arith.constant 0 : index
    %c0_26 = arith.constant 0 : index
    %29 = vector.load %arg7[%c0_23, %c0_24, %c0_25, %c0_26] : memref<1x32x32x8xbf16, #tpu.memory_space<vmem>>, vector<1x32x32x8xbf16>
    tpu.vector_store %arg7[%c0_23, %c0_24, %c0_25, %c0_26], %28 {strides = array<i32>} : memref<1x32x32x8xbf16, #tpu.memory_space<vmem>>, vector<1x32x32x8xbf16>,
    return
  }
  func.func @transform_0(%arg0: i32, %arg1: i32) -> (i32, i32, i32, i32) {
    %c0_i32 = arith.constant 0 : i32
    %c0_i32_0 = arith.constant 0 : i32
    %c0_i32_1 = arith.constant 0 : i32
    return %arg0, %arg1, %c0_i32, %c0_i32_0 : i32, i32, i32, i32
  }
  func.func @transform_1(%arg0: i32, %arg1: i32) -> (i32, i32, i32, i32) {
    %c1_i32 = arith.constant 1 : i32
    %0 = arith.addi %arg1, %c1_i32 : i32
    %c32_i32 = arith.constant 32 : i32
    %1 = arith.muli %0, %c32_i32 : i32
    %c0_i32 = arith.constant 0 : i32
    %c0_i32_0 = arith.constant 0 : i32
    %c0_i32_1 = arith.constant 0 : i32
    return %arg0, %1, %c0_i32, %c0_i32_0 : i32, i32, i32, i32
  }
  func.func @transform_2(%arg0: i32, %arg1: i32) -> (i32, i32, i32, i32) {
    %c0_i32 = arith.constant 0 : i32
    %c0_i32_0 = arith.constant 0 : i32
    %c0_i32_1 = arith.constant 0 : i32
    return %arg0, %arg1, %c0_i32, %c0_i32_0 : i32, i32, i32, i32
  }
  func.func @transform_3(%arg0: i32, %arg1: i32) -> (i32, i32, i32) {
    %c0_i32 = arith.constant 0 : i32
    %c0_i32_0 = arith.constant 0 : i32
    %c0_i32_1 = arith.constant 0 : i32
    %c0_i32_2 = arith.constant 0 : i32
    return %c0_i32, %c0_i32_0, %c0_i32_1 : i32, i32, i32
  }
  func.func @transform_4(%arg0: i32, %arg1: i32) -> (i32, i32) {
    %c0_i32 = arith.constant 0 : i32
    %c0_i32_0 = arith.constant 0 : i32
    %c0_i32_1 = arith.constant 0 : i32
    return %c0_i32, %c0_i32_0 : i32, i32
  }
  func.func @transform_5(%arg0: i32, %arg1: i32) -> (i32, i32, i32, i32) {
    %c0_i32 = arith.constant 0 : i32
    %c0_i32_0 = arith.constant 0 : i32
    %c0_i32_1 = arith.constant 0 : i32
    return %arg0, %arg1, %c0_i32, %c0_i32_0 : i32, i32, i32, i32
  }
}

module attributes {stable_mosaic.version = 11 : i64} {
  func.func @_conv3x3s2_relu_kernel(%arg0: i32, %arg1: i32, %arg2: memref<1x16x16x24xbf16, #tpu.memory_space<vmem>>, %arg3: memref<1x1x16x24xbf16, #tpu.memory_space<vmem>>, %arg4: memref<1x16x16x24xbf16, #tpu.memory_space<vmem>>, %arg5: memref<3x24x16xbf16, #tpu.memory_space<vmem>>, %arg6: memref<1x16xf32, #tpu.memory_space<vmem>>, %arg7: memref<1x16x16x16xbf16, #tpu.memory_space<vmem>>) attributes {dimension_semantics = [#tpu.dimension_semantics<parallel>, #tpu.dimension_semantics<parallel>], iteration_bounds = array<i64: 2, 1>, scalar_prefetch = 0 : i64, scratch_operands = 0 : i64, tpu.core_type = #tpu.core_type<tc>, window_params = [{transform_indices = @transform_0, window_bounds = array<i64: 1, 16, 16, 24>}, {transform_indices = @transform_1, window_bounds = array<i64: 1, 1, 16, 24>}, {transform_indices = @transform_2, window_bounds = array<i64: 1, 16, 16, 24>}, {pipeline_mode = #tpu.pipeline_mode<synchronous>, transform_indices = @transform_3, window_bounds = array<i64: 3, 24, 16>}, {pipeline_mode = #tpu.pipeline_mode<synchronous>, transform_indices = @transform_4, window_bounds = array<i64: 1, 16>}, {transform_indices = @transform_5, window_bounds = array<i64: 1, 16, 16, 16>}]} {
    %c0 = arith.constant 0 : index
    %c0_0 = arith.constant 0 : index
    %c0_1 = arith.constant 0 : index
    %c0_2 = arith.constant 0 : index
    %0 = vector.load %arg2[%c0, %c0_0, %c0_1, %c0_2] : memref<1x16x16x24xbf16, #tpu.memory_space<vmem>>, vector<1x16x16x24xbf16>
    %1 = vector.shape_cast %0 : vector<1x16x16x24xbf16> to vector<16x16x24xbf16>
    %2 = vector.shape_cast %1 : vector<16x16x24xbf16> to vector<256x24xbf16>
    %c0_3 = arith.constant 0 : index
    %c0_4 = arith.constant 0 : index
    %c0_5 = arith.constant 0 : index
    %c0_6 = arith.constant 0 : index
    %3 = vector.load %arg4[%c0_3, %c0_4, %c0_5, %c0_6] : memref<1x16x16x24xbf16, #tpu.memory_space<vmem>>, vector<1x16x16x24xbf16>
    %4 = vector.shape_cast %3 : vector<1x16x16x24xbf16> to vector<16x16x24xbf16>
    %5 = vector.shape_cast %4 : vector<16x16x24xbf16> to vector<256x24xbf16>
    %6 = vector.extract_strided_slice %1 {offsets = [1, 0, 0], sizes = [15, 16, 24], strides = [1, 1, 1]} : vector<16x16x24xbf16> to vector<15x16x24xbf16>
    %c0_7 = arith.constant 0 : index
    %c0_8 = arith.constant 0 : index
    %c0_9 = arith.constant 0 : index
    %c0_10 = arith.constant 0 : index
    %7 = vector.load %arg3[%c0_7, %c0_8, %c0_9, %c0_10] : memref<1x1x16x24xbf16, #tpu.memory_space<vmem>>, vector<1x1x16x24xbf16>
    %8 = vector.shape_cast %7 : vector<1x1x16x24xbf16> to vector<1x16x24xbf16>
    %9 = tpu.concatenate %6, %8 in 0 : vector<15x16x24xbf16>, vector<1x16x24xbf16> -> vector<16x16x24xbf16>
    %10 = vector.shape_cast %9 : vector<16x16x24xbf16> to vector<256x24xbf16>
    %c0_11 = arith.constant 0 : index
    %c0_12 = arith.constant 0 : index
    %c0_13 = arith.constant 0 : index
    %11 = vector.load %arg5[%c0_11, %c0_12, %c0_13] : memref<3x24x16xbf16, #tpu.memory_space<vmem>>, vector<1x24x16xbf16>
    %12 = vector.shape_cast %11 : vector<1x24x16xbf16> to vector<24x16xbf16>
    %cst = arith.constant dense<0.000000e+00> : vector<256x16xf32>
    %13 = tpu.matmul %2, %12, %cst {dimension_numbers = #tpu.dot_dimension_numbers<[1], [0], [0], [1], [0, 0, 1, 1], [], []>} : vector<256x24xbf16>, vector<24x16xbf16>, vector<256x16xf32> -> vector<256x16xf32>
    %c1 = arith.constant 1 : index
    %c0_14 = arith.constant 0 : index
    %c0_15 = arith.constant 0 : index
    %14 = vector.load %arg5[%c1, %c0_14, %c0_15] : memref<3x24x16xbf16, #tpu.memory_space<vmem>>, vector<1x24x16xbf16>
    %15 = vector.shape_cast %14 : vector<1x24x16xbf16> to vector<24x16xbf16>
    %cst_16 = arith.constant dense<0.000000e+00> : vector<256x16xf32>
    %16 = tpu.matmul %5, %15, %cst_16 {dimension_numbers = #tpu.dot_dimension_numbers<[1], [0], [0], [1], [0, 0, 1, 1], [], []>} : vector<256x24xbf16>, vector<24x16xbf16>, vector<256x16xf32> -> vector<256x16xf32>
    %17 = arith.addf %13, %16 : vector<256x16xf32>
    %c2 = arith.constant 2 : index
    %c0_17 = arith.constant 0 : index
    %c0_18 = arith.constant 0 : index
    %18 = vector.load %arg5[%c2, %c0_17, %c0_18] : memref<3x24x16xbf16, #tpu.memory_space<vmem>>, vector<1x24x16xbf16>
    %19 = vector.shape_cast %18 : vector<1x24x16xbf16> to vector<24x16xbf16>
    %cst_19 = arith.constant dense<0.000000e+00> : vector<256x16xf32>
    %20 = tpu.matmul %10, %19, %cst_19 {dimension_numbers = #tpu.dot_dimension_numbers<[1], [0], [0], [1], [0, 0, 1, 1], [], []>} : vector<256x24xbf16>, vector<24x16xbf16>, vector<256x16xf32> -> vector<256x16xf32>
    %21 = arith.addf %17, %20 : vector<256x16xf32>
    %c0_20 = arith.constant 0 : index
    %c0_21 = arith.constant 0 : index
    %22 = vector.load %arg6[%c0_20, %c0_21] : memref<1x16xf32, #tpu.memory_space<vmem>>, vector<1x16xf32>
    %23 = vector.broadcast %22 : vector<1x16xf32> to vector<256x16xf32>
    %24 = arith.addf %21, %23 : vector<256x16xf32>
    %cst_22 = arith.constant 0.000000e+00 : f32
    %25 = vector.broadcast %cst_22 : f32 to vector<256x16xf32>
    %26 = arith.maximumf %24, %25 : vector<256x16xf32>
    %27 = vector.shape_cast %26 : vector<256x16xf32> to vector<1x16x16x16xf32>
    %28 = arith.truncf %27 : vector<1x16x16x16xf32> to vector<1x16x16x16xbf16>
    %c0_23 = arith.constant 0 : index
    %c0_24 = arith.constant 0 : index
    %c0_25 = arith.constant 0 : index
    %c0_26 = arith.constant 0 : index
    %29 = vector.load %arg7[%c0_23, %c0_24, %c0_25, %c0_26] : memref<1x16x16x16xbf16, #tpu.memory_space<vmem>>, vector<1x16x16x16xbf16>
    tpu.vector_store %arg7[%c0_23, %c0_24, %c0_25, %c0_26], %28 {strides = array<i32>} : memref<1x16x16x16xbf16, #tpu.memory_space<vmem>>, vector<1x16x16x16xbf16>,
    return
  }
  func.func @transform_0(%arg0: i32, %arg1: i32) -> (i32, i32, i32, i32) {
    %c0_i32 = arith.constant 0 : i32
    %c0_i32_0 = arith.constant 0 : i32
    %c0_i32_1 = arith.constant 0 : i32
    return %arg0, %arg1, %c0_i32, %c0_i32_0 : i32, i32, i32, i32
  }
  func.func @transform_1(%arg0: i32, %arg1: i32) -> (i32, i32, i32, i32) {
    %c1_i32 = arith.constant 1 : i32
    %0 = arith.addi %arg1, %c1_i32 : i32
    %c16_i32 = arith.constant 16 : i32
    %1 = arith.muli %0, %c16_i32 : i32
    %c0_i32 = arith.constant 0 : i32
    %c0_i32_0 = arith.constant 0 : i32
    %c0_i32_1 = arith.constant 0 : i32
    return %arg0, %1, %c0_i32, %c0_i32_0 : i32, i32, i32, i32
  }
  func.func @transform_2(%arg0: i32, %arg1: i32) -> (i32, i32, i32, i32) {
    %c0_i32 = arith.constant 0 : i32
    %c0_i32_0 = arith.constant 0 : i32
    %c0_i32_1 = arith.constant 0 : i32
    return %arg0, %arg1, %c0_i32, %c0_i32_0 : i32, i32, i32, i32
  }
  func.func @transform_3(%arg0: i32, %arg1: i32) -> (i32, i32, i32) {
    %c0_i32 = arith.constant 0 : i32
    %c0_i32_0 = arith.constant 0 : i32
    %c0_i32_1 = arith.constant 0 : i32
    %c0_i32_2 = arith.constant 0 : i32
    return %c0_i32, %c0_i32_0, %c0_i32_1 : i32, i32, i32
  }
  func.func @transform_4(%arg0: i32, %arg1: i32) -> (i32, i32) {
    %c0_i32 = arith.constant 0 : i32
    %c0_i32_0 = arith.constant 0 : i32
    %c0_i32_1 = arith.constant 0 : i32
    return %c0_i32, %c0_i32_0 : i32, i32
  }
  func.func @transform_5(%arg0: i32, %arg1: i32) -> (i32, i32, i32, i32) {
    %c0_i32 = arith.constant 0 : i32
    %c0_i32_0 = arith.constant 0 : i32
    %c0_i32_1 = arith.constant 0 : i32
    return %arg0, %arg1, %c0_i32, %c0_i32_0 : i32, i32, i32, i32
  }
}

module attributes {stable_mosaic.version = 11 : i64} {
  func.func @_conv3x3s2_relu_seg_kernel(%arg0: i32, %arg1: i32, %arg2: memref<1x8x8x48xbf16, #tpu.memory_space<vmem>>, %arg3: memref<1x1x8x48xbf16, #tpu.memory_space<vmem>>, %arg4: memref<1x8x8x48xbf16, #tpu.memory_space<vmem>>, %arg5: memref<3x48x32xbf16, #tpu.memory_space<vmem>>, %arg6: memref<1x32xf32, #tpu.memory_space<vmem>>, %arg7: memref<32x6xf32, #tpu.memory_space<vmem>>, %arg8: memref<1x6xf32, #tpu.memory_space<vmem>>, %arg9: memref<1x8x8x6xf32, #tpu.memory_space<vmem>>) attributes {dimension_semantics = [#tpu.dimension_semantics<parallel>, #tpu.dimension_semantics<parallel>], iteration_bounds = array<i64: 2, 1>, scalar_prefetch = 0 : i64, scratch_operands = 0 : i64, tpu.core_type = #tpu.core_type<tc>, window_params = [{transform_indices = @transform_0, window_bounds = array<i64: 1, 8, 8, 48>}, {transform_indices = @transform_1, window_bounds = array<i64: 1, 1, 8, 48>}, {transform_indices = @transform_2, window_bounds = array<i64: 1, 8, 8, 48>}, {pipeline_mode = #tpu.pipeline_mode<synchronous>, transform_indices = @transform_3, window_bounds = array<i64: 3, 48, 32>}, {pipeline_mode = #tpu.pipeline_mode<synchronous>, transform_indices = @transform_4, window_bounds = array<i64: 1, 32>}, {pipeline_mode = #tpu.pipeline_mode<synchronous>, transform_indices = @transform_5, window_bounds = array<i64: 32, 6>}, {pipeline_mode = #tpu.pipeline_mode<synchronous>, transform_indices = @transform_6, window_bounds = array<i64: 1, 6>}, {transform_indices = @transform_7, window_bounds = array<i64: 1, 8, 8, 6>}]} {
    %c0 = arith.constant 0 : index
    %c0_0 = arith.constant 0 : index
    %c0_1 = arith.constant 0 : index
    %c0_2 = arith.constant 0 : index
    %0 = vector.load %arg2[%c0, %c0_0, %c0_1, %c0_2] : memref<1x8x8x48xbf16, #tpu.memory_space<vmem>>, vector<1x8x8x48xbf16>
    %1 = vector.shape_cast %0 : vector<1x8x8x48xbf16> to vector<8x8x48xbf16>
    %2 = vector.shape_cast %1 : vector<8x8x48xbf16> to vector<64x48xbf16>
    %c0_3 = arith.constant 0 : index
    %c0_4 = arith.constant 0 : index
    %c0_5 = arith.constant 0 : index
    %c0_6 = arith.constant 0 : index
    %3 = vector.load %arg4[%c0_3, %c0_4, %c0_5, %c0_6] : memref<1x8x8x48xbf16, #tpu.memory_space<vmem>>, vector<1x8x8x48xbf16>
    %4 = vector.shape_cast %3 : vector<1x8x8x48xbf16> to vector<8x8x48xbf16>
    %5 = vector.shape_cast %4 : vector<8x8x48xbf16> to vector<64x48xbf16>
    %6 = vector.extract_strided_slice %1 {offsets = [1, 0, 0], sizes = [7, 8, 48], strides = [1, 1, 1]} : vector<8x8x48xbf16> to vector<7x8x48xbf16>
    %c0_7 = arith.constant 0 : index
    %c0_8 = arith.constant 0 : index
    %c0_9 = arith.constant 0 : index
    %c0_10 = arith.constant 0 : index
    %7 = vector.load %arg3[%c0_7, %c0_8, %c0_9, %c0_10] : memref<1x1x8x48xbf16, #tpu.memory_space<vmem>>, vector<1x1x8x48xbf16>
    %8 = vector.shape_cast %7 : vector<1x1x8x48xbf16> to vector<1x8x48xbf16>
    %9 = tpu.concatenate %6, %8 in 0 : vector<7x8x48xbf16>, vector<1x8x48xbf16> -> vector<8x8x48xbf16>
    %10 = vector.shape_cast %9 : vector<8x8x48xbf16> to vector<64x48xbf16>
    %c0_11 = arith.constant 0 : index
    %c0_12 = arith.constant 0 : index
    %c0_13 = arith.constant 0 : index
    %11 = vector.load %arg5[%c0_11, %c0_12, %c0_13] : memref<3x48x32xbf16, #tpu.memory_space<vmem>>, vector<1x48x32xbf16>
    %12 = vector.shape_cast %11 : vector<1x48x32xbf16> to vector<48x32xbf16>
    %cst = arith.constant dense<0.000000e+00> : vector<64x32xf32>
    %13 = tpu.matmul %2, %12, %cst {dimension_numbers = #tpu.dot_dimension_numbers<[1], [0], [0], [1], [0, 0, 1, 1], [], []>} : vector<64x48xbf16>, vector<48x32xbf16>, vector<64x32xf32> -> vector<64x32xf32>
    %c1 = arith.constant 1 : index
    %c0_14 = arith.constant 0 : index
    %c0_15 = arith.constant 0 : index
    %14 = vector.load %arg5[%c1, %c0_14, %c0_15] : memref<3x48x32xbf16, #tpu.memory_space<vmem>>, vector<1x48x32xbf16>
    %15 = vector.shape_cast %14 : vector<1x48x32xbf16> to vector<48x32xbf16>
    %cst_16 = arith.constant dense<0.000000e+00> : vector<64x32xf32>
    %16 = tpu.matmul %5, %15, %cst_16 {dimension_numbers = #tpu.dot_dimension_numbers<[1], [0], [0], [1], [0, 0, 1, 1], [], []>} : vector<64x48xbf16>, vector<48x32xbf16>, vector<64x32xf32> -> vector<64x32xf32>
    %17 = arith.addf %13, %16 : vector<64x32xf32>
    %c2 = arith.constant 2 : index
    %c0_17 = arith.constant 0 : index
    %c0_18 = arith.constant 0 : index
    %18 = vector.load %arg5[%c2, %c0_17, %c0_18] : memref<3x48x32xbf16, #tpu.memory_space<vmem>>, vector<1x48x32xbf16>
    %19 = vector.shape_cast %18 : vector<1x48x32xbf16> to vector<48x32xbf16>
    %cst_19 = arith.constant dense<0.000000e+00> : vector<64x32xf32>
    %20 = tpu.matmul %10, %19, %cst_19 {dimension_numbers = #tpu.dot_dimension_numbers<[1], [0], [0], [1], [0, 0, 1, 1], [], []>} : vector<64x48xbf16>, vector<48x32xbf16>, vector<64x32xf32> -> vector<64x32xf32>
    %21 = arith.addf %17, %20 : vector<64x32xf32>
    %c0_20 = arith.constant 0 : index
    %c0_21 = arith.constant 0 : index
    %22 = vector.load %arg6[%c0_20, %c0_21] : memref<1x32xf32, #tpu.memory_space<vmem>>, vector<1x32xf32>
    %23 = vector.broadcast %22 : vector<1x32xf32> to vector<64x32xf32>
    %24 = arith.addf %21, %23 : vector<64x32xf32>
    %cst_22 = arith.constant 0.000000e+00 : f32
    %25 = vector.broadcast %cst_22 : f32 to vector<64x32xf32>
    %26 = arith.maximumf %24, %25 : vector<64x32xf32>
    %c0_23 = arith.constant 0 : index
    %c0_24 = arith.constant 0 : index
    %27 = vector.load %arg7[%c0_23, %c0_24] : memref<32x6xf32, #tpu.memory_space<vmem>>, vector<32x6xf32>
    %cst_25 = arith.constant dense<0.000000e+00> : vector<64x6xf32>
    %28 = tpu.matmul %26, %27, %cst_25 {dimension_numbers = #tpu.dot_dimension_numbers<[1], [0], [0], [1], [0, 0, 1, 1], [], []>} : vector<64x32xf32>, vector<32x6xf32>, vector<64x6xf32> -> vector<64x6xf32>
    %c0_26 = arith.constant 0 : index
    %c0_27 = arith.constant 0 : index
    %29 = vector.load %arg8[%c0_26, %c0_27] : memref<1x6xf32, #tpu.memory_space<vmem>>, vector<1x6xf32>
    %30 = vector.broadcast %29 : vector<1x6xf32> to vector<64x6xf32>
    %31 = arith.addf %28, %30 : vector<64x6xf32>
    %32 = vector.shape_cast %31 : vector<64x6xf32> to vector<1x8x8x6xf32>
    %c0_28 = arith.constant 0 : index
    %c0_29 = arith.constant 0 : index
    %c0_30 = arith.constant 0 : index
    %c0_31 = arith.constant 0 : index
    %33 = vector.load %arg9[%c0_28, %c0_29, %c0_30, %c0_31] : memref<1x8x8x6xf32, #tpu.memory_space<vmem>>, vector<1x8x8x6xf32>
    tpu.vector_store %arg9[%c0_28, %c0_29, %c0_30, %c0_31], %32 {strides = array<i32>} : memref<1x8x8x6xf32, #tpu.memory_space<vmem>>, vector<1x8x8x6xf32>,
    return
  }
  func.func @transform_0(%arg0: i32, %arg1: i32) -> (i32, i32, i32, i32) {
    %c0_i32 = arith.constant 0 : i32
    %c0_i32_0 = arith.constant 0 : i32
    %c0_i32_1 = arith.constant 0 : i32
    return %arg0, %arg1, %c0_i32, %c0_i32_0 : i32, i32, i32, i32
  }
  func.func @transform_1(%arg0: i32, %arg1: i32) -> (i32, i32, i32, i32) {
    %c1_i32 = arith.constant 1 : i32
    %0 = arith.addi %arg1, %c1_i32 : i32
    %c8_i32 = arith.constant 8 : i32
    %1 = arith.muli %0, %c8_i32 : i32
    %c0_i32 = arith.constant 0 : i32
    %c0_i32_0 = arith.constant 0 : i32
    %c0_i32_1 = arith.constant 0 : i32
    return %arg0, %1, %c0_i32, %c0_i32_0 : i32, i32, i32, i32
  }
  func.func @transform_2(%arg0: i32, %arg1: i32) -> (i32, i32, i32, i32) {
    %c0_i32 = arith.constant 0 : i32
    %c0_i32_0 = arith.constant 0 : i32
    %c0_i32_1 = arith.constant 0 : i32
    return %arg0, %arg1, %c0_i32, %c0_i32_0 : i32, i32, i32, i32
  }
  func.func @transform_3(%arg0: i32, %arg1: i32) -> (i32, i32, i32) {
    %c0_i32 = arith.constant 0 : i32
    %c0_i32_0 = arith.constant 0 : i32
    %c0_i32_1 = arith.constant 0 : i32
    %c0_i32_2 = arith.constant 0 : i32
    return %c0_i32, %c0_i32_0, %c0_i32_1 : i32, i32, i32
  }
  func.func @transform_4(%arg0: i32, %arg1: i32) -> (i32, i32) {
    %c0_i32 = arith.constant 0 : i32
    %c0_i32_0 = arith.constant 0 : i32
    %c0_i32_1 = arith.constant 0 : i32
    return %c0_i32, %c0_i32_0 : i32, i32
  }
  func.func @transform_5(%arg0: i32, %arg1: i32) -> (i32, i32) {
    %c0_i32 = arith.constant 0 : i32
    %c0_i32_0 = arith.constant 0 : i32
    %c0_i32_1 = arith.constant 0 : i32
    return %c0_i32, %c0_i32_0 : i32, i32
  }
  func.func @transform_6(%arg0: i32, %arg1: i32) -> (i32, i32) {
    %c0_i32 = arith.constant 0 : i32
    %c0_i32_0 = arith.constant 0 : i32
    %c0_i32_1 = arith.constant 0 : i32
    return %c0_i32, %c0_i32_0 : i32, i32
  }
  func.func @transform_7(%arg0: i32, %arg1: i32) -> (i32, i32, i32, i32) {
    %c0_i32 = arith.constant 0 : i32
    %c0_i32_0 = arith.constant 0 : i32
    %c0_i32_1 = arith.constant 0 : i32
    return %arg0, %arg1, %c0_i32, %c0_i32_0 : i32, i32, i32, i32
  }
}

module attributes {stable_mosaic.version = 11 : i64} {
  func.func @_width_up_kernel(%arg0: i32, %arg1: i32, %arg2: memref<1x1x8x8xf32, #tpu.memory_space<vmem>>, %arg3: memref<8x64xf32, #tpu.memory_space<vmem>>, %arg4: memref<1x1x8x64xf32, #tpu.memory_space<vmem>>) attributes {dimension_semantics = [#tpu.dimension_semantics<parallel>, #tpu.dimension_semantics<parallel>], iteration_bounds = array<i64: 2, 6>, scalar_prefetch = 0 : i64, scratch_operands = 0 : i64, tpu.core_type = #tpu.core_type<tc>, window_params = [{transform_indices = @transform_0, window_bounds = array<i64: 1, 1, 8, 8>}, {pipeline_mode = #tpu.pipeline_mode<synchronous>, transform_indices = @transform_1, window_bounds = array<i64: 8, 64>}, {transform_indices = @transform_2, window_bounds = array<i64: 1, 1, 8, 64>}]} {
    %c0 = arith.constant 0 : index
    %c0_0 = arith.constant 0 : index
    %c0_1 = arith.constant 0 : index
    %c0_2 = arith.constant 0 : index
    %0 = vector.load %arg2[%c0, %c0_0, %c0_1, %c0_2] : memref<1x1x8x8xf32, #tpu.memory_space<vmem>>, vector<1x1x8x8xf32>
    %1 = vector.shape_cast %0 : vector<1x1x8x8xf32> to vector<8x8xf32>
    %c0_3 = arith.constant 0 : index
    %c0_4 = arith.constant 0 : index
    %2 = vector.load %arg3[%c0_3, %c0_4] : memref<8x64xf32, #tpu.memory_space<vmem>>, vector<8x64xf32>
    %cst = arith.constant dense<0.000000e+00> : vector<8x64xf32>
    %3 = tpu.matmul %1, %2, %cst {dimension_numbers = #tpu.dot_dimension_numbers<[1], [0], [0], [1], [0, 0, 1, 1], [], []>} : vector<8x8xf32>, vector<8x64xf32>, vector<8x64xf32> -> vector<8x64xf32>
    %c0_5 = arith.constant 0 : index
    %c0_6 = arith.constant 0 : index
    %c0_7 = arith.constant 0 : index
    %c0_8 = arith.constant 0 : index
    %4 = vector.load %arg4[%c0_5, %c0_6, %c0_7, %c0_8] : memref<1x1x8x64xf32, #tpu.memory_space<vmem>>, vector<1x1x8x64xf32>
    %5 = vector.shape_cast %4 : vector<1x1x8x64xf32> to vector<8x64xf32>
    %6 = vector.shape_cast %3 : vector<8x64xf32> to vector<1x1x8x64xf32>
    tpu.vector_store %arg4[%c0_5, %c0_6, %c0_7, %c0_8], %6 {strides = array<i32>} : memref<1x1x8x64xf32, #tpu.memory_space<vmem>>, vector<1x1x8x64xf32>,
    return
  }
  func.func @transform_0(%arg0: i32, %arg1: i32) -> (i32, i32, i32, i32) {
    %c0_i32 = arith.constant 0 : i32
    %c0_i32_0 = arith.constant 0 : i32
    %c0_i32_1 = arith.constant 0 : i32
    return %arg0, %arg1, %c0_i32, %c0_i32_0 : i32, i32, i32, i32
  }
  func.func @transform_1(%arg0: i32, %arg1: i32) -> (i32, i32) {
    %c0_i32 = arith.constant 0 : i32
    %c0_i32_0 = arith.constant 0 : i32
    %c0_i32_1 = arith.constant 0 : i32
    return %c0_i32, %c0_i32_0 : i32, i32
  }
  func.func @transform_2(%arg0: i32, %arg1: i32) -> (i32, i32, i32, i32) {
    %c0_i32 = arith.constant 0 : i32
    %c0_i32_0 = arith.constant 0 : i32
    %c0_i32_1 = arith.constant 0 : i32
    return %arg0, %arg1, %c0_i32, %c0_i32_0 : i32, i32, i32, i32
  }
}

module attributes {stable_mosaic.version = 11 : i64} {
  func.func @_height_up_logsoftmax_kernel(%arg0: i32, %arg1: i32, %arg2: memref<1x6x8x64xf32, #tpu.memory_space<vmem>>, %arg3: memref<64x8xf32, #tpu.memory_space<vmem>>, %arg4: memref<1x6x64x64xf32, #tpu.memory_space<vmem>>) attributes {dimension_semantics = [#tpu.dimension_semantics<parallel>, #tpu.dimension_semantics<parallel>], iteration_bounds = array<i64: 2, 1>, scalar_prefetch = 0 : i64, scratch_operands = 0 : i64, tpu.core_type = #tpu.core_type<tc>, window_params = [{transform_indices = @transform_0, window_bounds = array<i64: 1, 6, 8, 64>}, {transform_indices = @transform_1, window_bounds = array<i64: 64, 8>}, {transform_indices = @transform_2, window_bounds = array<i64: 1, 6, 64, 64>}]} {
    %c0 = arith.constant 0 : index
    %c0_0 = arith.constant 0 : index
    %0 = vector.load %arg3[%c0, %c0_0] : memref<64x8xf32, #tpu.memory_space<vmem>>, vector<64x8xf32>
    %c0_1 = arith.constant 0 : index
    %c0_2 = arith.constant 0 : index
    %c0_3 = arith.constant 0 : index
    %c0_4 = arith.constant 0 : index
    %1 = vector.load %arg2[%c0_1, %c0_2, %c0_3, %c0_4] : memref<1x6x8x64xf32, #tpu.memory_space<vmem>>, vector<1x1x8x64xf32>
    %2 = vector.shape_cast %1 : vector<1x1x8x64xf32> to vector<8x64xf32>
    %cst = arith.constant dense<0.000000e+00> : vector<64x64xf32>
    %3 = tpu.matmul %0, %2, %cst {dimension_numbers = #tpu.dot_dimension_numbers<[1], [0], [0], [1], [0, 0, 1, 1], [], []>} : vector<64x8xf32>, vector<8x64xf32>, vector<64x64xf32> -> vector<64x64xf32>
    %c0_5 = arith.constant 0 : index
    %c0_6 = arith.constant 0 : index
    %c0_7 = arith.constant 0 : index
    %c0_8 = arith.constant 0 : index
    %4 = vector.load %arg4[%c0_5, %c0_6, %c0_7, %c0_8] : memref<1x6x64x64xf32, #tpu.memory_space<vmem>>, vector<1x1x64x64xf32>
    %5 = vector.shape_cast %4 : vector<1x1x64x64xf32> to vector<64x64xf32>
    %6 = vector.shape_cast %3 : vector<64x64xf32> to vector<1x1x64x64xf32>
    tpu.vector_store %arg4[%c0_5, %c0_6, %c0_7, %c0_8], %6 {strides = array<i32>} : memref<1x6x64x64xf32, #tpu.memory_space<vmem>>, vector<1x1x64x64xf32>,
    %c0_9 = arith.constant 0 : index
    %c1 = arith.constant 1 : index
    %c0_10 = arith.constant 0 : index
    %c0_11 = arith.constant 0 : index
    %7 = vector.load %arg2[%c0_9, %c1, %c0_10, %c0_11] : memref<1x6x8x64xf32, #tpu.memory_space<vmem>>, vector<1x1x8x64xf32>
    %8 = vector.shape_cast %7 : vector<1x1x8x64xf32> to vector<8x64xf32>
    %cst_12 = arith.constant dense<0.000000e+00> : vector<64x64xf32>
    %9 = tpu.matmul %0, %8, %cst_12 {dimension_numbers = #tpu.dot_dimension_numbers<[1], [0], [0], [1], [0, 0, 1, 1], [], []>} : vector<64x8xf32>, vector<8x64xf32>, vector<64x64xf32> -> vector<64x64xf32>
    %c0_13 = arith.constant 0 : index
    %c1_14 = arith.constant 1 : index
    %c0_15 = arith.constant 0 : index
    %c0_16 = arith.constant 0 : index
    %10 = vector.load %arg4[%c0_13, %c1_14, %c0_15, %c0_16] : memref<1x6x64x64xf32, #tpu.memory_space<vmem>>, vector<1x1x64x64xf32>
    %11 = vector.shape_cast %10 : vector<1x1x64x64xf32> to vector<64x64xf32>
    %12 = vector.shape_cast %9 : vector<64x64xf32> to vector<1x1x64x64xf32>
    tpu.vector_store %arg4[%c0_13, %c1_14, %c0_15, %c0_16], %12 {strides = array<i32>} : memref<1x6x64x64xf32, #tpu.memory_space<vmem>>, vector<1x1x64x64xf32>,
    %13 = arith.maximumf %3, %9 : vector<64x64xf32>
    %c0_17 = arith.constant 0 : index
    %c2 = arith.constant 2 : index
    %c0_18 = arith.constant 0 : index
    %c0_19 = arith.constant 0 : index
    %14 = vector.load %arg2[%c0_17, %c2, %c0_18, %c0_19] : memref<1x6x8x64xf32, #tpu.memory_space<vmem>>, vector<1x1x8x64xf32>
    %15 = vector.shape_cast %14 : vector<1x1x8x64xf32> to vector<8x64xf32>
    %cst_20 = arith.constant dense<0.000000e+00> : vector<64x64xf32>
    %16 = tpu.matmul %0, %15, %cst_20 {dimension_numbers = #tpu.dot_dimension_numbers<[1], [0], [0], [1], [0, 0, 1, 1], [], []>} : vector<64x8xf32>, vector<8x64xf32>, vector<64x64xf32> -> vector<64x64xf32>
    %c0_21 = arith.constant 0 : index
    %c2_22 = arith.constant 2 : index
    %c0_23 = arith.constant 0 : index
    %c0_24 = arith.constant 0 : index
    %17 = vector.load %arg4[%c0_21, %c2_22, %c0_23, %c0_24] : memref<1x6x64x64xf32, #tpu.memory_space<vmem>>, vector<1x1x64x64xf32>
    %18 = vector.shape_cast %17 : vector<1x1x64x64xf32> to vector<64x64xf32>
    %19 = vector.shape_cast %16 : vector<64x64xf32> to vector<1x1x64x64xf32>
    tpu.vector_store %arg4[%c0_21, %c2_22, %c0_23, %c0_24], %19 {strides = array<i32>} : memref<1x6x64x64xf32, #tpu.memory_space<vmem>>, vector<1x1x64x64xf32>,
    %20 = arith.maximumf %13, %16 : vector<64x64xf32>
    %c0_25 = arith.constant 0 : index
    %c3 = arith.constant 3 : index
    %c0_26 = arith.constant 0 : index
    %c0_27 = arith.constant 0 : index
    %21 = vector.load %arg2[%c0_25, %c3, %c0_26, %c0_27] : memref<1x6x8x64xf32, #tpu.memory_space<vmem>>, vector<1x1x8x64xf32>
    %22 = vector.shape_cast %21 : vector<1x1x8x64xf32> to vector<8x64xf32>
    %cst_28 = arith.constant dense<0.000000e+00> : vector<64x64xf32>
    %23 = tpu.matmul %0, %22, %cst_28 {dimension_numbers = #tpu.dot_dimension_numbers<[1], [0], [0], [1], [0, 0, 1, 1], [], []>} : vector<64x8xf32>, vector<8x64xf32>, vector<64x64xf32> -> vector<64x64xf32>
    %c0_29 = arith.constant 0 : index
    %c3_30 = arith.constant 3 : index
    %c0_31 = arith.constant 0 : index
    %c0_32 = arith.constant 0 : index
    %24 = vector.load %arg4[%c0_29, %c3_30, %c0_31, %c0_32] : memref<1x6x64x64xf32, #tpu.memory_space<vmem>>, vector<1x1x64x64xf32>
    %25 = vector.shape_cast %24 : vector<1x1x64x64xf32> to vector<64x64xf32>
    %26 = vector.shape_cast %23 : vector<64x64xf32> to vector<1x1x64x64xf32>
    tpu.vector_store %arg4[%c0_29, %c3_30, %c0_31, %c0_32], %26 {strides = array<i32>} : memref<1x6x64x64xf32, #tpu.memory_space<vmem>>, vector<1x1x64x64xf32>,
    %27 = arith.maximumf %20, %23 : vector<64x64xf32>
    %c0_33 = arith.constant 0 : index
    %c4 = arith.constant 4 : index
    %c0_34 = arith.constant 0 : index
    %c0_35 = arith.constant 0 : index
    %28 = vector.load %arg2[%c0_33, %c4, %c0_34, %c0_35] : memref<1x6x8x64xf32, #tpu.memory_space<vmem>>, vector<1x1x8x64xf32>
    %29 = vector.shape_cast %28 : vector<1x1x8x64xf32> to vector<8x64xf32>
    %cst_36 = arith.constant dense<0.000000e+00> : vector<64x64xf32>
    %30 = tpu.matmul %0, %29, %cst_36 {dimension_numbers = #tpu.dot_dimension_numbers<[1], [0], [0], [1], [0, 0, 1, 1], [], []>} : vector<64x8xf32>, vector<8x64xf32>, vector<64x64xf32> -> vector<64x64xf32>
    %c0_37 = arith.constant 0 : index
    %c4_38 = arith.constant 4 : index
    %c0_39 = arith.constant 0 : index
    %c0_40 = arith.constant 0 : index
    %31 = vector.load %arg4[%c0_37, %c4_38, %c0_39, %c0_40] : memref<1x6x64x64xf32, #tpu.memory_space<vmem>>, vector<1x1x64x64xf32>
    %32 = vector.shape_cast %31 : vector<1x1x64x64xf32> to vector<64x64xf32>
    %33 = vector.shape_cast %30 : vector<64x64xf32> to vector<1x1x64x64xf32>
    tpu.vector_store %arg4[%c0_37, %c4_38, %c0_39, %c0_40], %33 {strides = array<i32>} : memref<1x6x64x64xf32, #tpu.memory_space<vmem>>, vector<1x1x64x64xf32>,
    %34 = arith.maximumf %27, %30 : vector<64x64xf32>
    %c0_41 = arith.constant 0 : index
    %c5 = arith.constant 5 : index
    %c0_42 = arith.constant 0 : index
    %c0_43 = arith.constant 0 : index
    %35 = vector.load %arg2[%c0_41, %c5, %c0_42, %c0_43] : memref<1x6x8x64xf32, #tpu.memory_space<vmem>>, vector<1x1x8x64xf32>
    %36 = vector.shape_cast %35 : vector<1x1x8x64xf32> to vector<8x64xf32>
    %cst_44 = arith.constant dense<0.000000e+00> : vector<64x64xf32>
    %37 = tpu.matmul %0, %36, %cst_44 {dimension_numbers = #tpu.dot_dimension_numbers<[1], [0], [0], [1], [0, 0, 1, 1], [], []>} : vector<64x8xf32>, vector<8x64xf32>, vector<64x64xf32> -> vector<64x64xf32>
    %c0_45 = arith.constant 0 : index
    %c5_46 = arith.constant 5 : index
    %c0_47 = arith.constant 0 : index
    %c0_48 = arith.constant 0 : index
    %38 = vector.load %arg4[%c0_45, %c5_46, %c0_47, %c0_48] : memref<1x6x64x64xf32, #tpu.memory_space<vmem>>, vector<1x1x64x64xf32>
    %39 = vector.shape_cast %38 : vector<1x1x64x64xf32> to vector<64x64xf32>
    %40 = vector.shape_cast %37 : vector<64x64xf32> to vector<1x1x64x64xf32>
    tpu.vector_store %arg4[%c0_45, %c5_46, %c0_47, %c0_48], %40 {strides = array<i32>} : memref<1x6x64x64xf32, #tpu.memory_space<vmem>>, vector<1x1x64x64xf32>,
    %41 = arith.maximumf %34, %37 : vector<64x64xf32>
    %cst_49 = arith.constant 0.000000e+00 : f32
    %42 = vector.broadcast %cst_49 : f32 to vector<64x64xf32>
    %c0_50 = arith.constant 0 : index
    %c0_51 = arith.constant 0 : index
    %c0_52 = arith.constant 0 : index
    %c0_53 = arith.constant 0 : index
    %43 = vector.load %arg4[%c0_50, %c0_51, %c0_52, %c0_53] : memref<1x6x64x64xf32, #tpu.memory_space<vmem>>, vector<1x1x64x64xf32>
    %44 = vector.shape_cast %43 : vector<1x1x64x64xf32> to vector<64x64xf32>
    %45 = arith.subf %44, %41 : vector<64x64xf32>
    %46 = math.exp %45 : vector<64x64xf32>
    %47 = arith.addf %42, %46 : vector<64x64xf32>
    %c0_54 = arith.constant 0 : index
    %c1_55 = arith.constant 1 : index
    %c0_56 = arith.constant 0 : index
    %c0_57 = arith.constant 0 : index
    %48 = vector.load %arg4[%c0_54, %c1_55, %c0_56, %c0_57] : memref<1x6x64x64xf32, #tpu.memory_space<vmem>>, vector<1x1x64x64xf32>
    %49 = vector.shape_cast %48 : vector<1x1x64x64xf32> to vector<64x64xf32>
    %50 = arith.subf %49, %41 : vector<64x64xf32>
    %51 = math.exp %50 : vector<64x64xf32>
    %52 = arith.addf %47, %51 : vector<64x64xf32>
    %c0_58 = arith.constant 0 : index
    %c2_59 = arith.constant 2 : index
    %c0_60 = arith.constant 0 : index
    %c0_61 = arith.constant 0 : index
    %53 = vector.load %arg4[%c0_58, %c2_59, %c0_60, %c0_61] : memref<1x6x64x64xf32, #tpu.memory_space<vmem>>, vector<1x1x64x64xf32>
    %54 = vector.shape_cast %53 : vector<1x1x64x64xf32> to vector<64x64xf32>
    %55 = arith.subf %54, %41 : vector<64x64xf32>
    %56 = math.exp %55 : vector<64x64xf32>
    %57 = arith.addf %52, %56 : vector<64x64xf32>
    %c0_62 = arith.constant 0 : index
    %c3_63 = arith.constant 3 : index
    %c0_64 = arith.constant 0 : index
    %c0_65 = arith.constant 0 : index
    %58 = vector.load %arg4[%c0_62, %c3_63, %c0_64, %c0_65] : memref<1x6x64x64xf32, #tpu.memory_space<vmem>>, vector<1x1x64x64xf32>
    %59 = vector.shape_cast %58 : vector<1x1x64x64xf32> to vector<64x64xf32>
    %60 = arith.subf %59, %41 : vector<64x64xf32>
    %61 = math.exp %60 : vector<64x64xf32>
    %62 = arith.addf %57, %61 : vector<64x64xf32>
    %c0_66 = arith.constant 0 : index
    %c4_67 = arith.constant 4 : index
    %c0_68 = arith.constant 0 : index
    %c0_69 = arith.constant 0 : index
    %63 = vector.load %arg4[%c0_66, %c4_67, %c0_68, %c0_69] : memref<1x6x64x64xf32, #tpu.memory_space<vmem>>, vector<1x1x64x64xf32>
    %64 = vector.shape_cast %63 : vector<1x1x64x64xf32> to vector<64x64xf32>
    %65 = arith.subf %64, %41 : vector<64x64xf32>
    %66 = math.exp %65 : vector<64x64xf32>
    %67 = arith.addf %62, %66 : vector<64x64xf32>
    %c0_70 = arith.constant 0 : index
    %c5_71 = arith.constant 5 : index
    %c0_72 = arith.constant 0 : index
    %c0_73 = arith.constant 0 : index
    %68 = vector.load %arg4[%c0_70, %c5_71, %c0_72, %c0_73] : memref<1x6x64x64xf32, #tpu.memory_space<vmem>>, vector<1x1x64x64xf32>
    %69 = vector.shape_cast %68 : vector<1x1x64x64xf32> to vector<64x64xf32>
    %70 = arith.subf %69, %41 : vector<64x64xf32>
    %71 = math.exp %70 : vector<64x64xf32>
    %72 = arith.addf %67, %71 : vector<64x64xf32>
    %73 = math.log %72 : vector<64x64xf32>
    %74 = arith.addf %41, %73 : vector<64x64xf32>
    %c0_74 = arith.constant 0 : index
    %c0_75 = arith.constant 0 : index
    %c0_76 = arith.constant 0 : index
    %c0_77 = arith.constant 0 : index
    %75 = vector.load %arg4[%c0_74, %c0_75, %c0_76, %c0_77] : memref<1x6x64x64xf32, #tpu.memory_space<vmem>>, vector<1x1x64x64xf32>
    %76 = vector.shape_cast %75 : vector<1x1x64x64xf32> to vector<64x64xf32>
    %77 = arith.subf %76, %74 : vector<64x64xf32>
    %c0_78 = arith.constant 0 : index
    %c0_79 = arith.constant 0 : index
    %c0_80 = arith.constant 0 : index
    %c0_81 = arith.constant 0 : index
    %78 = vector.load %arg4[%c0_78, %c0_79, %c0_80, %c0_81] : memref<1x6x64x64xf32, #tpu.memory_space<vmem>>, vector<1x1x64x64xf32>
    %79 = vector.shape_cast %78 : vector<1x1x64x64xf32> to vector<64x64xf32>
    %80 = vector.shape_cast %77 : vector<64x64xf32> to vector<1x1x64x64xf32>
    tpu.vector_store %arg4[%c0_78, %c0_79, %c0_80, %c0_81], %80 {strides = array<i32>} : memref<1x6x64x64xf32, #tpu.memory_space<vmem>>, vector<1x1x64x64xf32>,
    %c0_82 = arith.constant 0 : index
    %c1_83 = arith.constant 1 : index
    %c0_84 = arith.constant 0 : index
    %c0_85 = arith.constant 0 : index
    %81 = vector.load %arg4[%c0_82, %c1_83, %c0_84, %c0_85] : memref<1x6x64x64xf32, #tpu.memory_space<vmem>>, vector<1x1x64x64xf32>
    %82 = vector.shape_cast %81 : vector<1x1x64x64xf32> to vector<64x64xf32>
    %83 = arith.subf %82, %74 : vector<64x64xf32>
    %c0_86 = arith.constant 0 : index
    %c1_87 = arith.constant 1 : index
    %c0_88 = arith.constant 0 : index
    %c0_89 = arith.constant 0 : index
    %84 = vector.load %arg4[%c0_86, %c1_87, %c0_88, %c0_89] : memref<1x6x64x64xf32, #tpu.memory_space<vmem>>, vector<1x1x64x64xf32>
    %85 = vector.shape_cast %84 : vector<1x1x64x64xf32> to vector<64x64xf32>
    %86 = vector.shape_cast %83 : vector<64x64xf32> to vector<1x1x64x64xf32>
    tpu.vector_store %arg4[%c0_86, %c1_87, %c0_88, %c0_89], %86 {strides = array<i32>} : memref<1x6x64x64xf32, #tpu.memory_space<vmem>>, vector<1x1x64x64xf32>,
    %c0_90 = arith.constant 0 : index
    %c2_91 = arith.constant 2 : index
    %c0_92 = arith.constant 0 : index
    %c0_93 = arith.constant 0 : index
    %87 = vector.load %arg4[%c0_90, %c2_91, %c0_92, %c0_93] : memref<1x6x64x64xf32, #tpu.memory_space<vmem>>, vector<1x1x64x64xf32>
    %88 = vector.shape_cast %87 : vector<1x1x64x64xf32> to vector<64x64xf32>
    %89 = arith.subf %88, %74 : vector<64x64xf32>
    %c0_94 = arith.constant 0 : index
    %c2_95 = arith.constant 2 : index
    %c0_96 = arith.constant 0 : index
    %c0_97 = arith.constant 0 : index
    %90 = vector.load %arg4[%c0_94, %c2_95, %c0_96, %c0_97] : memref<1x6x64x64xf32, #tpu.memory_space<vmem>>, vector<1x1x64x64xf32>
    %91 = vector.shape_cast %90 : vector<1x1x64x64xf32> to vector<64x64xf32>
    %92 = vector.shape_cast %89 : vector<64x64xf32> to vector<1x1x64x64xf32>
    tpu.vector_store %arg4[%c0_94, %c2_95, %c0_96, %c0_97], %92 {strides = array<i32>} : memref<1x6x64x64xf32, #tpu.memory_space<vmem>>, vector<1x1x64x64xf32>,
    %c0_98 = arith.constant 0 : index
    %c3_99 = arith.constant 3 : index
    %c0_100 = arith.constant 0 : index
    %c0_101 = arith.constant 0 : index
    %93 = vector.load %arg4[%c0_98, %c3_99, %c0_100, %c0_101] : memref<1x6x64x64xf32, #tpu.memory_space<vmem>>, vector<1x1x64x64xf32>
    %94 = vector.shape_cast %93 : vector<1x1x64x64xf32> to vector<64x64xf32>
    %95 = arith.subf %94, %74 : vector<64x64xf32>
    %c0_102 = arith.constant 0 : index
    %c3_103 = arith.constant 3 : index
    %c0_104 = arith.constant 0 : index
    %c0_105 = arith.constant 0 : index
    %96 = vector.load %arg4[%c0_102, %c3_103, %c0_104, %c0_105] : memref<1x6x64x64xf32, #tpu.memory_space<vmem>>, vector<1x1x64x64xf32>
    %97 = vector.shape_cast %96 : vector<1x1x64x64xf32> to vector<64x64xf32>
    %98 = vector.shape_cast %95 : vector<64x64xf32> to vector<1x1x64x64xf32>
    tpu.vector_store %arg4[%c0_102, %c3_103, %c0_104, %c0_105], %98 {strides = array<i32>} : memref<1x6x64x64xf32, #tpu.memory_space<vmem>>, vector<1x1x64x64xf32>,
    %c0_106 = arith.constant 0 : index
    %c4_107 = arith.constant 4 : index
    %c0_108 = arith.constant 0 : index
    %c0_109 = arith.constant 0 : index
    %99 = vector.load %arg4[%c0_106, %c4_107, %c0_108, %c0_109] : memref<1x6x64x64xf32, #tpu.memory_space<vmem>>, vector<1x1x64x64xf32>
    %100 = vector.shape_cast %99 : vector<1x1x64x64xf32> to vector<64x64xf32>
    %101 = arith.subf %100, %74 : vector<64x64xf32>
    %c0_110 = arith.constant 0 : index
    %c4_111 = arith.constant 4 : index
    %c0_112 = arith.constant 0 : index
    %c0_113 = arith.constant 0 : index
    %102 = vector.load %arg4[%c0_110, %c4_111, %c0_112, %c0_113] : memref<1x6x64x64xf32, #tpu.memory_space<vmem>>, vector<1x1x64x64xf32>
    %103 = vector.shape_cast %102 : vector<1x1x64x64xf32> to vector<64x64xf32>
    %104 = vector.shape_cast %101 : vector<64x64xf32> to vector<1x1x64x64xf32>
    tpu.vector_store %arg4[%c0_110, %c4_111, %c0_112, %c0_113], %104 {strides = array<i32>} : memref<1x6x64x64xf32, #tpu.memory_space<vmem>>, vector<1x1x64x64xf32>,
    %c0_114 = arith.constant 0 : index
    %c5_115 = arith.constant 5 : index
    %c0_116 = arith.constant 0 : index
    %c0_117 = arith.constant 0 : index
    %105 = vector.load %arg4[%c0_114, %c5_115, %c0_116, %c0_117] : memref<1x6x64x64xf32, #tpu.memory_space<vmem>>, vector<1x1x64x64xf32>
    %106 = vector.shape_cast %105 : vector<1x1x64x64xf32> to vector<64x64xf32>
    %107 = arith.subf %106, %74 : vector<64x64xf32>
    %c0_118 = arith.constant 0 : index
    %c5_119 = arith.constant 5 : index
    %c0_120 = arith.constant 0 : index
    %c0_121 = arith.constant 0 : index
    %108 = vector.load %arg4[%c0_118, %c5_119, %c0_120, %c0_121] : memref<1x6x64x64xf32, #tpu.memory_space<vmem>>, vector<1x1x64x64xf32>
    %109 = vector.shape_cast %108 : vector<1x1x64x64xf32> to vector<64x64xf32>
    %110 = vector.shape_cast %107 : vector<64x64xf32> to vector<1x1x64x64xf32>
    tpu.vector_store %arg4[%c0_118, %c5_119, %c0_120, %c0_121], %110 {strides = array<i32>} : memref<1x6x64x64xf32, #tpu.memory_space<vmem>>, vector<1x1x64x64xf32>,
    return
  }
  func.func @transform_0(%arg0: i32, %arg1: i32) -> (i32, i32, i32, i32) {
    %c0_i32 = arith.constant 0 : i32
    %c0_i32_0 = arith.constant 0 : i32
    %c0_i32_1 = arith.constant 0 : i32
    %c0_i32_2 = arith.constant 0 : i32
    return %arg0, %c0_i32, %c0_i32_0, %c0_i32_1 : i32, i32, i32, i32
  }
  func.func @transform_1(%arg0: i32, %arg1: i32) -> (i32, i32) {
    %c0_i32 = arith.constant 0 : i32
    %c0_i32_0 = arith.constant 0 : i32
    return %arg1, %c0_i32 : i32, i32
  }
  func.func @transform_2(%arg0: i32, %arg1: i32) -> (i32, i32, i32, i32) {
    %c0_i32 = arith.constant 0 : i32
    %c0_i32_0 = arith.constant 0 : i32
    %c0_i32_1 = arith.constant 0 : i32
    return %arg0, %c0_i32, %arg1, %c0_i32_0 : i32, i32, i32, i32
  }
}

</mosaic_0001>

<bundles_post_ra>
// kernel: drnseg_inference_forward.5
= control target key start
LH: loop header
LB: loop body
LE: loop exit
PB: predicated region body
PF: predicated region fallthrough
CT: control target
= control target key end

     0   :  { %s4458_s18 = smov 0   ;;  %s4460_s19 = smov 0   ;;  %s5534_s0 = inlined_call_operand.vmem [shape: bf16[2,33,32,9], index: 0, kind: input, shape index: {}, may-alias: {0,1}]   ;;  %s5535_s1 = inlined_call_operand.vmem [shape: bf16[2,33,32,9], index: 1, kind: input, shape index: {}, may-alias: {0,1}]   ;;  %s5536_s2 = inlined_call_operand.vmem [shape: bf16[2,32,32,9], index: 2, kind: input, shape index: {}]   ;;  %s5537_s3 = inlined_call_operand.vmem [shape: bf16[3,9,8], index: 3, kind: input, shape index: {}]   ;;  %s5538_s4 = inlined_call_operand.vmem [shape: f32[1,8], index: 4, kind: input, shape index: {}]   ;;  %s5539_s5 = inlined_call_operand.vmem [shape: bf16[2,32,32,8], index: 5, kind: output, shape index: {}]  }
   0x1   :  { %s4462_s20 = smov 0  }
   0x2 LB: > { %s27_s21 = sadd.s32 1, %s4421_s19  ;;  %p3493_p0 = scmp.ge.s32.totalorder %s4425_s20, 1  ;;  %s4425_s20 = sphi %s4462_s20, %s15_s20   ;;  %s4421_s19 = sphi %s4460_s19, %s5591_s19   ;;  %s4417_s18 = sphi %s4458_s18, %s5590_s18  }
   0x3   : > { %p29_p1 = scmp.ge.s32.totalorder %s27_s21, 2  ;;  %p261_p2 = scmp.lt.s32.totalorder %s4425_s20, 3 }
   0x5   : > { %s5593_s21 = smov (%p29_p1, %s27_s21), 0  ;;  %p262_p3 = pnand %p3493_p0, %p261_p2 }
   0x7   : > { %265 = sbr.rel (%p262_p3) target bundleno = 924 (0x39c), region = 40 }
   0xc   : > { %v3760_v0 = vld [vmem:[%s5537_s3 + $0x8] sm:$0xf]  ;;  %v4365_v1 = vld [vmem:[%s5537_s3 + $0x8] sm:$0x10]  ;;  %vm1165_vm0 = vcmask 1043456   ;;  %vm1166_vm1 = vcmask 1044480  }
   0xd   : > { %v3761_v2 = vor.u32 %v4365_v1, %v3760_v0  ;;  %v4084_v3 = vld [vmem:[%s5537_s3] sm:$0xf]  ;;  %v4364_v4 = vld [vmem:[%s5537_s3] sm:$0x10]  ;;  %p331_p4 = scmp.lt.s32.totalorder %s4417_s18, 1  ;;  %v4427_v5 = vmov 65535  }
   0xe   : > { %v1167_v6 = vsel %vm1165_vm0, 4294967295, %v4427_v5  ;;  %v4085_v7 = vor.u32 %v4364_v4, %v4084_v3  ;;  %v4162_v8 = vld [vmem:[%s5537_s3 + $0x10] sm:$0xf]  ;;  %v4366_v9 = vld [vmem:[%s5537_s3 + $0x10] sm:$0x10]  ;;  %vm972_vm2 = vcmask 72704  }
   0xf   : > { %v1168_v10 = vsel %vm1166_vm1, %v1167_v6, 0  ;;  %v4163_v11 = vor.u32 %v4366_v9, %v4162_v8  ;;  %s5595_s18 = smov (!%p331_p4, %s4417_s18), 1  ;;  %v4582_v48 = vld [vmem:[%s5538_s4] ss:$0 sm:$0xff]  ;;  %vm3222_vm3 = vcmask 60416  }
  0x10   : > { %v1170_v12 = vand.u32 %v3761_v2, %v1168_v10  ;;  %v2019_v13 = vand.u32 %v4085_v7, %v1168_v10  ;;  %s4232_s9 = sshll.u32 %s5595_s18, 9  ;;  %s4370_s13 = smul.u32 528, %s5595_s18 }
  0x11   : > { %v2375_v14 = vand.u32 %v4163_v11, %v1168_v10  ;;  %s4502_s12 = scalar_lea.vmem %s5536_s2, %s4232_s9  ;;  %s4592_s25 = scalar_lea.vmem %s5539_s5, %s4232_s9 }
  0x12   : > { %1179 = vmatpush.bf16.msra.mxu0 %v1170_v12  ;;  %4367 = vmatpush.bf16.msra.mxu3 %v1170_v12  ;;  %v4298_v15 = vld [vmem:[%s4502_s12] sm:$0xff]  ;;  %s4514_s16 = scalar_lea.vmem %s5534_s0, %s4370_s13  ;;  %v4299_v19 = vld [vmem:[%s4502_s12 + $0x8] sm:$0xff]  ;;  %v4300_v23 = vld [vmem:[%s4502_s12 + $0x10] sm:$0xff]  ;;  %s4231_s30 = sadd.s32 512, %s4370_s13 }
  0x13   : > { %2028 = vmatpush.bf16.msra.mxu1 %v2019_v13  ;;  %2384 = vmatpush.bf16.msra.mxu2 %v2375_v14  ;;  %v4346_v16 = vld [vmem:[%s4502_s12 + $0x180] sm:$0xff]  ;;  %v4236_v18 = vld [vmem:[%s4514_s16 + $0x10] sm:$0xff]  ;;  %v4347_v20 = vld [vmem:[%s4502_s12 + $0x188] sm:$0xff]  ;;  %s5335_s8 = scalar_lea.vmem %s5535_s1, %s4231_s30 }
  0x14   : > { %v4234_v17 = vld [vmem:[%s4514_s16] sm:$0xff]  ;;  %v4235_v21 = vld [vmem:[%s4514_s16 + $0x8] sm:$0xff]  ;;  %v4237_v22 = vld [vmem:[%s4514_s16 + $0x18] sm:$0xff] }
  0x15   : > { %3762 = vmatmul.msk.bf16.vlgmr.msra.gmra.mxu0 %vm972_vm2, %v4298_v15  ;;  %3810 = vmatmul.msk.bf16.vlgmr.msra.gmra.mxu3 %vm972_vm2, %v4346_v16  ;;  %v4348_v24 = vld [vmem:[%s4502_s12 + $0x190] sm:$0xff]  ;;  %v4238_v25 = vld [vmem:[%s4514_s16 + $0x20] sm:$0xff]  ;;  %v4301_v26 = vld [vmem:[%s4502_s12 + $0x18] sm:$0xff] }
  0x16   : > { %4368 = vmatpush.bf16.msrb.mxu3 %v2019_v13  ;;  %4086 = vmatmul.msk.bf16.vlgmr.msra.gmra.mxu1 %vm972_vm2, %v4234_v17  ;;  %v4349_v27 = vld [vmem:[%s4502_s12 + $0x198] sm:$0xff]  ;;  %v4239_v28 = vld [vmem:[%s4514_s16 + $0x28] sm:$0xff]  ;;  %v4302_v29 = vld [vmem:[%s4502_s12 + $0x20] sm:$0xff] }
  0x17   : > { %4164 = vmatmul.msk.bf16.vlgmr.msra.gmra.mxu2 %vm972_vm2, %v4236_v18  ;;  %v4350_v30 = vld [vmem:[%s4502_s12 + $0x1a0] sm:$0xff]  ;;  %v4240_v31 = vld [vmem:[%s4514_s16 + $0x30] sm:$0xff]  ;;  %v4303_v32 = vld [vmem:[%s4502_s12 + $0x28] sm:$0xff] }
  0x18   : > { %v4351_v33 = vld [vmem:[%s4502_s12 + $0x1a8] sm:$0xff]  ;;  %v4241_v34 = vld [vmem:[%s4514_s16 + $0x38] sm:$0xff]  ;;  %v4304_v35 = vld [vmem:[%s4502_s12 + $0x30] sm:$0xff] }
  0x19   : > { %v4352_v36 = vld [vmem:[%s4502_s12 + $0x1b0] sm:$0xff]  ;;  %v4242_v37 = vld [vmem:[%s4514_s16 + $0x40] sm:$0xff]  ;;  %v4305_v38 = vld [vmem:[%s4502_s12 + $0x38] sm:$0xff] }
  0x1a   : > { %4369 = vmatpush.bf16.msra.mxu3 %v2375_v14  ;;  %v4353_v39 = vld [vmem:[%s4502_s12 + $0x1b8] sm:$0xff]  ;;  %v4243_v40 = vld [vmem:[%s4514_s16 + $0x48] sm:$0xff]  ;;  %v4306_v41 = vld [vmem:[%s4502_s12 + $0x40] sm:$0xff] }
  0x1b   : > { %v4354_v42 = vld [vmem:[%s4502_s12 + $0x1c0] sm:$0xff]  ;;  %v4244_v44 = vld [vmem:[%s4514_s16 + $0x50] sm:$0xff]  ;;  %v4307_v56 = vld [vmem:[%s4502_s12 + $0x48] sm:$0xff] }
  0x1c   : > { %v4355_v57 = vld [vmem:[%s4502_s12 + $0x1c8] sm:$0xff]  ;;  %v4245_v63 = vld [vmem:[%s4514_s16 + $0x58] sm:$0xff]  ;;  %v4308_v13 = vld [vmem:[%s4502_s12 + $0x50] sm:$0xff] }
  0x1d   : > { %v4356_v14 = vld [vmem:[%s4502_s12 + $0x1d0] sm:$0xff] }
  0x25   : > { %3763 = vmatmul.msk.bf16.gmra.mxu0 %vm972_vm2, %v4299_v19  ;;  %3811 = vmatmul.msk.bf16.gmra.mxu3 %vm972_vm2, %v4347_v20  ;;  %v4246_v20 = vld [vmem:[%s4514_s16 + $0x60] sm:$0xff] }
  0x26   : > { %4087 = vmatmul.msk.bf16.gmra.mxu1 %vm972_vm2, %v4235_v21 }
  0x27   : > { %4165 = vmatmul.msk.bf16.gmra.mxu2 %vm972_vm2, %v4237_v22 }
  0x35   : > { %3764 = vmatmul.msk.bf16.gmra.mxu0 %vm972_vm2, %v4300_v23  ;;  %3812 = vmatmul.msk.bf16.gmra.mxu3 %vm972_vm2, %v4348_v24 }
  0x36   : > { %4088 = vmatmul.msk.bf16.gmra.mxu1 %vm972_vm2, %v4236_v18 }
  0x37   : > { %4166 = vmatmul.msk.bf16.gmra.mxu2 %vm972_vm2, %v4238_v25 }
  0x45   : > { %3765 = vmatmul.msk.bf16.gmra.mxu0 %vm972_vm2, %v4301_v26  ;;  %3813 = vmatmul.msk.bf16.gmra.mxu3 %vm972_vm2, %v4349_v27 }
  0x46   : > { %4089 = vmatmul.msk.bf16.gmra.mxu1 %vm972_vm2, %v4237_v22 }
  0x47   : > { %4167 = vmatmul.msk.bf16.gmra.mxu2 %vm972_vm2, %v4239_v28 }
  0x55   : > { %3766 = vmatmul.msk.bf16.gmra.mxu0 %vm972_vm2, %v4302_v29  ;;  %3814 = vmatmul.msk.bf16.gmra.mxu3 %vm972_vm2, %v4350_v30 }
  0x56   : > { %4090 = vmatmul.msk.bf16.gmra.mxu1 %vm972_vm2, %v4238_v25 }
  0x57   : > { %4168 = vmatmul.msk.bf16.gmra.mxu2 %vm972_vm2, %v4240_v31 }
  0x65   : > { %3767 = vmatmul.msk.bf16.gmra.mxu0 %vm972_vm2, %v4303_v32  ;;  %3815 = vmatmul.msk.bf16.gmra.mxu3 %vm972_vm2, %v4351_v33 }
  0x66   : > { %4091 = vmatmul.msk.bf16.gmra.mxu1 %vm972_vm2, %v4239_v28 }
  0x67   : > { %4169 = vmatmul.msk.bf16.gmra.mxu2 %vm972_vm2, %v4241_v34 }
  0x75   : > { %3768 = vmatmul.msk.bf16.gmra.mxu0 %vm972_vm2, %v4304_v35  ;;  %3816 = vmatmul.msk.bf16.gmra.mxu3 %vm972_vm2, %v4352_v36  ;;  %v4357_v35 = vld [vmem:[%s4502_s12 + $0x1d8] sm:$0xff] }
  0x76   : > { %4092 = vmatmul.msk.bf16.gmra.mxu1 %vm972_vm2, %v4240_v31 }
  0x77   : > { %4170 = vmatmul.msk.bf16.gmra.mxu2 %vm972_vm2, %v4242_v37 }
  0x85   : > { %3769 = vmatmul.msk.bf16.gmra.mxu0 %vm972_vm2, %v4305_v38  ;;  %3817 = vmatmul.msk.bf16.gmra.mxu3 %vm972_vm2, %v4353_v39 }
  0x86   : > { %4093 = vmatmul.msk.bf16.gmra.mxu1 %vm972_vm2, %v4241_v34  ;;  %v4309_v34 = vld [vmem:[%s4502_s12 + $0x58] sm:$0xff] }
  0x87   : > { %4171 = vmatmul.msk.bf16.gmra.mxu2 %vm972_vm2, %v4243_v40 }
  0x92   : > { %v1181_v43 = vpop.f32.mrf.mxu0 }
  0x93   : > { %v2030_v45 = vpop.f32.mrf.mxu1 }
  0x94   : > { %v2031_v46 = vadd.f32 %v2030_v45, %v1181_v43 }
  0x95   : > { %3770 = vmatmul.msk.bf16.gmra.mxu0 %vm972_vm2, %v4306_v41  ;;  %3818 = vmatmul.msk.bf16.gmra.mxu3 %vm972_vm2, %v4354_v42  ;;  %v4247_v41 = vld [vmem:[%s4514_s16 + $0x68] sm:$0xff] }
  0x96   : > { %4094 = vmatmul.msk.bf16.gmra.mxu1 %vm972_vm2, %v4242_v37 }
  0x97   : > { %4172 = vmatmul.msk.bf16.gmra.mxu2 %vm972_vm2, %v4244_v44 }
  0x98   : > { %v4577_v47 = vpop.f32.mrf.mxu3 }
  0x9a   : > { %v1183_v49 = vpop.f32.mrf.mxu0  ;;  %v2386_v50 = vpop.f32.mrf.mxu2 }
  0x9b   : > { %v2706_v51 = vadd.f32 %v2386_v50, %v2031_v46  ;;  %v2032_v52 = vpop.f32.mrf.mxu1 }
  0x9c   : > { %v2033_v59 = vadd.f32 %v2032_v52, %v1183_v49 }
  0x9d   : > { %v2838_v53 = vadd.f32 %v4582_v48, %v2706_v51 }
  0x9f   : > { %v2966_v54 = vmax.f32 %v2838_v53, 0.0 }
  0xa0   : > { %v4585_v55 = vpop.f32.mrf.mxu3 }
  0xa1   : > { %v3094_v58 = vpack.c.bf16 %v2966_v54, %v2966_v54 }
  0xa2   : > { %v1186_v60 = vpop.f32.mrf.mxu0  ;;  %v2388_v61 = vpop.f32.mrf.mxu2 }
  0xa3   : > { %3223 = vst.msk [vmem:[%s4592_s25] sm:$0xf] %vm3222_vm3, %v3094_v58  ;;  %v2707_v62 = vadd.f32 %v2388_v61, %v2033_v59  ;;  %v2035_v0 = vpop.f32.mrf.mxu1  ;;  %v4310_v58 = vld [vmem:[%s4502_s12 + $0x60] sm:$0xff] }
  0xa4   : > { %v2036_v3 = vadd.f32 %v2035_v0, %v1186_v60  ;;  %v4358_v59 = vld [vmem:[%s4502_s12 + $0x1e0] sm:$0xff] }
  0xa5   : > { %3771 = vmatmul.msk.bf16.gmra.mxu0 %vm972_vm2, %v4307_v56  ;;  %3819 = vmatmul.msk.bf16.gmra.mxu3 %vm972_vm2, %v4355_v57  ;;  %v2839_v1 = vadd.f32 %v4582_v48, %v2707_v62 }
  0xa6   : > { %4095 = vmatmul.msk.bf16.gmra.mxu1 %vm972_vm2, %v4243_v40 }
  0xa7   : > { %v2967_v2 = vmax.f32 %v2839_v1, 0.0  ;;  %4173 = vmatmul.msk.bf16.gmra.mxu2 %vm972_vm2, %v4245_v63  ;;  %v4248_v1 = vld [vmem:[%s4514_s16 + $0x70] sm:$0xff] }
  0xa8   : > { %v4604_v4 = vpop.f32.mrf.mxu3 }
  0xa9   : > { %v3095_v5 = vpack.c.bf16 %v2967_v2, %v2967_v2 }
  0xaa   : > { %v1188_v6 = vpop.f32.mrf.mxu0  ;;  %v2391_v7 = vpop.f32.mrf.mxu2 }
  0xab   : > { %3224 = vst.msk [vmem:[%s4592_s25 + $0x4] sm:$0xf] %vm3222_vm3, %v3095_v5  ;;  %v2708_v8 = vadd.f32 %v2391_v7, %v2036_v3  ;;  %v2037_v9 = vpop.f32.mrf.mxu1 }
  0xac   : > { %v2038_v16 = vadd.f32 %v2037_v9, %v1188_v6 }
  0xad   : > { %v2840_v10 = vadd.f32 %v4582_v48, %v2708_v8 }
  0xaf   : > { %v2968_v11 = vmax.f32 %v2840_v10, 0.0 }
  0xb0   : > { %v4609_v12 = vpop.f32.mrf.mxu3 }
  0xb1   : > { %v3096_v15 = vpack.c.bf16 %v2968_v11, %v2968_v11 }
  0xb2   : > { %v1191_v17 = vpop.f32.mrf.mxu0  ;;  %v2393_v18 = vpop.f32.mrf.mxu2 }
  0xb3   : > { %3225 = vst.msk [vmem:[%s4592_s25 + $0x8] sm:$0xf] %vm3222_vm3, %v3096_v15  ;;  %v2709_v19 = vadd.f32 %v2393_v18, %v2038_v16  ;;  %v2040_v21 = vpop.f32.mrf.mxu1  ;;  %v4359_v18 = vld [vmem:[%s4502_s12 + $0x1e8] sm:$0xff] }
  0xb4   : > { %v2041_v24 = vadd.f32 %v2040_v21, %v1191_v17  ;;  %v4311_v17 = vld [vmem:[%s4502_s12 + $0x68] sm:$0xff] }
  0xb5   : > { %3772 = vmatmul.msk.bf16.gmra.mxu0 %vm972_vm2, %v4308_v13  ;;  %3820 = vmatmul.msk.bf16.gmra.mxu3 %vm972_vm2, %v4356_v14  ;;  %v2841_v22 = vadd.f32 %v4582_v48, %v2709_v19 }
  0xb6   : > { %4096 = vmatmul.msk.bf16.gmra.mxu1 %vm972_vm2, %v4244_v44 }
  0xb7   : > { %v2969_v23 = vmax.f32 %v2841_v22, 0.0  ;;  %4174 = vmatmul.msk.bf16.gmra.mxu2 %vm972_vm2, %v4246_v20 }
  0xb8   : > { %v4621_v25 = vpop.f32.mrf.mxu3 }
  0xb9   : > { %v3097_v26 = vpack.c.bf16 %v2969_v23, %v2969_v23 }
  0xba   : > { %v1193_v27 = vpop.f32.mrf.mxu0  ;;  %v2396_v28 = vpop.f32.mrf.mxu2 }
  0xbb   : > { %3226 = vst.msk [vmem:[%s4592_s25 + $0xc] sm:$0xf] %vm3222_vm3, %v3097_v26  ;;  %v2710_v29 = vadd.f32 %v2396_v28, %v2041_v24  ;;  %v2042_v30 = vpop.f32.mrf.mxu1  ;;  %v4249_v24 = vld [vmem:[%s4514_s16 + $0x78] sm:$0xff] }
  0xbc   : > { %v2043_v37 = vadd.f32 %v2042_v30, %v1193_v27 }
  0xbd   : > { %v2842_v31 = vadd.f32 %v4582_v48, %v2710_v29 }
  0xbf   : > { %v2970_v32 = vmax.f32 %v2842_v31, 0.0 }
  0xc0   : > { %v4626_v33 = vpop.f32.mrf.mxu3 }
  0xc1   : > { %v3098_v36 = vpack.c.bf16 %v2970_v32, %v2970_v32 }
  0xc2   : > { %v1196_v38 = vpop.f32.mrf.mxu0  ;;  %v2398_v39 = vpop.f32.mrf.mxu2 }
  0xc3   : > { %3227 = vst.msk [vmem:[%s4592_s25 + $0x10] sm:$0xf] %vm3222_vm3, %v3098_v36  ;;  %v2711_v40 = vadd.f32 %v2398_v39, %v2043_v37  ;;  %v2045_v42 = vpop.f32.mrf.mxu1 }
  0xc4   : > { %v2046_v45 = vadd.f32 %v2045_v42, %v1196_v38 }
  0xc5   : > { %3773 = vmatmul.msk.bf16.gmra.mxu0 %vm972_vm2, %v4309_v34  ;;  %3821 = vmatmul.msk.bf16.gmra.mxu3 %vm972_vm2, %v4357_v35  ;;  %v2843_v43 = vadd.f32 %v4582_v48, %v2711_v40  ;;  %v4312_v40 = vld [vmem:[%s4502_s12 + $0x70] sm:$0xff] }
  0xc6   : > { %4097 = vmatmul.msk.bf16.gmra.mxu1 %vm972_vm2, %v4245_v63 }
  0xc7   : > { %v2971_v44 = vmax.f32 %v2843_v43, 0.0  ;;  %4175 = vmatmul.msk.bf16.gmra.mxu2 %vm972_vm2, %v4247_v41 }
  0xc8   : > { %v4638_v46 = vpop.f32.mrf.mxu3 }
  0xc9   : > { %v3099_v49 = vpack.c.bf16 %v2971_v44, %v2971_v44 }
  0xca   : > { %v1198_v50 = vpop.f32.mrf.mxu0  ;;  %v2401_v51 = vpop.f32.mrf.mxu2 }
  0xcb   : > { %3228 = vst.msk [vmem:[%s4592_s25 + $0x14] sm:$0xf] %vm3222_vm3, %v3099_v49  ;;  %v2712_v52 = vadd.f32 %v2401_v51, %v2046_v45  ;;  %v2047_v53 = vpop.f32.mrf.mxu1 }
  0xcc   : > { %v2048_v61 = vadd.f32 %v2047_v53, %v1198_v50  ;;  %v4250_v50 = vld [vmem:[%s4514_s16 + $0x80] sm:$0xff] }
  0xcd   : > { %v2844_v54 = vadd.f32 %v4582_v48, %v2712_v52 }
  0xcf   : > { %v2972_v56 = vmax.f32 %v2844_v54, 0.0 }
  0xd0   : > { %v4643_v57 = vpop.f32.mrf.mxu3 }
  0xd1   : > { %v3100_v60 = vpack.c.bf16 %v2972_v56, %v2972_v56 }
  0xd2   : > { %v1201_v62 = vpop.f32.mrf.mxu0  ;;  %v2403_v63 = vpop.f32.mrf.mxu2 }
  0xd3   : > { %3229 = vst.msk [vmem:[%s4592_s25 + $0x18] sm:$0xf] %vm3222_vm3, %v3100_v60  ;;  %v2713_v0 = vadd.f32 %v2403_v63, %v2048_v61  ;;  %v2050_v2 = vpop.f32.mrf.mxu1 }
  0xd4   : > { %v2051_v6 = vadd.f32 %v2050_v2, %v1201_v62 }
  0xd5   : > { %3774 = vmatmul.msk.bf16.gmra.mxu0 %vm972_vm2, %v4310_v58  ;;  %3822 = vmatmul.msk.bf16.gmra.mxu3 %vm972_vm2, %v4358_v59  ;;  %v2845_v3 = vadd.f32 %v4582_v48, %v2713_v0 }
  0xd6   : > { %4098 = vmatmul.msk.bf16.gmra.mxu1 %vm972_vm2, %v4246_v20 }
  0xd7   : > { %v2973_v5 = vmax.f32 %v2845_v3, 0.0  ;;  %4176 = vmatmul.msk.bf16.gmra.mxu2 %vm972_vm2, %v4248_v1  ;;  %v4313_v3 = vld [vmem:[%s4502_s12 + $0x78] sm:$0xff] }
  0xd8   : > { %v4655_v7 = vpop.f32.mrf.mxu3 }
  0xd9   : > { %v3101_v8 = vpack.c.bf16 %v2973_v5, %v2973_v5 }
  0xda   : > { %v1203_v9 = vpop.f32.mrf.mxu0  ;;  %v2406_v10 = vpop.f32.mrf.mxu2 }
  0xdb   : > { %3230 = vst.msk [vmem:[%s4592_s25 + $0x1c] sm:$0xf] %vm3222_vm3, %v3101_v8  ;;  %v2714_v11 = vadd.f32 %v2406_v10, %v2051_v6  ;;  %v2052_v13 = vpop.f32.mrf.mxu1 }
  0xdc   : > { %v2053_v20 = vadd.f32 %v2052_v13, %v1203_v9 }
  0xdd   : > { %v2846_v14 = vadd.f32 %v4582_v48, %v2714_v11  ;;  %v4251_v11 = vld [vmem:[%s4514_s16 + $0x88] sm:$0xff] }
  0xdf   : > { %v2974_v15 = vmax.f32 %v2846_v14, 0.0 }
  0xe0   : > { %v4660_v16 = vpop.f32.mrf.mxu3 }
  0xe1   : > { %v3102_v19 = vpack.c.bf16 %v2974_v15, %v2974_v15 }
  0xe2   : > { %v1206_v21 = vpop.f32.mrf.mxu0  ;;  %v2408_v22 = vpop.f32.mrf.mxu2 }
  0xe3   : > { %3231 = vst.msk [vmem:[%s4592_s25 + $0x20] sm:$0xf] %vm3222_vm3, %v3102_v19  ;;  %v2715_v23 = vadd.f32 %v2408_v22, %v2053_v20  ;;  %v2055_v26 = vpop.f32.mrf.mxu1 }
  0xe4   : > { %v2056_v29 = vadd.f32 %v2055_v26, %v1206_v21 }
  0xe5   : > { %3775 = vmatmul.msk.bf16.gmra.mxu0 %vm972_vm2, %v4311_v17  ;;  %3823 = vmatmul.msk.bf16.gmra.mxu3 %vm972_vm2, %v4359_v18  ;;  %v2847_v27 = vadd.f32 %v4582_v48, %v2715_v23 }
  0xe6   : > { %4099 = vmatmul.msk.bf16.gmra.mxu1 %vm972_vm2, %v4247_v41  ;;  %v4360_v41 = vld [vmem:[%s4502_s12 + $0x1f0] sm:$0xff] }
  0xe7   : > { %v2975_v28 = vmax.f32 %v2847_v27, 0.0  ;;  %4177 = vmatmul.msk.bf16.gmra.mxu2 %vm972_vm2, %v4249_v24 }
  0xe8   : > { %v4672_v30 = vpop.f32.mrf.mxu3 }
  0xe9   : > { %v3103_v31 = vpack.c.bf16 %v2975_v28, %v2975_v28 }
  0xea   : > { %v1208_v32 = vpop.f32.mrf.mxu0  ;;  %v2411_v34 = vpop.f32.mrf.mxu2 }
  0xeb   : > { %3232 = vst.msk [vmem:[%s4592_s25 + $0x24] sm:$0xf] %vm3222_vm3, %v3103_v31  ;;  %v2716_v35 = vadd.f32 %v2411_v34, %v2056_v29  ;;  %v2057_v36 = vpop.f32.mrf.mxu1  ;;  %v4314_v29 = vld [vmem:[%s4502_s12 + $0x80] sm:$0xff] }
  0xec   : > { %v2058_v43 = vadd.f32 %v2057_v36, %v1208_v32 }
  0xed   : > { %v2848_v37 = vadd.f32 %v4582_v48, %v2716_v35 }
  0xef   : > { %v2976_v38 = vmax.f32 %v2848_v37, 0.0  ;;  %v4252_v37 = vld [vmem:[%s4514_s16 + $0x90] sm:$0xff] }
  0xf0   : > { %v4677_v39 = vpop.f32.mrf.mxu3 }
  0xf1   : > { %v3104_v42 = vpack.c.bf16 %v2976_v38, %v2976_v38 }
  0xf2   : > { %v1211_v44 = vpop.f32.mrf.mxu0  ;;  %v2413_v45 = vpop.f32.mrf.mxu2 }
  0xf3   : > { %3233 = vst.msk [vmem:[%s4592_s25 + $0x28] sm:$0xf] %vm3222_vm3, %v3104_v42  ;;  %v2717_v49 = vadd.f32 %v2413_v45, %v2058_v43  ;;  %v2060_v51 = vpop.f32.mrf.mxu1 }
  0xf4   : > { %v2061_v54 = vadd.f32 %v2060_v51, %v1211_v44 }
  0xf5   : > { %3776 = vmatmul.msk.bf16.gmra.mxu0 %vm972_vm2, %v4312_v40  ;;  %3824 = vmatmul.msk.bf16.gmra.mxu3 %vm972_vm2, %v4360_v41  ;;  %v2849_v52 = vadd.f32 %v4582_v48, %v2717_v49 }
  0xf6   : > { %4100 = vmatmul.msk.bf16.gmra.mxu1 %vm972_vm2, %v4248_v1  ;;  %v4361_v1 = vld [vmem:[%s4502_s12 + $0x1f8] sm:$0xff] }
  0xf7   : > { %v2977_v53 = vmax.f32 %v2849_v52, 0.0  ;;  %4178 = vmatmul.msk.bf16.gmra.mxu2 %vm972_vm2, %v4250_v50 }
  0xf8   : > { %v4689_v56 = vpop.f32.mrf.mxu3 }
  0xf9   : > { %v3105_v58 = vpack.c.bf16 %v2977_v53, %v2977_v53 }
  0xfa   : > { %v1213_v59 = vpop.f32.mrf.mxu0  ;;  %v2416_v60 = vpop.f32.mrf.mxu2 }
  0xfb   : > { %3234 = vst.msk [vmem:[%s4592_s25 + $0x2c] sm:$0xf] %vm3222_vm3, %v3105_v58  ;;  %v2718_v61 = vadd.f32 %v2416_v60, %v2061_v54  ;;  %v2062_v62 = vpop.f32.mrf.mxu1 }
  0xfc   : > { %v2063_v6 = vadd.f32 %v2062_v62, %v1213_v59  ;;  %v4315_v59 = vld [vmem:[%s4502_s12 + $0x88] sm:$0xff] }
  0xfd   : > { %v2850_v63 = vadd.f32 %v4582_v48, %v2718_v61 }
  0xff   : > { %v2978_v0 = vmax.f32 %v2850_v63, 0.0 }
 0x100   : > { %v4694_v2 = vpop.f32.mrf.mxu3 }
 0x101   : > { %v3106_v5 = vpack.c.bf16 %v2978_v0, %v2978_v0 }
 0x102   : > { %v1216_v8 = vpop.f32.mrf.mxu0  ;;  %v2418_v9 = vpop.f32.mrf.mxu2 }
 0x103   : > { %3235 = vst.msk [vmem:[%s4592_s25 + $0x30] sm:$0xf] %vm3222_vm3, %v3106_v5  ;;  %v2719_v10 = vadd.f32 %v2418_v9, %v2063_v6  ;;  %v2065_v13 = vpop.f32.mrf.mxu1 }
 0x104   : > { %v2066_v17 = vadd.f32 %v2065_v13, %v1216_v8 }
 0x105   : > { %3777 = vmatmul.msk.bf16.gmra.mxu0 %vm972_vm2, %v4313_v3  ;;  %3825 = vmatmul.msk.bf16.gmra.mxu3 %vm972_vm2, %v4361_v1  ;;  %v2851_v14 = vadd.f32 %v4582_v48, %v2719_v10  ;;  %v4253_v3 = vld [vmem:[%s4514_s16 + $0x98] sm:$0xff] }
 0x106   : > { %4101 = vmatmul.msk.bf16.gmra.mxu1 %vm972_vm2, %v4249_v24  ;;  %v4282_v24 = vld [vmem:[%s4514_s16 + $0x180] sm:$0xff] }
 0x107   : > { %v2979_v15 = vmax.f32 %v2851_v14, 0.0  ;;  %4179 = vmatmul.msk.bf16.gmra.mxu2 %vm972_vm2, %v4251_v11 }
 0x108   : > { %v4706_v18 = vpop.f32.mrf.mxu3 }
 0x109   : > { %v3107_v19 = vpack.c.bf16 %v2979_v15, %v2979_v15 }
 0x10a   : > { %v1218_v20 = vpop.f32.mrf.mxu0  ;;  %v2421_v21 = vpop.f32.mrf.mxu2 }
 0x10b   : > { %3236 = vst.msk [vmem:[%s4592_s25 + $0x34] sm:$0xf] %vm3222_vm3, %v3107_v19  ;;  %v2720_v22 = vadd.f32 %v2421_v21, %v2066_v17  ;;  %v2067_v23 = vpop.f32.mrf.mxu1 }
 0x10c   : > { %v2068_v32 = vadd.f32 %v2067_v23, %v1218_v20 }
 0x10d   : > { %v2852_v26 = vadd.f32 %v4582_v48, %v2720_v22  ;;  %v4316_v22 = vld [vmem:[%s4502_s12 + $0x90] sm:$0xff] }
 0x10f   : > { %v2980_v27 = vmax.f32 %v2852_v26, 0.0 }
 0x110   : > { %v4711_v28 = vpop.f32.mrf.mxu3 }
 0x111   : > { %5540 = vst [vmem:[#allocation2_spill] sm:$0xff] %v4711_v28  ;;  %v3108_v31 = vpack.c.bf16 %v2980_v27, %v2980_v27 }
 0x112   : > { %v1221_v34 = vpop.f32.mrf.mxu0  ;;  %v2423_v35 = vpop.f32.mrf.mxu2 }
 0x113   : > { %3237 = vst.msk [vmem:[%s4592_s25 + $0x38] sm:$0xf] %vm3222_vm3, %v3108_v31  ;;  %v2721_v36 = vadd.f32 %v2423_v35, %v2068_v32  ;;  %v2070_v38 = vpop.f32.mrf.mxu1  ;;  %v4254_v31 = vld [vmem:[%s4514_s16 + $0xa0] sm:$0xff] }
 0x114   : > { %v2071_v42 = vadd.f32 %v2070_v38, %v1221_v34 }
 0x115   : > { %3778 = vmatmul.msk.bf16.gmra.mxu0 %vm972_vm2, %v4314_v29  ;;  %4134 = vmatmul.msk.bf16.vlgmr.msrb.gmra.mxu3 %vm972_vm2, %v4282_v24  ;;  %v2853_v40 = vadd.f32 %v4582_v48, %v2721_v36 }
 0x116   : > { %4102 = vmatmul.msk.bf16.gmra.mxu1 %vm972_vm2, %v4250_v50  ;;  %v4283_v50 = vld [vmem:[%s4514_s16 + $0x188] sm:$0xff] }
 0x117   : > { %v2981_v41 = vmax.f32 %v2853_v40, 0.0  ;;  %4180 = vmatmul.msk.bf16.gmra.mxu2 %vm972_vm2, %v4252_v37 }
 0x118   : > { %v4723_v43 = vpop.f32.mrf.mxu3 }
 0x119   : > { %5541 = vst [vmem:[#allocation3_spill] sm:$0xff] %v4723_v43  ;;  %v3109_v44 = vpack.c.bf16 %v2981_v41, %v2981_v41  ;;  %v4268_v43 = vld [vmem:[%s4514_s16 + $0x110] sm:$0xff] }
 0x11a   : > { %v1223_v45 = vpop.f32.mrf.mxu0  ;;  %v2426_v49 = vpop.f32.mrf.mxu2 }
 0x11b   : > { %3238 = vst.msk [vmem:[%s4592_s25 + $0x3c] sm:$0xf] %vm3222_vm3, %v3109_v44  ;;  %v2722_v51 = vadd.f32 %v2426_v49, %v2071_v42  ;;  %v2072_v52 = vpop.f32.mrf.mxu1 }
 0x11c   : > { %v2073_v61 = vadd.f32 %v2072_v52, %v1223_v45 }
 0x11d   : > { %v2854_v53 = vadd.f32 %v4582_v48, %v2722_v51 }
 0x11f   : > { %v2982_v54 = vmax.f32 %v2854_v53, 0.0  ;;  %v4317_v53 = vld [vmem:[%s4502_s12 + $0x98] sm:$0xff] }
 0x120   : > { %v4728_v58 = vpop.f32.mrf.mxu3 }
 0x121   : > { %5542 = vst [vmem:[#allocation4_spill] sm:$0xff] %v4728_v58  ;;  %v3110_v60 = vpack.c.bf16 %v2982_v54, %v2982_v54 }
 0x122   : > { %v1226_v62 = vpop.f32.mrf.mxu0  ;;  %v2428_v63 = vpop.f32.mrf.mxu2 }
 0x123   : > { %3239 = vst.msk [vmem:[%s4592_s25 + $0x40] sm:$0xf] %vm3222_vm3, %v3110_v60  ;;  %v2723_v0 = vadd.f32 %v2428_v63, %v2073_v61  ;;  %v2075_v1 = vpop.f32.mrf.mxu1 }
 0x124   : > { %v2076_v8 = vadd.f32 %v2075_v1, %v1226_v62  ;;  %v4255_v62 = vld [vmem:[%s4514_s16 + $0xa8] sm:$0xff] }
 0x125   : > { %3779 = vmatmul.msk.bf16.gmra.mxu0 %vm972_vm2, %v4315_v59  ;;  %4135 = vmatmul.msk.bf16.gmra.mxu3 %vm972_vm2, %v4283_v50  ;;  %v2855_v5 = vadd.f32 %v4582_v48, %v2723_v0 }
 0x126   : > { %4103 = vmatmul.msk.bf16.gmra.mxu1 %vm972_vm2, %v4251_v11  ;;  %v4749_v11 = vld [vmem:[%s4514_s16 + $0x190] sm:$0xff] }
 0x127   : > { %v2983_v6 = vmax.f32 %v2855_v5, 0.0  ;;  %4181 = vmatmul.msk.bf16.gmra.mxu2 %vm972_vm2, %v4253_v3 }
 0x128   : > { %v4740_v9 = vpop.f32.mrf.mxu3 }
 0x129   : > { %5543 = vst [vmem:[#allocation5_spill] sm:$0xff] %v4740_v9  ;;  %v3111_v10 = vpack.c.bf16 %v2983_v6, %v2983_v6  ;;  %v4267_v9 = vld [vmem:[%s4514_s16 + $0x108] sm:$0xff] }
 0x12a   : > { %v1228_v13 = vpop.f32.mrf.mxu0  ;;  %v2431_v14 = vpop.f32.mrf.mxu2 }
 0x12b   : > { %3240 = vst.msk [vmem:[%s4592_s25 + $0x44] sm:$0xf] %vm3222_vm3, %v3111_v10  ;;  %v2724_v15 = vadd.f32 %v2431_v14, %v2076_v8  ;;  %v2077_v17 = vpop.f32.mrf.mxu1 }
 0x12c   : > { %v2078_v26 = vadd.f32 %v2077_v17, %v1228_v13 }
 0x12d   : > { %v2856_v19 = vadd.f32 %v4582_v48, %v2724_v15 }
 0x12f   : > { %v2984_v20 = vmax.f32 %v2856_v19, 0.0 }
 0x130   : > { %v4745_v21 = vpop.f32.mrf.mxu3 }
 0x131   : > { %5544 = vst [vmem:[#allocation6_spill] sm:$0xff] %v4745_v21  ;;  %v3112_v23 = vpack.c.bf16 %v2984_v20, %v2984_v20 }
 0x132   : > { %v1231_v27 = vpop.f32.mrf.mxu0  ;;  %v2433_v29 = vpop.f32.mrf.mxu2 }
 0x133   : > { %3241 = vst.msk [vmem:[%s4592_s25 + $0x48] sm:$0xf] %vm3222_vm3, %v3112_v23  ;;  %v2725_v24 = vadd.f32 %v2433_v29, %v2078_v26  ;;  %v2080_v32 = vpop.f32.mrf.mxu1 }
 0x134   : > { %v2081_v36 = vadd.f32 %v2080_v32, %v1231_v27  ;;  %v4256_v32 = vld [vmem:[%s4514_s16 + $0xb0] sm:$0xff] }
 0x135   : > { %3780 = vmatmul.msk.bf16.gmra.mxu0 %vm972_vm2, %v4316_v22  ;;  %4136 = vmatmul.msk.bf16.gmra.mxu3 %vm972_vm2, %v4749_v11  ;;  %v2857_v34 = vadd.f32 %v4582_v48, %v2725_v24  ;;  %v4318_v22 = vld [vmem:[%s4502_s12 + $0xa0] sm:$0xff] }
 0x136   : > { %4104 = vmatmul.msk.bf16.gmra.mxu1 %vm972_vm2, %v4252_v37  ;;  %v4769_v37 = vld [vmem:[%s4514_s16 + $0x198] sm:$0xff] }
 0x137   : > { %v2985_v35 = vmax.f32 %v2857_v34, 0.0  ;;  %4182 = vmatmul.msk.bf16.gmra.mxu2 %vm972_vm2, %v4254_v31 }
 0x138   : > { %v4760_v38 = vpop.f32.mrf.mxu3 }
 0x139   : > { %5545 = vst [vmem:[#allocation7_spill] sm:$0xff] %v4760_v38  ;;  %v3113_v40 = vpack.c.bf16 %v2985_v35, %v2985_v35 }
 0x13a   : > { %v1233_v41 = vpop.f32.mrf.mxu0  ;;  %v2436_v42 = vpop.f32.mrf.mxu2 }
 0x13b   : > { %3242 = vst.msk [vmem:[%s4592_s25 + $0x4c] sm:$0xf] %vm3222_vm3, %v3113_v40  ;;  %v2726_v44 = vadd.f32 %v2436_v42, %v2081_v36  ;;  %v2082_v45 = vpop.f32.mrf.mxu1 }
 0x13c   : > { %v2083_v59 = vadd.f32 %v2082_v45, %v1233_v41 }
 0x13d   : > { %v2858_v49 = vadd.f32 %v4582_v48, %v2726_v44 }
 0x13f   : > { %v2986_v51 = vmax.f32 %v2858_v49, 0.0 }
 0x140   : > { %v4765_v52 = vpop.f32.mrf.mxu3 }
 0x141   : > { %5546 = vst [vmem:[#allocation8_spill] sm:$0xff] %v4765_v52  ;;  %v3114_v54 = vpack.c.bf16 %v2986_v51, %v2986_v51  ;;  %v4266_v52 = vld [vmem:[%s4514_s16 + $0x100] sm:$0xff] }
 0x142   : > { %v1236_v50 = vpop.f32.mrf.mxu0  ;;  %v2438_v60 = vpop.f32.mrf.mxu2 }
 0x143   : > { %3243 = vst.msk [vmem:[%s4592_s25 + $0x50] sm:$0xf] %vm3222_vm3, %v3114_v54  ;;  %v2727_v61 = vadd.f32 %v2438_v60, %v2083_v59  ;;  %v2085_v63 = vpop.f32.mrf.mxu1 }
 0x144   : > { %v2086_v5 = vadd.f32 %v2085_v63, %v1236_v50  ;;  %v4319_v50 = vld [vmem:[%s4502_s12 + $0xa8] sm:$0xff] }
 0x145   : > { %3781 = vmatmul.msk.bf16.gmra.mxu0 %vm972_vm2, %v4317_v53  ;;  %4137 = vmatmul.msk.bf16.gmra.mxu3 %vm972_vm2, %v4769_v37  ;;  %v2859_v0 = vadd.f32 %v4582_v48, %v2727_v61 }
 0x146   : > { %4105 = vmatmul.msk.bf16.gmra.mxu1 %vm972_vm2, %v4253_v3  ;;  %v4789_v3 = vld [vmem:[%s4514_s16 + $0x1a0] sm:$0xff] }
 0x147   : > { %v2987_v1 = vmax.f32 %v2859_v0, 0.0  ;;  %4183 = vmatmul.msk.bf16.gmra.mxu2 %vm972_vm2, %v4255_v62 }
 0x148   : > { %v4780_v6 = vpop.f32.mrf.mxu3 }
 0x149   : > { %5547 = vst [vmem:[#allocation9_spill] sm:$0xff] %v4780_v6  ;;  %v3115_v8 = vpack.c.bf16 %v2987_v1, %v2987_v1 }
 0x14a   : > { %v1238_v10 = vpop.f32.mrf.mxu0  ;;  %v2441_v13 = vpop.f32.mrf.mxu2 }
 0x14b   : > { %3244 = vst.msk [vmem:[%s4592_s25 + $0x54] sm:$0xf] %vm3222_vm3, %v3115_v8  ;;  %v2728_v14 = vadd.f32 %v2441_v13, %v2086_v5  ;;  %v2087_v15 = vpop.f32.mrf.mxu1  ;;  %v4257_v5 = vld [vmem:[%s4514_s16 + $0xb8] sm:$0xff] }
 0x14c   : > { %v2088_v26 = vadd.f32 %v2087_v15, %v1238_v10 }
 0x14d   : > { %v2860_v17 = vadd.f32 %v4582_v48, %v2728_v14 }
 0x14f   : > { %v2988_v19 = vmax.f32 %v2860_v17, 0.0 }
 0x150   : > { %v4785_v20 = vpop.f32.mrf.mxu3 }
 0x151   : > { %5548 = vst [vmem:[#allocation10_spill] sm:$0xff] %v4785_v20  ;;  %v3116_v23 = vpack.c.bf16 %v2988_v19, %v2988_v19 }
 0x152   : > { %v1241_v27 = vpop.f32.mrf.mxu0  ;;  %v2443_v29 = vpop.f32.mrf.mxu2 }
 0x153   : > { %3245 = vst.msk [vmem:[%s4592_s25 + $0x58] sm:$0xf] %vm3222_vm3, %v3116_v23  ;;  %v2729_v24 = vadd.f32 %v2443_v29, %v2088_v26  ;;  %v2090_v34 = vpop.f32.mrf.mxu1 }
 0x154   : > { %v2091_v40 = vadd.f32 %v2090_v34, %v1241_v27  ;;  %v4320_v34 = vld [vmem:[%s4502_s12 + $0xb0] sm:$0xff] }
 0x155   : > { %3782 = vmatmul.msk.bf16.gmra.mxu0 %vm972_vm2, %v4318_v22  ;;  %4138 = vmatmul.msk.bf16.gmra.mxu3 %vm972_vm2, %v4789_v3  ;;  %v2861_v35 = vadd.f32 %v4582_v48, %v2729_v24 }
 0x156   : > { %4106 = vmatmul.msk.bf16.gmra.mxu1 %vm972_vm2, %v4254_v31  ;;  %v4809_v31 = vld [vmem:[%s4514_s16 + $0x1a8] sm:$0xff] }
 0x157   : > { %v2989_v36 = vmax.f32 %v2861_v35, 0.0  ;;  %4184 = vmatmul.msk.bf16.gmra.mxu2 %vm972_vm2, %v4256_v32 }
 0x158   : > { %v4800_v41 = vpop.f32.mrf.mxu3 }
 0x159   : > { %5549 = vst [vmem:[#allocation11_spill] sm:$0xff] %v4800_v41  ;;  %v3117_v42 = vpack.c.bf16 %v2989_v36, %v2989_v36  ;;  %v4265_v41 = vld [vmem:[%s4514_s16 + $0xf8] sm:$0xff] }
 0x15a   : > { %v1243_v44 = vpop.f32.mrf.mxu0  ;;  %v2446_v45 = vpop.f32.mrf.mxu2 }
 0x15b   : > { %3246 = vst.msk [vmem:[%s4592_s25 + $0x5c] sm:$0xf] %vm3222_vm3, %v3117_v42  ;;  %v2730_v49 = vadd.f32 %v2446_v45, %v2091_v40  ;;  %v2092_v51 = vpop.f32.mrf.mxu1  ;;  %v4258_v45 = vld [vmem:[%s4514_s16 + $0xc0] sm:$0xff] }
 0x15c   : > { %v2093_v61 = vadd.f32 %v2092_v51, %v1243_v44 }
 0x15d   : > { %v2862_v53 = vadd.f32 %v4582_v48, %v2730_v49 }
 0x15f   : > { %v2990_v54 = vmax.f32 %v2862_v53, 0.0 }
 0x160   : > { %v4805_v59 = vpop.f32.mrf.mxu3 }
 0x161   : > { %5550 = vst [vmem:[#allocation12_spill] sm:$0xff] %v4805_v59  ;;  %v3118_v60 = vpack.c.bf16 %v2990_v54, %v2990_v54 }
 0x162   : > { %v1246_v63 = vpop.f32.mrf.mxu0  ;;  %v2448_v0 = vpop.f32.mrf.mxu2 }
 0x163   : > { %3247 = vst.msk [vmem:[%s4592_s25 + $0x60] sm:$0xf] %vm3222_vm3, %v3118_v60  ;;  %v2731_v1 = vadd.f32 %v2448_v0, %v2093_v61  ;;  %v2095_v8 = vpop.f32.mrf.mxu1 }
 0x164   : > { %v2096_v14 = vadd.f32 %v2095_v8, %v1246_v63 }
 0x165   : > { %3783 = vmatmul.msk.bf16.gmra.mxu0 %vm972_vm2, %v4319_v50  ;;  %4139 = vmatmul.msk.bf16.gmra.mxu3 %vm972_vm2, %v4809_v31  ;;  %v2863_v10 = vadd.f32 %v4582_v48, %v2731_v1 }
 0x166   : > { %4107 = vmatmul.msk.bf16.gmra.mxu1 %vm972_vm2, %v4255_v62  ;;  %v4829_v62 = vld [vmem:[%s4514_s16 + $0x1b0] sm:$0xff] }
 0x167   : > { %v2991_v13 = vmax.f32 %v2863_v10, 0.0  ;;  %4185 = vmatmul.msk.bf16.gmra.mxu2 %vm972_vm2, %v4257_v5 }
 0x168   : > { %v4820_v15 = vpop.f32.mrf.mxu3 }
 0x169   : > { %5551 = vst [vmem:[#allocation13_spill] sm:$0xff] %v4820_v15  ;;  %v3119_v17 = vpack.c.bf16 %v2991_v13, %v2991_v13 }
 0x16a   : > { %v1248_v19 = vpop.f32.mrf.mxu0  ;;  %v2451_v22 = vpop.f32.mrf.mxu2 }
 0x16b   : > { %3248 = vst.msk [vmem:[%s4592_s25 + $0x64] sm:$0xf] %vm3222_vm3, %v3119_v17  ;;  %v2732_v23 = vadd.f32 %v2451_v22, %v2096_v14  ;;  %v2097_v26 = vpop.f32.mrf.mxu1  ;;  %v4321_v14 = vld [vmem:[%s4502_s12 + $0xb8] sm:$0xff] }
 0x16c   : > { %v2098_v36 = vadd.f32 %v2097_v26, %v1248_v19 }
 0x16d   : > { %v2864_v27 = vadd.f32 %v4582_v48, %v2732_v23 }
 0x16f   : > { %v2992_v29 = vmax.f32 %v2864_v27, 0.0  ;;  %v4259_v27 = vld [vmem:[%s4514_s16 + $0xc8] sm:$0xff] }
 0x170   : > { %v4825_v24 = vpop.f32.mrf.mxu3 }
 0x171   : > { %5552 = vst [vmem:[#allocation14_spill] sm:$0xff] %v4825_v24  ;;  %v3120_v35 = vpack.c.bf16 %v2992_v29, %v2992_v29 }
 0x172   : > { %v1251_v40 = vpop.f32.mrf.mxu0  ;;  %v2453_v42 = vpop.f32.mrf.mxu2 }
 0x173   : > { %3249 = vst.msk [vmem:[%s4592_s25 + $0x68] sm:$0xf] %vm3222_vm3, %v3120_v35  ;;  %v2733_v44 = vadd.f32 %v2453_v42, %v2098_v36  ;;  %v2100_v49 = vpop.f32.mrf.mxu1 }
 0x174   : > { %v2101_v54 = vadd.f32 %v2100_v49, %v1251_v40 }
 0x175   : > { %3784 = vmatmul.msk.bf16.gmra.mxu0 %vm972_vm2, %v4320_v34  ;;  %4140 = vmatmul.msk.bf16.gmra.mxu3 %vm972_vm2, %v4829_v62  ;;  %v2865_v51 = vadd.f32 %v4582_v48, %v2733_v44 }
 0x176   : > { %4108 = vmatmul.msk.bf16.gmra.mxu1 %vm972_vm2, %v4256_v32  ;;  %v4849_v32 = vld [vmem:[%s4514_s16 + $0x1b8] sm:$0xff] }
 0x177   : > { %v2993_v53 = vmax.f32 %v2865_v51, 0.0  ;;  %4186 = vmatmul.msk.bf16.gmra.mxu2 %vm972_vm2, %v4258_v45 }
 0x178   : > { %v4840_v50 = vpop.f32.mrf.mxu3 }
 0x179   : > { %5553 = vst [vmem:[#allocation15_spill] sm:$0xff] %v4840_v50  ;;  %v3121_v60 = vpack.c.bf16 %v2993_v53, %v2993_v53 }
 0x17a   : > { %v1253_v61 = vpop.f32.mrf.mxu0  ;;  %v2456_v63 = vpop.f32.mrf.mxu2 }
 0x17b   : > { %3250 = vst.msk [vmem:[%s4592_s25 + $0x6c] sm:$0xf] %vm3222_vm3, %v3121_v60  ;;  %v2734_v0 = vadd.f32 %v2456_v63, %v2101_v54  ;;  %v2102_v1 = vpop.f32.mrf.mxu1  ;;  %v4322_v63 = vld [vmem:[%s4502_s12 + $0xc0] sm:$0xff] }
 0x17c   : > { %v2103_v19 = vadd.f32 %v2102_v1, %v1253_v61 }
 0x17d   : > { %v2866_v8 = vadd.f32 %v4582_v48, %v2734_v0 }
 0x17f   : > { %v2994_v10 = vmax.f32 %v2866_v8, 0.0 }
 0x180   : > { %v4845_v13 = vpop.f32.mrf.mxu3 }
 0x181   : > { %5554 = vst [vmem:[#allocation16_spill] sm:$0xff] %v4845_v13  ;;  %v3122_v17 = vpack.c.bf16 %v2994_v10, %v2994_v10 }
 0x182   : > { %v1256_v22 = vpop.f32.mrf.mxu0  ;;  %v2458_v23 = vpop.f32.mrf.mxu2 }
 0x183   : > { %3251 = vst.msk [vmem:[%s4592_s25 + $0x70] sm:$0xf] %vm3222_vm3, %v3122_v17  ;;  %v2735_v26 = vadd.f32 %v2458_v23, %v2103_v19  ;;  %v2105_v29 = vpop.f32.mrf.mxu1  ;;  %v4260_v17 = vld [vmem:[%s4514_s16 + $0xd0] sm:$0xff] }
 0x184   : > { %v2106_v36 = vadd.f32 %v2105_v29, %v1256_v22 }
 0x185   : > { %3785 = vmatmul.msk.bf16.gmra.mxu0 %vm972_vm2, %v4321_v14  ;;  %4141 = vmatmul.msk.bf16.gmra.mxu3 %vm972_vm2, %v4849_v32  ;;  %v2867_v34 = vadd.f32 %v4582_v48, %v2735_v26 }
 0x186   : > { %4109 = vmatmul.msk.bf16.gmra.mxu1 %vm972_vm2, %v4257_v5  ;;  %v4869_v5 = vld [vmem:[%s4514_s16 + $0x1c0] sm:$0xff] }
 0x187   : > { %v2995_v35 = vmax.f32 %v2867_v34, 0.0  ;;  %4187 = vmatmul.msk.bf16.gmra.mxu2 %vm972_vm2, %v4259_v27 }
 0x188   : > { %v4860_v40 = vpop.f32.mrf.mxu3 }
 0x189   : > { %5555 = vst [vmem:[#allocation17_spill] sm:$0xff] %v4860_v40  ;;  %v3123_v42 = vpack.c.bf16 %v2995_v35, %v2995_v35  ;;  %v4263_v40 = vld [vmem:[%s4514_s16 + $0xe8] sm:$0xff] }
 0x18a   : > { %v1258_v44 = vpop.f32.mrf.mxu0  ;;  %v2461_v49 = vpop.f32.mrf.mxu2 }
 0x18b   : > { %3252 = vst.msk [vmem:[%s4592_s25 + $0x74] sm:$0xf] %vm3222_vm3, %v3123_v42  ;;  %v2736_v51 = vadd.f32 %v2461_v49, %v2106_v36  ;;  %v2107_v53 = vpop.f32.mrf.mxu1 }
 0x18c   : > { %v2108_v1 = vadd.f32 %v2107_v53, %v1258_v44 }
 0x18d   : > { %v2868_v54 = vadd.f32 %v4582_v48, %v2736_v51 }
 0x18f   : > { %v2996_v60 = vmax.f32 %v2868_v54, 0.0  ;;  %v4323_v54 = vld [vmem:[%s4502_s12 + $0xc8] sm:$0xff] }
 0x190   : > { %v4865_v61 = vpop.f32.mrf.mxu3 }
 0x191   : > { %5556 = vst [vmem:[#allocation18_spill] sm:$0xff] %v4865_v61  ;;  %v3124_v0 = vpack.c.bf16 %v2996_v60, %v2996_v60 }
 0x192   : > { %v1261_v8 = vpop.f32.mrf.mxu0  ;;  %v2463_v10 = vpop.f32.mrf.mxu2 }
 0x193   : > { %3253 = vst.msk [vmem:[%s4592_s25 + $0x78] sm:$0xf] %vm3222_vm3, %v3124_v0  ;;  %v2737_v14 = vadd.f32 %v2463_v10, %v2108_v1  ;;  %v2110_v19 = vpop.f32.mrf.mxu1  ;;  %v4261_v10 = vld [vmem:[%s4514_s16 + $0xd8] sm:$0xff] }
 0x194   : > { %v2111_v26 = vadd.f32 %v2110_v19, %v1261_v8 }
 0x195   : > { %3786 = vmatmul.msk.bf16.gmra.mxu0 %vm972_vm2, %v4322_v63  ;;  %4142 = vmatmul.msk.bf16.gmra.mxu3 %vm972_vm2, %v4869_v5  ;;  %v2869_v22 = vadd.f32 %v4582_v48, %v2737_v14 }
 0x196   : > { %4110 = vmatmul.msk.bf16.gmra.mxu1 %vm972_vm2, %v4258_v45  ;;  %v4889_v45 = vld [vmem:[%s4514_s16 + $0x1c8] sm:$0xff] }
 0x197   : > { %v2997_v23 = vmax.f32 %v2869_v22, 0.0  ;;  %4188 = vmatmul.msk.bf16.gmra.mxu2 %vm972_vm2, %v4260_v17 }
 0x198   : > { %v4880_v29 = vpop.f32.mrf.mxu3 }
 0x199   : > { %v3125_v34 = vpack.c.bf16 %v2997_v23, %v2997_v23 }
 0x19a   : > { %v1263_v35 = vpop.f32.mrf.mxu0  ;;  %v2466_v36 = vpop.f32.mrf.mxu2 }
 0x19b   : > { %3254 = vst.msk [vmem:[%s4592_s25 + $0x7c] sm:$0xf] %vm3222_vm3, %v3125_v34  ;;  %v2738_v42 = vadd.f32 %v2466_v36, %v2111_v26  ;;  %v2112_v44 = vpop.f32.mrf.mxu1 }
 0x19c   : > { %v2113_v63 = vadd.f32 %v2112_v44, %v1263_v35 }
 0x19d   : > { %v2870_v49 = vadd.f32 %v4582_v48, %v2738_v42 }
 0x19f   : > { %v2998_v51 = vmax.f32 %v2870_v49, 0.0 }
 0x1a0   : > { %v4885_v53 = vpop.f32.mrf.mxu3 }
 0x1a1   : > { %v3126_v60 = vpack.c.bf16 %v2998_v51, %v2998_v51 }
 0x1a2   : > { %v1266_v0 = vpop.f32.mrf.mxu0  ;;  %v2468_v1 = vpop.f32.mrf.mxu2 }
 0x1a3   : > { %3255 = vst.msk [vmem:[%s4592_s25 + $0x80] sm:$0xf] %vm3222_vm3, %v3126_v60  ;;  %v2739_v8 = vadd.f32 %v2468_v1, %v2113_v63  ;;  %v2115_v14 = vpop.f32.mrf.mxu1  ;;  %v4324_v60 = vld [vmem:[%s4502_s12 + $0xd0] sm:$0xff] }
 0x1a4   : > { %v2116_v23 = vadd.f32 %v2115_v14, %v1266_v0 }
 0x1a5   : > { %3787 = vmatmul.msk.bf16.gmra.mxu0 %vm972_vm2, %v4323_v54  ;;  %4143 = vmatmul.msk.bf16.gmra.mxu3 %vm972_vm2, %v4889_v45  ;;  %v2871_v19 = vadd.f32 %v4582_v48, %v2739_v8 }
 0x1a6   : > { %4111 = vmatmul.msk.bf16.gmra.mxu1 %vm972_vm2, %v4259_v27  ;;  %v4909_v27 = vld [vmem:[%s4514_s16 + $0x1d0] sm:$0xff] }
 0x1a7   : > { %v2999_v22 = vmax.f32 %v2871_v19, 0.0  ;;  %4189 = vmatmul.msk.bf16.gmra.mxu2 %vm972_vm2, %v4261_v10  ;;  %v4262_v19 = vld [vmem:[%s4514_s16 + $0xe0] sm:$0xff] }
 0x1a8   : > { %v4900_v26 = vpop.f32.mrf.mxu3 }
 0x1a9   : > { %v3127_v34 = vpack.c.bf16 %v2999_v22, %v2999_v22 }
 0x1aa   : > { %v1268_v35 = vpop.f32.mrf.mxu0  ;;  %v2471_v36 = vpop.f32.mrf.mxu2 }
 0x1ab   : > { %3256 = vst.msk [vmem:[%s4592_s25 + $0x84] sm:$0xf] %vm3222_vm3, %v3127_v34  ;;  %v2740_v42 = vadd.f32 %v2471_v36, %v2116_v23  ;;  %v2117_v44 = vpop.f32.mrf.mxu1 }
 0x1ac   : > { %v2118_v0 = vadd.f32 %v2117_v44, %v1268_v35 }
 0x1ad   : > { %v2872_v49 = vadd.f32 %v4582_v48, %v2740_v42 }
 0x1af   : > { %v3000_v51 = vmax.f32 %v2872_v49, 0.0 }
 0x1b0   : > { %v4905_v54 = vpop.f32.mrf.mxu3 }
 0x1b1   : > { %v3128_v63 = vpack.c.bf16 %v3000_v51, %v3000_v51 }
 0x1b2   : > { %v1271_v1 = vpop.f32.mrf.mxu0  ;;  %v2473_v8 = vpop.f32.mrf.mxu2 }
 0x1b3   : > { %3257 = vst.msk [vmem:[%s4592_s25 + $0x88] sm:$0xf] %vm3222_vm3, %v3128_v63  ;;  %v2741_v14 = vadd.f32 %v2473_v8, %v2118_v0  ;;  %v2120_v22 = vpop.f32.mrf.mxu1 }
 0x1b4   : > { %v2121_v36 = vadd.f32 %v2120_v22, %v1271_v1  ;;  %v4325_v1 = vld [vmem:[%s4502_s12 + $0xd8] sm:$0xff] }
 0x1b5   : > { %3788 = vmatmul.msk.bf16.gmra.mxu0 %vm972_vm2, %v4324_v60  ;;  %4144 = vmatmul.msk.bf16.gmra.mxu3 %vm972_vm2, %v4909_v27  ;;  %v2873_v23 = vadd.f32 %v4582_v48, %v2741_v14 }
 0x1b6   : > { %4112 = vmatmul.msk.bf16.gmra.mxu1 %vm972_vm2, %v4260_v17  ;;  %v4929_v17 = vld [vmem:[%s4514_s16 + $0x1d8] sm:$0xff] }
 0x1b7   : > { %v3001_v34 = vmax.f32 %v2873_v23, 0.0  ;;  %4190 = vmatmul.msk.bf16.gmra.mxu2 %vm972_vm2, %v4262_v19 }
 0x1b8   : > { %v4920_v35 = vpop.f32.mrf.mxu3 }
 0x1b9   : > { %v3129_v42 = vpack.c.bf16 %v3001_v34, %v3001_v34 }
 0x1ba   : > { %v1273_v44 = vpop.f32.mrf.mxu0  ;;  %v2476_v49 = vpop.f32.mrf.mxu2 }
 0x1bb   : > { %3258 = vst.msk [vmem:[%s4592_s25 + $0x8c] sm:$0xf] %vm3222_vm3, %v3129_v42  ;;  %v2742_v51 = vadd.f32 %v2476_v49, %v2121_v36  ;;  %v2122_v60 = vpop.f32.mrf.mxu1 }
 0x1bc   : > { %v2123_v22 = vadd.f32 %v2122_v60, %v1273_v44 }
 0x1bd   : > { %v2874_v63 = vadd.f32 %v4582_v48, %v2742_v51 }
 0x1bf   : > { %v3002_v0 = vmax.f32 %v2874_v63, 0.0 }
 0x1c0   : > { %v4925_v8 = vpop.f32.mrf.mxu3 }
 0x1c1   : > { %v3130_v14 = vpack.c.bf16 %v3002_v0, %v3002_v0 }
 0x1c2   : > { %v1276_v23 = vpop.f32.mrf.mxu0  ;;  %v2478_v61 = vpop.f32.mrf.mxu2 }
 0x1c3   : > { %3259 = vst.msk [vmem:[%s4592_s25 + $0x90] sm:$0xf] %vm3222_vm3, %v3130_v14  ;;  %v2743_v34 = vadd.f32 %v2478_v61, %v2123_v22  ;;  %v2125_v42 = vpop.f32.mrf.mxu1 }
 0x1c4   : > { %v2126_v51 = vadd.f32 %v2125_v42, %v1276_v23  ;;  %v4326_v23 = vld [vmem:[%s4502_s12 + $0xe0] sm:$0xff] }
 0x1c5   : > { %3789 = vmatmul.msk.bf16.gmra.mxu0 %vm972_vm2, %v4325_v1  ;;  %4145 = vmatmul.msk.bf16.gmra.mxu3 %vm972_vm2, %v4929_v17  ;;  %v2875_v36 = vadd.f32 %v4582_v48, %v2743_v34  ;;  %v4947_v48 = vld [vmem:[%s5538_s4] ss:$0 sm:$0xff] }
 0x1c6   : > { %4113 = vmatmul.msk.bf16.gmra.mxu1 %vm972_vm2, %v4261_v10  ;;  %v4954_v34 = vld [vmem:[%s4514_s16 + $0x1e0] sm:$0xff] }
 0x1c7   : > { %v3003_v49 = vmax.f32 %v2875_v36, 0.0  ;;  %4191 = vmatmul.msk.bf16.gmra.mxu2 %vm972_vm2, %v4263_v40 }
 0x1c8   : > { %v4940_v44 = vpop.f32.mrf.mxu3 }
 0x1c9   : > { %v3131_v61 = vpack.c.bf16 %v3003_v49, %v3003_v49 }
 0x1ca   : > { %v1278_v60 = vpop.f32.mrf.mxu0  ;;  %v2481_v63 = vpop.f32.mrf.mxu2 }
 0x1cb   : > { %3260 = vst.msk [vmem:[%s4592_s25 + $0x94] sm:$0xf] %vm3222_vm3, %v3131_v61  ;;  %v2744_v0 = vadd.f32 %v2481_v63, %v2126_v51  ;;  %v2127_v1 = vpop.f32.mrf.mxu1  ;;  %v4264_v61 = vld [vmem:[%s4514_s16 + $0xf0] sm:$0xff] }
 0x1cc   : > { %v2128_v36 = vadd.f32 %v2127_v1, %v1278_v60 }
 0x1cd   : > { %v2876_v10 = vadd.f32 %v4947_v48, %v2744_v0 }
 0x1cf   : > { %v3004_v14 = vmax.f32 %v2876_v10, 0.0 }
 0x1d0   : > { %v4950_v22 = vpop.f32.mrf.mxu3 }
 0x1d1   : > { %v3132_v42 = vpack.c.bf16 %v3004_v14, %v3004_v14 }
 0x1d2   : > { %v1281_v49 = vpop.f32.mrf.mxu0  ;;  %v2483_v13 = vpop.f32.mrf.mxu2 }
 0x1d3   : > { %3261 = vst.msk [vmem:[%s4592_s25 + $0x98] sm:$0xf] %vm3222_vm3, %v3132_v42  ;;  %v2745_v51 = vadd.f32 %v2483_v13, %v2128_v36  ;;  %v2130_v63 = vpop.f32.mrf.mxu1 }
 0x1d4   : > { %v2131_v14 = vadd.f32 %v2130_v63, %v1281_v49  ;;  %v4327_v49 = vld [vmem:[%s4502_s12 + $0xe8] sm:$0xff] }
 0x1d5   : > { %3790 = vmatmul.msk.bf16.gmra.mxu0 %vm972_vm2, %v4326_v23  ;;  %4146 = vmatmul.msk.bf16.gmra.mxu3 %vm972_vm2, %v4954_v34  ;;  %v2877_v0 = vadd.f32 %v4947_v48, %v2745_v51 }
 0x1d6   : > { %4114 = vmatmul.msk.bf16.gmra.mxu1 %vm972_vm2, %v4262_v19  ;;  %v4974_v19 = vld [vmem:[%s4514_s16 + $0x1e8] sm:$0xff] }
 0x1d7   : > { %v3005_v10 = vmax.f32 %v2877_v0, 0.0  ;;  %4192 = vmatmul.msk.bf16.gmra.mxu2 %vm972_vm2, %v4264_v61 }
 0x1d8   : > { %v4965_v60 = vpop.f32.mrf.mxu3 }
 0x1d9   : > { %v3133_v13 = vpack.c.bf16 %v3005_v10, %v3005_v10 }
 0x1da   : > { %v1283_v1 = vpop.f32.mrf.mxu0  ;;  %v2486_v23 = vpop.f32.mrf.mxu2 }
 0x1db   : > { %3262 = vst.msk [vmem:[%s4592_s25 + $0x9c] sm:$0xf] %vm3222_vm3, %v3133_v13  ;;  %v2746_v42 = vadd.f32 %v2486_v23, %v2131_v14  ;;  %v2132_v36 = vpop.f32.mrf.mxu1 }
 0x1dc   : > { %v2133_v24 = vadd.f32 %v2132_v36, %v1283_v1 }
 0x1dd   : > { %v2878_v51 = vadd.f32 %v4947_v48, %v2746_v42 }
 0x1df   : > { %v3006_v50 = vmax.f32 %v2878_v51, 0.0 }
 0x1e0   : > { %v4970_v0 = vpop.f32.mrf.mxu3 }
 0x1e1   : > { %v3134_v63 = vpack.c.bf16 %v3006_v50, %v3006_v50 }
 0x1e2   : > { %v1286_v15 = vpop.f32.mrf.mxu0  ;;  %v2488_v59 = vpop.f32.mrf.mxu2 }
 0x1e3   : > { %3263 = vst.msk [vmem:[%s4592_s25 + $0xa0] sm:$0xf] %vm3222_vm3, %v3134_v63  ;;  %v2747_v10 = vadd.f32 %v2488_v59, %v2133_v24  ;;  %v2135_v13 = vpop.f32.mrf.mxu1 }
 0x1e4   : > { %v2136_v50 = vadd.f32 %v2135_v13, %v1286_v15  ;;  %v4328_v15 = vld [vmem:[%s4502_s12 + $0xf0] sm:$0xff] }
 0x1e5   : > { %3791 = vmatmul.msk.bf16.gmra.mxu0 %vm972_vm2, %v4327_v49  ;;  %4147 = vmatmul.msk.bf16.gmra.mxu3 %vm972_vm2, %v4974_v19  ;;  %v2879_v14 = vadd.f32 %v4947_v48, %v2747_v10 }
 0x1e6   : > { %4115 = vmatmul.msk.bf16.gmra.mxu1 %vm972_vm2, %v4263_v40  ;;  %v4994_v40 = vld [vmem:[%s4514_s16 + $0x1f0] sm:$0xff] }
 0x1e7   : > { %v3007_v23 = vmax.f32 %v2879_v14, 0.0  ;;  %4193 = vmatmul.msk.bf16.gmra.mxu2 %vm972_vm2, %v4265_v41 }
 0x1e8   : > { %v4985_v1 = vpop.f32.mrf.mxu3 }
 0x1e9   : > { %v3135_v59 = vpack.c.bf16 %v3007_v23, %v3007_v23 }
 0x1ea   : > { %v1288_v24 = vpop.f32.mrf.mxu0  ;;  %v2491_v42 = vpop.f32.mrf.mxu2 }
 0x1eb   : > { %3264 = vst.msk [vmem:[%s4592_s25 + $0xa4] sm:$0xf] %vm3222_vm3, %v3135_v59  ;;  %v2748_v36 = vadd.f32 %v2491_v42, %v2136_v50  ;;  %v2137_v51 = vpop.f32.mrf.mxu1 }
 0x1ec   : > { %v2138_v14 = vadd.f32 %v2137_v51, %v1288_v24 }
 0x1ed   : > { %v2880_v49 = vadd.f32 %v4947_v48, %v2748_v36 }
 0x1ef   : > { %v3008_v63 = vmax.f32 %v2880_v49, 0.0 }
 0x1f0   : > { %v4990_v10 = vpop.f32.mrf.mxu3 }
 0x1f1   : > { %v3136_v13 = vpack.c.bf16 %v3008_v63, %v3008_v63 }
 0x1f2   : > { %v1291_v20 = vpop.f32.mrf.mxu0  ;;  %v2493_v6 = vpop.f32.mrf.mxu2 }
 0x1f3   : > { %3265 = vst.msk [vmem:[%s4592_s25 + $0xa8] sm:$0xf] %vm3222_vm3, %v3136_v13  ;;  %v2749_v23 = vadd.f32 %v2493_v6, %v2138_v14  ;;  %v2140_v59 = vpop.f32.mrf.mxu1 }
 0x1f4   : > { %v2141_v36 = vadd.f32 %v2140_v59, %v1291_v20  ;;  %v4329_v20 = vld [vmem:[%s4502_s12 + $0xf8] sm:$0xff] }
 0x1f5   : > { %3792 = vmatmul.msk.bf16.gmra.mxu0 %vm972_vm2, %v4328_v15  ;;  %4148 = vmatmul.msk.bf16.gmra.mxu3 %vm972_vm2, %v4994_v40  ;;  %v2881_v50 = vadd.f32 %v4947_v48, %v2749_v23 }
 0x1f6   : > { %4116 = vmatmul.msk.bf16.gmra.mxu1 %vm972_vm2, %v4264_v61  ;;  %v5014_v61 = vld [vmem:[%s4514_s16 + $0x1f8] sm:$0xff] }
 0x1f7   : > { %v3009_v42 = vmax.f32 %v2881_v50, 0.0  ;;  %4194 = vmatmul.msk.bf16.gmra.mxu2 %vm972_vm2, %v4266_v52 }
 0x1f8   : > { %v5005_v24 = vpop.f32.mrf.mxu3 }
 0x1f9   : > { %v3137_v6 = vpack.c.bf16 %v3009_v42, %v3009_v42 }
 0x1fa   : > { %v1293_v51 = vpop.f32.mrf.mxu0  ;;  %v2496_v49 = vpop.f32.mrf.mxu2 }
 0x1fb   : > { %3266 = vst.msk [vmem:[%s4592_s25 + $0xac] sm:$0xf] %vm3222_vm3, %v3137_v6  ;;  %v2750_v63 = vadd.f32 %v2496_v49, %v2141_v36  ;;  %v2142_v15 = vpop.f32.mrf.mxu1 }
 0x1fc   : > { %v2143_v50 = vadd.f32 %v2142_v15, %v1293_v51 }
 0x1fd   : > { %v2882_v13 = vadd.f32 %v4947_v48, %v2750_v63 }
 0x1ff   : > { %v3010_v14 = vmax.f32 %v2882_v13, 0.0 }
 0x200   : > { %v5010_v23 = vpop.f32.mrf.mxu3 }
 0x201   : > { %v3138_v59 = vpack.c.bf16 %v3010_v14, %v3010_v14 }
 0x202   : > { %v1296_v38 = vpop.f32.mrf.mxu0  ;;  %v2498_v21 = vpop.f32.mrf.mxu2 }
 0x203   : > { %3267 = vst.msk [vmem:[%s4592_s25 + $0xb0] sm:$0xf] %vm3222_vm3, %v3138_v59  ;;  %v2751_v42 = vadd.f32 %v2498_v21, %v2143_v50  ;;  %v2145_v6 = vpop.f32.mrf.mxu1 }
 0x204   : > { %v2146_v63 = vadd.f32 %v2145_v6, %v1296_v38  ;;  %v4330_v38 = vld [vmem:[%s4502_s12 + $0x100] sm:$0xff] }
 0x205   : > { %3793 = vmatmul.msk.bf16.gmra.mxu0 %vm972_vm2, %v4329_v20  ;;  %4149 = vmatmul.msk.bf16.gmra.mxu3 %vm972_vm2, %v5014_v61  ;;  %v2883_v36 = vadd.f32 %v4947_v48, %v2751_v42 }
 0x206   : > { %4117 = vmatmul.msk.bf16.gmra.mxu1 %vm972_vm2, %v4265_v41 }
 0x207   : > { %v3011_v49 = vmax.f32 %v2883_v36, 0.0  ;;  %4195 = vmatmul.msk.bf16.gmra.mxu2 %vm972_vm2, %v4267_v9 }
 0x208   : > { %v5025_v51 = vpop.f32.mrf.mxu3 }
 0x209   : > { %v3139_v21 = vpack.c.bf16 %v3011_v49, %v3011_v49 }
 0x20a   : > { %v1298_v15 = vpop.f32.mrf.mxu0  ;;  %v2501_v13 = vpop.f32.mrf.mxu2 }
 0x20b   : > { %3268 = vst.msk [vmem:[%s4592_s25 + $0xb4] sm:$0xf] %vm3222_vm3, %v3139_v21  ;;  %v2752_v14 = vadd.f32 %v2501_v13, %v2146_v63  ;;  %v2147_v20 = vpop.f32.mrf.mxu1 }
 0x20c   : > { %v2148_v6 = vadd.f32 %v2147_v20, %v1298_v15 }
 0x20d   : > { %v2884_v59 = vadd.f32 %v4947_v48, %v2752_v14 }
 0x20f   : > { %v3012_v50 = vmax.f32 %v2884_v59, 0.0 }
 0x210   : > { %v5030_v42 = vpop.f32.mrf.mxu3 }
 0x211   : > { %v3140_v41 = vpack.c.bf16 %v3012_v50, %v3012_v50 }
 0x212   : > { %v1301_v36 = vpop.f32.mrf.mxu0  ;;  %v2503_v58 = vpop.f32.mrf.mxu2 }
 0x213   : > { %3269 = vst.msk [vmem:[%s4592_s25 + $0xb8] sm:$0xf] %vm3222_vm3, %v3140_v41  ;;  %v2753_v49 = vadd.f32 %v2503_v58, %v2148_v6  ;;  %v2150_v28 = vpop.f32.mrf.mxu1 }
 0x214   : > { %v2151_v13 = vadd.f32 %v2150_v28, %v1301_v36  ;;  %v4331_v28 = vld [vmem:[%s4502_s12 + $0x108] sm:$0xff] }
 0x215   : > { %3794 = vmatmul.msk.bf16.gmra.mxu0 %vm972_vm2, %v4330_v38  ;;  %4212 = vmatmul.msk.bf16.vlgmr.msra.gmra.mxu3 %vm972_vm2, %v4749_v11  ;;  %v2885_v63 = vadd.f32 %v4947_v48, %v2753_v49 }
 0x216   : > { %4118 = vmatmul.msk.bf16.gmra.mxu1 %vm972_vm2, %v4266_v52 }
 0x217   : > { %v3013_v21 = vmax.f32 %v2885_v63, 0.0  ;;  %4196 = vmatmul.msk.bf16.gmra.mxu2 %vm972_vm2, %v4268_v43 }
 0x218   : > { %v5042_v15 = vpop.f32.mrf.mxu3 }
 0x219   : > { %5557 = vst [vmem:[#allocation19_spill] sm:$0xff] %v5042_v15  ;;  %v3141_v58 = vpack.c.bf16 %v3013_v21, %v3013_v21  ;;  %v4269_v21 = vld [vmem:[%s4514_s16 + $0x118] sm:$0xff] }
 0x21a   : > { %v1303_v14 = vpop.f32.mrf.mxu0  ;;  %v2506_v20 = vpop.f32.mrf.mxu2 }
 0x21b   : > { %3270 = vst.msk [vmem:[%s4592_s25 + $0xbc] sm:$0xf] %vm3222_vm3, %v3141_v58  ;;  %v2754_v59 = vadd.f32 %v2506_v20, %v2151_v13  ;;  %v2152_v11 = vpop.f32.mrf.mxu1 }
 0x21c   : > { %v2153_v6 = vadd.f32 %v2152_v11, %v1303_v14 }
 0x21d   : > { %v2886_v50 = vadd.f32 %v4947_v48, %v2754_v59 }
 0x21f   : > { %v3014_v38 = vmax.f32 %v2886_v50, 0.0 }
 0x220   : > { %v5047_v41 = vpop.f32.mrf.mxu3 }
 0x221   : > { %v3142_v52 = vpack.c.bf16 %v3014_v38, %v3014_v38 }
 0x222   : > { %v1306_v36 = vpop.f32.mrf.mxu0  ;;  %v2508_v49 = vpop.f32.mrf.mxu2 }
 0x223   : > { %3271 = vst.msk [vmem:[%s4592_s25 + $0xc0] sm:$0xf] %vm3222_vm3, %v3142_v52  ;;  %v2755_v63 = vadd.f32 %v2508_v49, %v2153_v6  ;;  %v2155_v15 = vpop.f32.mrf.mxu1 }
 0x224   : > { %v2156_v20 = vadd.f32 %v2155_v15, %v1306_v36  ;;  %v4332_v15 = vld [vmem:[%s4502_s12 + $0x110] sm:$0xff] }
 0x225   : > { %3795 = vmatmul.msk.bf16.gmra.mxu0 %vm972_vm2, %v4331_v28  ;;  %4213 = vmatmul.msk.bf16.gmra.mxu3 %vm972_vm2, %v4769_v37  ;;  %v2887_v13 = vadd.f32 %v4947_v48, %v2755_v63 }
 0x226   : > { %4119 = vmatmul.msk.bf16.gmra.mxu1 %vm972_vm2, %v4267_v9 }
 0x227   : > { %v3015_v58 = vmax.f32 %v2887_v13, 0.0  ;;  %4197 = vmatmul.msk.bf16.gmra.mxu2 %vm972_vm2, %v4269_v21 }
 0x228   : > { %v5059_v14 = vpop.f32.mrf.mxu3 }
 0x229   : > { %5558 = vst [vmem:[#allocation20_spill] sm:$0xff] %v5059_v14  ;;  %v3143_v59 = vpack.c.bf16 %v3015_v58, %v3015_v58  ;;  %v4270_v58 = vld [vmem:[%s4514_s16 + $0x120] sm:$0xff] }
 0x22a   : > { %v1308_v11 = vpop.f32.mrf.mxu0  ;;  %v2511_v50 = vpop.f32.mrf.mxu2 }
 0x22b   : > { %3272 = vst.msk [vmem:[%s4592_s25 + $0xc4] sm:$0xf] %vm3222_vm3, %v3143_v59  ;;  %v2756_v38 = vadd.f32 %v2511_v50, %v2156_v20  ;;  %v2157_v37 = vpop.f32.mrf.mxu1 }
 0x22c   : > { %v2158_v36 = vadd.f32 %v2157_v37, %v1308_v11 }
 0x22d   : > { %v2888_v28 = vadd.f32 %v4947_v48, %v2756_v38 }
 0x22f   : > { %v3016_v52 = vmax.f32 %v2888_v28, 0.0 }
 0x230   : > { %v5064_v6 = vpop.f32.mrf.mxu3 }
 0x231   : > { %v3144_v9 = vpack.c.bf16 %v3016_v52, %v3016_v52 }
 0x232   : > { %v1311_v49 = vpop.f32.mrf.mxu0  ;;  %v2513_v63 = vpop.f32.mrf.mxu2 }
 0x233   : > { %3273 = vst.msk [vmem:[%s4592_s25 + $0xc8] sm:$0xf] %vm3222_vm3, %v3144_v9  ;;  %v2757_v13 = vadd.f32 %v2513_v63, %v2158_v36  ;;  %v2160_v14 = vpop.f32.mrf.mxu1 }
 0x234   : > { %v2161_v50 = vadd.f32 %v2160_v14, %v1311_v49  ;;  %v4333_v14 = vld [vmem:[%s4502_s12 + $0x118] sm:$0xff] }
 0x235   : > { %3796 = vmatmul.msk.bf16.gmra.mxu0 %vm972_vm2, %v4332_v15  ;;  %4214 = vmatmul.msk.bf16.gmra.mxu3 %vm972_vm2, %v4789_v3  ;;  %v2889_v20 = vadd.f32 %v4947_v48, %v2757_v13 }
 0x236   : > { %4120 = vmatmul.msk.bf16.gmra.mxu1 %vm972_vm2, %v4268_v43 }
 0x237   : > { %v3017_v59 = vmax.f32 %v2889_v20, 0.0  ;;  %4198 = vmatmul.msk.bf16.gmra.mxu2 %vm972_vm2, %v4270_v58 }
 0x238   : > { %v5076_v11 = vpop.f32.mrf.mxu3 }
 0x239   : > { %5559 = vst [vmem:[#allocation21_spill] sm:$0xff] %v5076_v11  ;;  %v3145_v38 = vpack.c.bf16 %v3017_v59, %v3017_v59  ;;  %v4271_v59 = vld [vmem:[%s4514_s16 + $0x128] sm:$0xff] }
 0x23a   : > { %v1313_v37 = vpop.f32.mrf.mxu0  ;;  %v2516_v28 = vpop.f32.mrf.mxu2 }
 0x23b   : > { %3274 = vst.msk [vmem:[%s4592_s25 + $0xcc] sm:$0xf] %vm3222_vm3, %v3145_v38  ;;  %v2758_v52 = vadd.f32 %v2516_v28, %v2161_v50  ;;  %v2162_v3 = vpop.f32.mrf.mxu1 }
 0x23c   : > { %v2163_v49 = vadd.f32 %v2162_v3, %v1313_v37 }
 0x23d   : > { %v2890_v15 = vadd.f32 %v4947_v48, %v2758_v52 }
 0x23f   : > { %v3018_v9 = vmax.f32 %v2890_v15, 0.0 }
 0x240   : > { %v5081_v36 = vpop.f32.mrf.mxu3 }
 0x241   : > { %v3146_v43 = vpack.c.bf16 %v3018_v9, %v3018_v9 }
 0x242   : > { %v1316_v63 = vpop.f32.mrf.mxu0  ;;  %v2518_v13 = vpop.f32.mrf.mxu2 }
 0x243   : > { %3275 = vst.msk [vmem:[%s4592_s25 + $0xd0] sm:$0xf] %vm3222_vm3, %v3146_v43  ;;  %v2759_v20 = vadd.f32 %v2518_v13, %v2163_v49  ;;  %v2165_v11 = vpop.f32.mrf.mxu1 }
 0x244   : > { %v2166_v28 = vadd.f32 %v2165_v11, %v1316_v63  ;;  %v4334_v11 = vld [vmem:[%s4502_s12 + $0x120] sm:$0xff] }
 0x245   : > { %3797 = vmatmul.msk.bf16.gmra.mxu0 %vm972_vm2, %v4333_v14  ;;  %4215 = vmatmul.msk.bf16.gmra.mxu3 %vm972_vm2, %v4809_v31  ;;  %v2891_v50 = vadd.f32 %v4947_v48, %v2759_v20 }
 0x246   : > { %4121 = vmatmul.msk.bf16.gmra.mxu1 %vm972_vm2, %v4269_v21 }
 0x247   : > { %v3019_v38 = vmax.f32 %v2891_v50, 0.0  ;;  %4199 = vmatmul.msk.bf16.gmra.mxu2 %vm972_vm2, %v4271_v59 }
 0x248   : > { %v5093_v37 = vpop.f32.mrf.mxu3 }
 0x249   : > { %5560 = vst [vmem:[#allocation22_spill] sm:$0xff] %v5093_v37  ;;  %v3147_v52 = vpack.c.bf16 %v3019_v38, %v3019_v38  ;;  %v4272_v38 = vld [vmem:[%s4514_s16 + $0x130] sm:$0xff] }
 0x24a   : > { %v1318_v3 = vpop.f32.mrf.mxu0  ;;  %v2521_v15 = vpop.f32.mrf.mxu2 }
 0x24b   : > { %3276 = vst.msk [vmem:[%s4592_s25 + $0xd4] sm:$0xf] %vm3222_vm3, %v3147_v52  ;;  %v2760_v9 = vadd.f32 %v2521_v15, %v2166_v28  ;;  %v2167_v31 = vpop.f32.mrf.mxu1 }
 0x24c   : > { %v2168_v63 = vadd.f32 %v2167_v31, %v1318_v3 }
 0x24d   : > { %v2892_v14 = vadd.f32 %v4947_v48, %v2760_v9 }
 0x24f   : > { %v3020_v43 = vmax.f32 %v2892_v14, 0.0 }
 0x250   : > { %v5098_v49 = vpop.f32.mrf.mxu3 }
 0x251   : > { %v3148_v21 = vpack.c.bf16 %v3020_v43, %v3020_v43 }
 0x252   : > { %v1321_v13 = vpop.f32.mrf.mxu0  ;;  %v2523_v20 = vpop.f32.mrf.mxu2 }
 0x253   : > { %3277 = vst.msk [vmem:[%s4592_s25 + $0xd8] sm:$0xf] %vm3222_vm3, %v3148_v21  ;;  %v2761_v50 = vadd.f32 %v2523_v20, %v2168_v63  ;;  %v2170_v37 = vpop.f32.mrf.mxu1 }
 0x254   : > { %v2171_v15 = vadd.f32 %v2170_v37, %v1321_v13  ;;  %v4335_v37 = vld [vmem:[%s4502_s12 + $0x128] sm:$0xff] }
 0x255   : > { %3798 = vmatmul.msk.bf16.gmra.mxu0 %vm972_vm2, %v4334_v11  ;;  %4216 = vmatmul.msk.bf16.gmra.mxu3 %vm972_vm2, %v4829_v62  ;;  %v2893_v28 = vadd.f32 %v4947_v48, %v2761_v50 }
 0x256   : > { %4122 = vmatmul.msk.bf16.gmra.mxu1 %vm972_vm2, %v4270_v58 }
 0x257   : > { %v3021_v52 = vmax.f32 %v2893_v28, 0.0  ;;  %4200 = vmatmul.msk.bf16.gmra.mxu2 %vm972_vm2, %v4272_v38 }
 0x258   : > { %v5110_v3 = vpop.f32.mrf.mxu3 }
 0x259   : > { %5561 = vst [vmem:[#allocation23_spill] sm:$0xff] %v5110_v3  ;;  %v3149_v9 = vpack.c.bf16 %v3021_v52, %v3021_v52  ;;  %v4273_v52 = vld [vmem:[%s4514_s16 + $0x138] sm:$0xff] }
 0x25a   : > { %v1323_v31 = vpop.f32.mrf.mxu0  ;;  %v2526_v14 = vpop.f32.mrf.mxu2 }
 0x25b   : > { %3278 = vst.msk [vmem:[%s4592_s25 + $0xdc] sm:$0xf] %vm3222_vm3, %v3149_v9  ;;  %v2762_v43 = vadd.f32 %v2526_v14, %v2171_v15  ;;  %v2172_v62 = vpop.f32.mrf.mxu1 }
 0x25c   : > { %v2173_v13 = vadd.f32 %v2172_v62, %v1323_v31 }
 0x25d   : > { %v2894_v11 = vadd.f32 %v4947_v48, %v2762_v43 }
 0x25f   : > { %v3022_v21 = vmax.f32 %v2894_v11, 0.0 }
 0x260   : > { %v5115_v63 = vpop.f32.mrf.mxu3 }
 0x261   : > { %v3150_v58 = vpack.c.bf16 %v3022_v21, %v3022_v21 }
 0x262   : > { %v1326_v20 = vpop.f32.mrf.mxu0  ;;  %v2528_v50 = vpop.f32.mrf.mxu2 }
 0x263   : > { %3279 = vst.msk [vmem:[%s4592_s25 + $0xe0] sm:$0xf] %vm3222_vm3, %v3150_v58  ;;  %v2763_v28 = vadd.f32 %v2528_v50, %v2173_v13  ;;  %v2175_v3 = vpop.f32.mrf.mxu1 }
 0x264   : > { %v2176_v14 = vadd.f32 %v2175_v3, %v1326_v20  ;;  %v4336_v3 = vld [vmem:[%s4502_s12 + $0x130] sm:$0xff] }
 0x265   : > { %3799 = vmatmul.msk.bf16.gmra.mxu0 %vm972_vm2, %v4335_v37  ;;  %4217 = vmatmul.msk.bf16.gmra.mxu3 %vm972_vm2, %v4849_v32  ;;  %v2895_v15 = vadd.f32 %v4947_v48, %v2763_v28 }
 0x266   : > { %4123 = vmatmul.msk.bf16.gmra.mxu1 %vm972_vm2, %v4271_v59 }
 0x267   : > { %v3023_v9 = vmax.f32 %v2895_v15, 0.0  ;;  %4201 = vmatmul.msk.bf16.gmra.mxu2 %vm972_vm2, %v4273_v52 }
 0x268   : > { %v5127_v31 = vpop.f32.mrf.mxu3 }
 0x269   : > { %5562 = vst [vmem:[#allocation24_spill] sm:$0xff] %v5127_v31  ;;  %v3151_v43 = vpack.c.bf16 %v3023_v9, %v3023_v9  ;;  %v4274_v9 = vld [vmem:[%s4514_s16 + $0x140] sm:$0xff] }
 0x26a   : > { %v1328_v62 = vpop.f32.mrf.mxu0  ;;  %v2531_v11 = vpop.f32.mrf.mxu2 }
 0x26b   : > { %3280 = vst.msk [vmem:[%s4592_s25 + $0xe4] sm:$0xf] %vm3222_vm3, %v3151_v43  ;;  %v2764_v21 = vadd.f32 %v2531_v11, %v2176_v14  ;;  %v2177_v32 = vpop.f32.mrf.mxu1 }
 0x26c   : > { %v2178_v20 = vadd.f32 %v2177_v32, %v1328_v62 }
 0x26d   : > { %v2896_v37 = vadd.f32 %v4947_v48, %v2764_v21 }
 0x26f   : > { %v3024_v58 = vmax.f32 %v2896_v37, 0.0 }
 0x270   : > { %v5132_v13 = vpop.f32.mrf.mxu3 }
 0x271   : > { %v3152_v59 = vpack.c.bf16 %v3024_v58, %v3024_v58 }
 0x272   : > { %v1331_v50 = vpop.f32.mrf.mxu0  ;;  %v2533_v28 = vpop.f32.mrf.mxu2 }
 0x273   : > { %3281 = vst.msk [vmem:[%s4592_s25 + $0xe8] sm:$0xf] %vm3222_vm3, %v3152_v59  ;;  %v2765_v15 = vadd.f32 %v2533_v28, %v2178_v20  ;;  %v2180_v31 = vpop.f32.mrf.mxu1 }
 0x274   : > { %v2181_v11 = vadd.f32 %v2180_v31, %v1331_v50  ;;  %v4337_v31 = vld [vmem:[%s4502_s12 + $0x138] sm:$0xff] }
 0x275   : > { %3800 = vmatmul.msk.bf16.gmra.mxu0 %vm972_vm2, %v4336_v3  ;;  %4218 = vmatmul.msk.bf16.gmra.mxu3 %vm972_vm2, %v4869_v5  ;;  %v2897_v14 = vadd.f32 %v4947_v48, %v2765_v15 }
 0x276   : > { %4124 = vmatmul.msk.bf16.gmra.mxu1 %vm972_vm2, %v4272_v38 }
 0x277   : > { %v3025_v43 = vmax.f32 %v2897_v14, 0.0  ;;  %4202 = vmatmul.msk.bf16.gmra.mxu2 %vm972_vm2, %v4274_v9 }
 0x278   : > { %v5144_v62 = vpop.f32.mrf.mxu3 }
 0x279   : > { %5563 = vst [vmem:[#allocation25_spill] sm:$0xff] %v5144_v62  ;;  %v3153_v21 = vpack.c.bf16 %v3025_v43, %v3025_v43  ;;  %v5155_v43 = vld [vmem:[%s4514_s16 + $0x148] sm:$0xff] }
 0x27a   : > { %v1333_v32 = vpop.f32.mrf.mxu0  ;;  %v2536_v37 = vpop.f32.mrf.mxu2 }
 0x27b   : > { %3282 = vst.msk [vmem:[%s4592_s25 + $0xec] sm:$0xf] %vm3222_vm3, %v3153_v21  ;;  %v2766_v58 = vadd.f32 %v2536_v37, %v2181_v11  ;;  %v2182_v5 = vpop.f32.mrf.mxu1 }
 0x27c   : > { %v2183_v50 = vadd.f32 %v2182_v5, %v1333_v32 }
 0x27d   : > { %v2898_v3 = vadd.f32 %v4947_v48, %v2766_v58 }
 0x27f   : > { %v3026_v59 = vmax.f32 %v2898_v3, 0.0 }
 0x280   : > { %v5149_v20 = vpop.f32.mrf.mxu3 }
 0x281   : > { %v3154_v38 = vpack.c.bf16 %v3026_v59, %v3026_v59 }
 0x282   : > { %v1336_v28 = vpop.f32.mrf.mxu0  ;;  %v2538_v15 = vpop.f32.mrf.mxu2 }
 0x283   : > { %3283 = vst.msk [vmem:[%s4592_s25 + $0xf0] sm:$0xf] %vm3222_vm3, %v3154_v38  ;;  %v2767_v14 = vadd.f32 %v2538_v15, %v2183_v50  ;;  %v2185_v62 = vpop.f32.mrf.mxu1 }
 0x284   : > { %v2186_v37 = vadd.f32 %v2185_v62, %v1336_v28 }
 0x285   : > { %3801 = vmatmul.msk.bf16.gmra.mxu0 %vm972_vm2, %v4337_v31  ;;  %4219 = vmatmul.msk.bf16.gmra.mxu3 %vm972_vm2, %v4889_v45  ;;  %v2899_v11 = vadd.f32 %v4947_v48, %v2767_v14 }
 0x286   : > { %4125 = vmatmul.msk.bf16.gmra.mxu1 %vm972_vm2, %v4273_v52  ;;  %v4338_v52 = vld [vmem:[%s4502_s12 + $0x140] sm:$0xff] }
 0x287   : > { %v3027_v21 = vmax.f32 %v2899_v11, 0.0  ;;  %4203 = vmatmul.msk.bf16.gmra.mxu2 %vm972_vm2, %v5155_v43 }
 0x288   : > { %v5164_v32 = vpop.f32.mrf.mxu3 }
 0x289   : > { %5564 = vst [vmem:[#allocation26_spill] sm:$0xff] %v5164_v32  ;;  %v3155_v58 = vpack.c.bf16 %v3027_v21, %v3027_v21  ;;  %v5175_v21 = vld [vmem:[%s4514_s16 + $0x150] sm:$0xff] }
 0x28a   : > { %v1338_v5 = vpop.f32.mrf.mxu0  ;;  %v2541_v3 = vpop.f32.mrf.mxu2 }
 0x28b   : > { %3284 = vst.msk [vmem:[%s4592_s25 + $0xf4] sm:$0xf] %vm3222_vm3, %v3155_v58  ;;  %v2768_v45 = vadd.f32 %v2541_v3, %v2186_v37  ;;  %v2187_v59 = vpop.f32.mrf.mxu1  ;;  %v2271_v58 = vadd.f32 %v4880_v29, %v4577_v47 }
 0x28c   : > { %v2188_v28 = vadd.f32 %v2187_v59, %v1338_v5 }
 0x28d   : > { %v2900_v31 = vadd.f32 %v4947_v48, %v2768_v45 }
 0x28f   : > { %v3028_v38 = vmax.f32 %v2900_v31, 0.0 }
 0x290   : > { %v5169_v62 = vpop.f32.mrf.mxu3 }
 0x291   : > { %v3156_v50 = vpack.c.bf16 %v3028_v38, %v3028_v38 }
 0x292   : > { %v1341_v15 = vpop.f32.mrf.mxu0  ;;  %v2543_v14 = vpop.f32.mrf.mxu2 }
 0x293   : > { %3285 = vst.msk [vmem:[%s4592_s25 + $0xf8] sm:$0xf] %vm3222_vm3, %v3156_v50  ;;  %v2769_v11 = vadd.f32 %v2543_v14, %v2188_v28  ;;  %v2190_v32 = vpop.f32.mrf.mxu1 }
 0x294   : > { %v2191_v3 = vadd.f32 %v2190_v32, %v1341_v15  ;;  %v2273_v32 = vadd.f32 %v4885_v53, %v4585_v55 }
 0x295   : > { %3802 = vmatmul.msk.bf16.gmra.mxu0 %vm972_vm2, %v4338_v52  ;;  %4220 = vmatmul.msk.bf16.gmra.mxu3 %vm972_vm2, %v4909_v27  ;;  %v2901_v37 = vadd.f32 %v4947_v48, %v2769_v11 }
 0x296   : > { %4126 = vmatmul.msk.bf16.gmra.mxu1 %vm972_vm2, %v4274_v9 }
 0x297   : > { %v3029_v5 = vmax.f32 %v2901_v37, 0.0  ;;  %4204 = vmatmul.msk.bf16.gmra.mxu2 %vm972_vm2, %v5175_v21  ;;  %v4339_v37 = vld [vmem:[%s4502_s12 + $0x148] sm:$0xff] }
 0x298   : > { %v2626_v45 = vpop.f32.mrf.mxu3 }
 0x299   : > { %v2802_v59 = vadd.f32 %v2626_v45, %v2271_v58  ;;  %v3157_v31 = vpack.c.bf16 %v3029_v5, %v3029_v5 }
 0x29a   : > { %v1343_v38 = vpop.f32.mrf.mxu0  ;;  %v2546_v52 = vpop.f32.mrf.mxu2 }
 0x29b   : > { %v2934_v27 = vadd.f32 %v4947_v48, %v2802_v59  ;;  %3286 = vst.msk [vmem:[%s4592_s25 + $0xfc] sm:$0xf] %vm3222_vm3, %v3157_v31  ;;  %v2770_v50 = vadd.f32 %v2546_v52, %v2191_v3  ;;  %v2192_v29 = vpop.f32.mrf.mxu1  ;;  %v2276_v52 = vadd.f32 %v4900_v26, %v4604_v4 }
 0x29c   : > { %v2193_v5 = vadd.f32 %v2192_v29, %v1343_v38 }
 0x29d   : > { %v3062_v47 = vmax.f32 %v2934_v27, 0.0  ;;  %v2902_v9 = vadd.f32 %v4947_v48, %v2770_v50  ;;  %v5199_v27 = vld [vmem:[%s4514_s16 + $0x158] sm:$0xff] }
 0x29f   : > { %v3190_v28 = vpack.c.bf16 %v3062_v47, %v3062_v47  ;;  %v3030_v15 = vmax.f32 %v2902_v9, 0.0 }
 0x2a0   : > { %v2628_v14 = vpop.f32.mrf.mxu3 }
 0x2a1   : > { %3319 = vst.msk [vmem:[%s4592_s25 + $0x180] sm:$0xf] %vm3222_vm3, %v3190_v28  ;;  %v2803_v11 = vadd.f32 %v2628_v14, %v2273_v32  ;;  %v3158_v58 = vpack.c.bf16 %v3030_v15, %v3030_v15 }
 0x2a2   : > { %v1346_v45 = vpop.f32.mrf.mxu0  ;;  %v2548_v59 = vpop.f32.mrf.mxu2 }
 0x2a3   : > { %v2935_v3 = vadd.f32 %v4947_v48, %v2803_v11  ;;  %3287 = vst.msk [vmem:[%s4592_s25 + $0x100] sm:$0xf] %vm3222_vm3, %v3158_v58  ;;  %v2771_v31 = vadd.f32 %v2548_v59, %v2193_v5  ;;  %v2195_v53 = vpop.f32.mrf.mxu1  ;;  %v4340_v59 = vld [vmem:[%s4502_s12 + $0x150] sm:$0xff] }
 0x2a4   : > { %v2196_v29 = vadd.f32 %v2195_v53, %v1346_v45 }
 0x2a5   : > { %v3063_v55 = vmax.f32 %v2935_v3, 0.0  ;;  %3803 = vmatmul.msk.bf16.gmra.mxu0 %vm972_vm2, %v4339_v37  ;;  %4221 = vmatmul.msk.bf16.gmra.mxu3 %vm972_vm2, %v4929_v17  ;;  %v2903_v38 = vadd.f32 %v4947_v48, %v2771_v31  ;;  %v2278_v37 = vadd.f32 %v4905_v54, %v4609_v12 }
 0x2a6   : > { %4127 = vmatmul.msk.bf16.gmra.mxu1 %vm972_vm2, %v5155_v43 }
 0x2a7   : > { %v3191_v50 = vpack.c.bf16 %v3063_v55, %v3063_v55  ;;  %v3031_v47 = vmax.f32 %v2903_v38, 0.0  ;;  %4205 = vmatmul.msk.bf16.gmra.mxu2 %vm972_vm2, %v5199_v27 }
 0x2a8   : > { %v2631_v9 = vpop.f32.mrf.mxu3 }
 0x2a9   : > { %3320 = vst.msk [vmem:[%s4592_s25 + $0x184] sm:$0xf] %vm3222_vm3, %v3191_v50  ;;  %v2804_v32 = vadd.f32 %v2631_v9, %v2276_v52  ;;  %v3159_v17 = vpack.c.bf16 %v3031_v47, %v3031_v47  ;;  %v5226_v47 = vld [vmem:[%s4514_s16 + $0x160] sm:$0xff]  ;;  %v2281_v9 = vadd.f32 %v4920_v35, %v4621_v25 }
 0x2aa   : > { %v1348_v28 = vpop.f32.mrf.mxu0  ;;  %v2551_v4 = vpop.f32.mrf.mxu2 }
 0x2ab   : > { %v2936_v15 = vadd.f32 %v4947_v48, %v2804_v32  ;;  %3288 = vst.msk [vmem:[%s4592_s25 + $0x104] sm:$0xf] %vm3222_vm3, %v3159_v17  ;;  %v2772_v26 = vadd.f32 %v2551_v4, %v2196_v29  ;;  %v2197_v43 = vpop.f32.mrf.mxu1 }
 0x2ac   : > { %v2198_v55 = vadd.f32 %v2197_v43, %v1348_v28 }
 0x2ad   : > { %v3064_v14 = vmax.f32 %v2936_v15, 0.0  ;;  %v2904_v11 = vadd.f32 %v4947_v48, %v2772_v26 }
 0x2af   : > { %v3192_v58 = vpack.c.bf16 %v3064_v14, %v3064_v14  ;;  %v3032_v5 = vmax.f32 %v2904_v11, 0.0 }
 0x2b0   : > { %v2633_v45 = vpop.f32.mrf.mxu3 }
 0x2b1   : > { %3321 = vst.msk [vmem:[%s4592_s25 + $0x188] sm:$0xf] %vm3222_vm3, %v3192_v58  ;;  %v2805_v3 = vadd.f32 %v2633_v45, %v2278_v37  ;;  %v3160_v31 = vpack.c.bf16 %v3032_v5, %v3032_v5  ;;  %v2283_v37 = vadd.f32 %v4925_v8, %v4626_v33 }
 0x2b2   : > { %v1351_v53 = vpop.f32.mrf.mxu0  ;;  %v2553_v52 = vpop.f32.mrf.mxu2 }
 0x2b3   : > { %v2937_v38 = vadd.f32 %v4947_v48, %v2805_v3  ;;  %3289 = vst.msk [vmem:[%s4592_s25 + $0x108] sm:$0xf] %vm3222_vm3, %v3160_v31  ;;  %v2773_v50 = vadd.f32 %v2553_v52, %v2198_v55  ;;  %v2200_v54 = vpop.f32.mrf.mxu1 }
 0x2b4   : > { %v2201_v28 = vadd.f32 %v2200_v54, %v1351_v53 }
 0x2b5   : > { %v3065_v12 = vmax.f32 %v2937_v38, 0.0  ;;  %3804 = vmatmul.msk.bf16.gmra.mxu0 %vm972_vm2, %v4340_v59  ;;  %4222 = vmatmul.msk.bf16.gmra.mxu3 %vm972_vm2, %v4954_v34  ;;  %v2905_v29 = vadd.f32 %v4947_v48, %v2773_v50  ;;  %v4341_v59 = vld [vmem:[%s4502_s12 + $0x158] sm:$0xff] }
 0x2b6   : > { %4128 = vmatmul.msk.bf16.gmra.mxu1 %vm972_vm2, %v5175_v21 }
 0x2b7   : > { %v3193_v32 = vpack.c.bf16 %v3065_v12, %v3065_v12  ;;  %v3033_v17 = vmax.f32 %v2905_v29, 0.0  ;;  %4206 = vmatmul.msk.bf16.gmra.mxu2 %vm972_vm2, %v5226_v47  ;;  %v5253_v12 = vld [vmem:[%s4514_s16 + $0x168] sm:$0xff]  ;;  %v2286_v29 = vadd.f32 %v4940_v44, %v4638_v46 }
 0x2b8   : > { %v2636_v15 = vpop.f32.mrf.mxu3 }
 0x2b9   : > { %3322 = vst.msk [vmem:[%s4592_s25 + $0x18c] sm:$0xf] %vm3222_vm3, %v3193_v32  ;;  %v2806_v4 = vadd.f32 %v2636_v15, %v2281_v9  ;;  %v3161_v34 = vpack.c.bf16 %v3033_v17, %v3033_v17 }
 0x2ba   : > { %v1353_v26 = vpop.f32.mrf.mxu0  ;;  %v2556_v25 = vpop.f32.mrf.mxu2 }
 0x2bb   : > { %v2938_v14 = vadd.f32 %v4947_v48, %v2806_v4  ;;  %3290 = vst.msk [vmem:[%s4592_s25 + $0x10c] sm:$0xf] %vm3222_vm3, %v3161_v34  ;;  %v2774_v35 = vadd.f32 %v2556_v25, %v2201_v28  ;;  %v2202_v21 = vpop.f32.mrf.mxu1  ;;  %v2288_v25 = vadd.f32 %v4950_v22, %v4643_v57 }
 0x2bc   : > { %v2203_v55 = vadd.f32 %v2202_v21, %v1353_v26 }
 0x2bd   : > { %v3066_v43 = vmax.f32 %v2938_v14, 0.0  ;;  %v2906_v11 = vadd.f32 %v4947_v48, %v2774_v35 }
 0x2bf   : > { %v3194_v58 = vpack.c.bf16 %v3066_v43, %v3066_v43  ;;  %v3034_v5 = vmax.f32 %v2906_v11, 0.0 }
 0x2c0   : > { %v2638_v45 = vpop.f32.mrf.mxu3 }
 0x2c1   : > { %3323 = vst.msk [vmem:[%s4592_s25 + $0x190] sm:$0xf] %vm3222_vm3, %v3194_v58  ;;  %v2807_v3 = vadd.f32 %v2638_v45, %v2283_v37  ;;  %v3162_v31 = vpack.c.bf16 %v3034_v5, %v3034_v5  ;;  %v4342_v37 = vld [vmem:[%s4502_s12 + $0x160] sm:$0xff] }
 0x2c2   : > { %v1356_v53 = vpop.f32.mrf.mxu0  ;;  %v2558_v52 = vpop.f32.mrf.mxu2 }
 0x2c3   : > { %v2939_v38 = vadd.f32 %v4947_v48, %v2807_v3  ;;  %3291 = vst.msk [vmem:[%s4592_s25 + $0x110] sm:$0xf] %vm3222_vm3, %v3162_v31  ;;  %v2775_v50 = vadd.f32 %v2558_v52, %v2203_v55  ;;  %v2205_v8 = vpop.f32.mrf.mxu1  ;;  %v5280_v55 = vld [vmem:[%s4514_s16 + $0x170] sm:$0xff] }
 0x2c4   : > { %v2206_v17 = vadd.f32 %v2205_v8, %v1356_v53 }
 0x2c5   : > { %v3067_v33 = vmax.f32 %v2939_v38, 0.0  ;;  %3805 = vmatmul.msk.bf16.gmra.mxu0 %vm972_vm2, %v4341_v59  ;;  %4223 = vmatmul.msk.bf16.gmra.mxu3 %vm972_vm2, %v4974_v19  ;;  %v2907_v54 = vadd.f32 %v4947_v48, %v2775_v50  ;;  %v2291_v38 = vadd.f32 %v4965_v60, %v4655_v7 }
 0x2c6   : > { %4129 = vmatmul.msk.bf16.gmra.mxu1 %vm972_vm2, %v5199_v27 }
 0x2c7   : > { %v3195_v9 = vpack.c.bf16 %v3067_v33, %v3067_v33  ;;  %v3035_v32 = vmax.f32 %v2907_v54, 0.0  ;;  %4207 = vmatmul.msk.bf16.gmra.mxu2 %vm972_vm2, %v5253_v12 }
 0x2c8   : > { %v2641_v28 = vpop.f32.mrf.mxu3 }
 0x2c9   : > { %3324 = vst.msk [vmem:[%s4592_s25 + $0x194] sm:$0xf] %vm3222_vm3, %v3195_v9  ;;  %v2808_v15 = vadd.f32 %v2641_v28, %v2286_v29  ;;  %v3163_v19 = vpack.c.bf16 %v3035_v32, %v3035_v32  ;;  %v2293_v28 = vadd.f32 %v4970_v0, %v4660_v16 }
 0x2ca   : > { %v1358_v4 = vpop.f32.mrf.mxu0  ;;  %v2561_v46 = vpop.f32.mrf.mxu2 }
 0x2cb   : > { %v2940_v34 = vadd.f32 %v4947_v48, %v2808_v15  ;;  %3292 = vst.msk [vmem:[%s4592_s25 + $0x114] sm:$0xf] %vm3222_vm3, %v3163_v19  ;;  %v2776_v44 = vadd.f32 %v2561_v46, %v2206_v17  ;;  %v2207_v27 = vpop.f32.mrf.mxu1  ;;  %v4343_v46 = vld [vmem:[%s4502_s12 + $0x168] sm:$0xff] }
 0x2cc   : > { %v2208_v5 = vadd.f32 %v2207_v27, %v1358_v4 }
 0x2cd   : > { %v3068_v26 = vmax.f32 %v2940_v34, 0.0  ;;  %v2908_v14 = vadd.f32 %v4947_v48, %v2776_v44 }
 0x2cf   : > { %v3196_v35 = vpack.c.bf16 %v3068_v26, %v3068_v26  ;;  %v3036_v43 = vmax.f32 %v2908_v14, 0.0 }
 0x2d0   : > { %v2643_v21 = vpop.f32.mrf.mxu3 }
 0x2d1   : > { %3325 = vst.msk [vmem:[%s4592_s25 + $0x198] sm:$0xf] %vm3222_vm3, %v3196_v35  ;;  %v2809_v11 = vadd.f32 %v2643_v21, %v2288_v25  ;;  %v3164_v58 = vpack.c.bf16 %v3036_v43, %v3036_v43  ;;  %v5307_v43 = vld [vmem:[%s4514_s16 + $0x178] sm:$0xff]  ;;  %v5315_v21 = vld [vmem:[%s5538_s4] ss:$0 sm:$0xff] }
 0x2d2   : > { %v1361_v45 = vpop.f32.mrf.mxu0  ;;  %v2563_v59 = vpop.f32.mrf.mxu2 }
 0x2d3   : > { %v2941_v3 = vadd.f32 %v4947_v48, %v2809_v11  ;;  %3293 = vst.msk [vmem:[%s4592_s25 + $0x118] sm:$0xf] %vm3222_vm3, %v3164_v58  ;;  %v2777_v31 = vadd.f32 %v2563_v59, %v2208_v5  ;;  %v2210_v22 = vpop.f32.mrf.mxu1  ;;  %v2296_v11 = vadd.f32 %v4985_v1, %v4672_v30 }
 0x2d4   : > { %v2211_v33 = vadd.f32 %v2210_v22, %v1361_v45 }
 0x2d5   : > { %v3069_v57 = vmax.f32 %v2941_v3, 0.0  ;;  %3806 = vmatmul.msk.bf16.gmra.mxu0 %vm972_vm2, %v4342_v37  ;;  %4224 = vmatmul.msk.bf16.gmra.mxu3 %vm972_vm2, %v4994_v40  ;;  %v2909_v53 = vadd.f32 %v4947_v48, %v2777_v31 }
 0x2d6   : > { %4130 = vmatmul.msk.bf16.gmra.mxu1 %vm972_vm2, %v5226_v47 }
 0x2d7   : > { %v3197_v52 = vpack.c.bf16 %v3069_v57, %v3069_v57  ;;  %v3037_v50 = vmax.f32 %v2909_v53, 0.0  ;;  %4208 = vmatmul.msk.bf16.gmra.mxu2 %vm972_vm2, %v5280_v55  ;;  %v2298_v53 = vadd.f32 %v4990_v10, %v4677_v39 }
 0x2d8   : > { %v2646_v8 = vpop.f32.mrf.mxu3 }
 0x2d9   : > { %3326 = vst.msk [vmem:[%s4592_s25 + $0x19c] sm:$0xf] %vm3222_vm3, %v3197_v52  ;;  %v2810_v54 = vadd.f32 %v2646_v8, %v2291_v38  ;;  %v3165_v40 = vpack.c.bf16 %v3037_v50, %v3037_v50  ;;  %v4344_v8 = vld [vmem:[%s4502_s12 + $0x170] sm:$0xff] }
 0x2da   : > { %v1363_v29 = vpop.f32.mrf.mxu0  ;;  %v2566_v7 = vpop.f32.mrf.mxu2 }
 0x2db   : > { %v2942_v9 = vadd.f32 %v4947_v48, %v2810_v54  ;;  %3294 = vst.msk [vmem:[%s4592_s25 + $0x11c] sm:$0xf] %vm3222_vm3, %v3165_v40  ;;  %v2778_v60 = vadd.f32 %v2566_v7, %v2211_v33  ;;  %v2212_v47 = vpop.f32.mrf.mxu1  ;;  %v4362_v54 = vld [vmem:[%s5335_s8] sm:$0xff] }
 0x2dc   : > { %v2213_v26 = vadd.f32 %v2212_v47, %v1363_v29 }
 0x2dd   : > { %v3070_v32 = vmax.f32 %v2942_v9, 0.0  ;;  %v2910_v17 = vadd.f32 %v4947_v48, %v2778_v60 }
 0x2df   : > { %v3198_v15 = vpack.c.bf16 %v3070_v32, %v3070_v32  ;;  %v3038_v19 = vmax.f32 %v2910_v17, 0.0  ;;  %v2301_v17 = vadd.f32 %v5005_v24, %v4689_v56 }
 0x2e0   : > { %v2648_v4 = vpop.f32.mrf.mxu3 }
 0x2e1   : > { %3327 = vst.msk [vmem:[%s4592_s25 + $0x1a0] sm:$0xf] %vm3222_vm3, %v3198_v15  ;;  %v2811_v34 = vadd.f32 %v2648_v4, %v2293_v28  ;;  %v3166_v44 = vpack.c.bf16 %v3038_v19, %v3038_v19  ;;  %v4401_v4 = vld [vmem:[%s4514_s16 + $0x180] sm:$0xff] }
 0x2e2   : > { %v1366_v27 = vpop.f32.mrf.mxu0  ;;  %v2568_v25 = vpop.f32.mrf.mxu2 }
 0x2e3   : > { %v2943_v14 = vadd.f32 %v4947_v48, %v2811_v34  ;;  %3295 = vst.msk [vmem:[%s4592_s25 + $0x120] sm:$0xf] %vm3222_vm3, %v3166_v44  ;;  %v2779_v35 = vadd.f32 %v2568_v25, %v2213_v26  ;;  %v2215_v0 = vpop.f32.mrf.mxu1 }
 0x2e4   : > { %v2216_v5 = vadd.f32 %v2215_v0, %v1366_v27 }
 0x2e5   : > { %v3071_v16 = vmax.f32 %v2943_v14, 0.0  ;;  %3807 = vmatmul.msk.bf16.gmra.mxu0 %vm972_vm2, %v4343_v46  ;;  %4225 = vmatmul.msk.bf16.gmra.mxu3 %vm972_vm2, %v5014_v61  ;;  %v2911_v48 = vadd.f32 %v5315_v21, %v2779_v35  ;;  %v2303_v35 = vadd.f32 %v5010_v23, %v4694_v2 }
 0x2e6   : > { %4131 = vmatmul.msk.bf16.gmra.mxu1 %vm972_vm2, %v5253_v12 }
 0x2e7   : > { %v3199_v37 = vpack.c.bf16 %v3071_v16, %v3071_v16  ;;  %v3039_v58 = vmax.f32 %v2911_v48, 0.0  ;;  %4209 = vmatmul.msk.bf16.gmra.mxu2 %vm972_vm2, %v5307_v43 }
 0x2e8   : > { %v2651_v61 = vpop.f32.mrf.mxu3 }
 0x2e9   : > { %3328 = vst.msk [vmem:[%s4592_s25 + $0x1a4] sm:$0xf] %vm3222_vm3, %v3199_v37  ;;  %v2812_v45 = vadd.f32 %v2651_v61, %v2296_v11  ;;  %v3167_v3 = vpack.c.bf16 %v3039_v58, %v3039_v58  ;;  %v4345_v37 = vld [vmem:[%s4502_s12 + $0x178] sm:$0xff]  ;;  %v4363_v58 = vld [vmem:[%s5335_s8 + $0x8] sm:$0xff] }
 0x2ea   : > { %v1368_v59 = vpop.f32.mrf.mxu0  ;;  %v2571_v30 = vpop.f32.mrf.mxu2 }
 0x2eb   : > { %v2944_v31 = vadd.f32 %v5315_v21, %v2812_v45  ;;  %3296 = vst.msk [vmem:[%s4592_s25 + $0x124] sm:$0xf] %vm3222_vm3, %v3167_v3  ;;  %v2780_v1 = vadd.f32 %v2571_v30, %v2216_v5  ;;  %v2217_v57 = vpop.f32.mrf.mxu1 }
 0x2ec   : > { %v2218_v29 = vadd.f32 %v2217_v57, %v1368_v59 }
 0x2ed   : > { %v3072_v12 = vmax.f32 %v2944_v31, 0.0  ;;  %v2912_v22 = vadd.f32 %v5315_v21, %v2780_v1  ;;  %v2306_v1 = vadd.f32 %v5025_v51, %v4706_v18 }
 0x2ef   : > { %v3200_v38 = vpack.c.bf16 %v3072_v12, %v3072_v12  ;;  %v3040_v52 = vmax.f32 %v2912_v22, 0.0 }
 0x2f0   : > { %v2653_v50 = vpop.f32.mrf.mxu3 }
 0x2f1   : > { %3329 = vst.msk [vmem:[%s4592_s25 + $0x1a8] sm:$0xf] %vm3222_vm3, %v3200_v38  ;;  %v2813_v33 = vadd.f32 %v2653_v50, %v2298_v53  ;;  %v3168_v40 = vpack.c.bf16 %v3040_v52, %v3040_v52  ;;  %v4402_v53 = vld [vmem:[%s4514_s16 + $0x188] sm:$0xff] }
 0x2f2   : > { %v1371_v9 = vpop.f32.mrf.mxu0  ;;  %v2573_v60 = vpop.f32.mrf.mxu2 }
 0x2f3   : > { %v2945_v7 = vadd.f32 %v5315_v21, %v2813_v33  ;;  %3297 = vst.msk [vmem:[%s4592_s25 + $0x128] sm:$0xf] %vm3222_vm3, %v3168_v40  ;;  %v2781_v32 = vadd.f32 %v2573_v60, %v2218_v29  ;;  %v2220_v10 = vpop.f32.mrf.mxu1  ;;  %v5565_v29 = vld [vmem:[#allocation2_spill] sm:$0xff] }
 0x2f4   : > { %v2221_v19 = vadd.f32 %v2220_v10, %v1371_v9  ;;  %v2308_v9 = vadd.f32 %v5030_v42, %v5565_v29 }
 0x2f5   : > { %v3073_v39 = vmax.f32 %v2945_v7, 0.0  ;;  %3808 = vmatmul.msk.bf16.gmra.mxu0 %vm972_vm2, %v4344_v8  ;;  %4226 = vmatmul.msk.bf16.gmra.mxu3 %vm972_vm2, %v4362_v54  ;;  %v2913_v47 = vadd.f32 %v5315_v21, %v2781_v32 }
 0x2f6   : > { %4132 = vmatmul.msk.bf16.gmra.mxu1 %vm972_vm2, %v5280_v55 }
 0x2f7   : > { %v3201_v28 = vpack.c.bf16 %v3073_v39, %v3073_v39  ;;  %v3041_v15 = vmax.f32 %v2913_v47, 0.0  ;;  %4210 = vmatmul.msk.bf16.gmra.mxu2 %vm972_vm2, %v4401_v4 }
 0x2f8   : > { %v2656_v34 = vpop.f32.mrf.mxu3 }
 0x2f9   : > { %3330 = vst.msk [vmem:[%s4592_s25 + $0x1ac] sm:$0xf] %vm3222_vm3, %v3201_v28  ;;  %v2814_v46 = vadd.f32 %v2656_v34, %v2301_v17  ;;  %v3169_v44 = vpack.c.bf16 %v3041_v15, %v3041_v15 }
 0x2fa   : > { %v1373_v26 = vpop.f32.mrf.mxu0  ;;  %v2576_v24 = vpop.f32.mrf.mxu2 }
 0x2fb   : > { %v2946_v56 = vadd.f32 %v5315_v21, %v2814_v46  ;;  %3298 = vst.msk [vmem:[%s4592_s25 + $0x12c] sm:$0xf] %vm3222_vm3, %v3169_v44  ;;  %v2782_v27 = vadd.f32 %v2576_v24, %v2221_v19  ;;  %v2222_v55 = vpop.f32.mrf.mxu1  ;;  %v5566_v46 = vld [vmem:[#allocation3_spill] sm:$0xff] }
 0x2fc   : > { %v2223_v61 = vadd.f32 %v2222_v55, %v1373_v26  ;;  %v5567_v44 = vld [vmem:[#allocation19_spill] sm:$0xff] }
 0x2fd   : > { %v3074_v14 = vmax.f32 %v2946_v56, 0.0  ;;  %v2914_v25 = vadd.f32 %v5315_v21, %v2782_v27  ;;  %v2311_v26 = vadd.f32 %v5567_v44, %v5566_v46 }
 0x2ff   : > { %v3202_v16 = vpack.c.bf16 %v3074_v14, %v3074_v14  ;;  %v3042_v0 = vmax.f32 %v2914_v25, 0.0 }
 0x300   : > { %v2658_v48 = vpop.f32.mrf.mxu3 }
 0x301   : > { %3331 = vst.msk [vmem:[%s4592_s25 + $0x1b0] sm:$0xf] %vm3222_vm3, %v3202_v16  ;;  %v2815_v11 = vadd.f32 %v2658_v48, %v2303_v35  ;;  %v3170_v5 = vpack.c.bf16 %v3042_v0, %v3042_v0 }
 0x302   : > { %v1376_v45 = vpop.f32.mrf.mxu0  ;;  %v2578_v59 = vpop.f32.mrf.mxu2 }
 0x303   : > { %v2947_v3 = vadd.f32 %v5315_v21, %v2815_v11  ;;  %3299 = vst.msk [vmem:[%s4592_s25 + $0x130] sm:$0xf] %vm3222_vm3, %v3170_v5  ;;  %v2783_v31 = vadd.f32 %v2578_v59, %v2223_v61  ;;  %v2225_v23 = vpop.f32.mrf.mxu1  ;;  %v5568_v5 = vld [vmem:[#allocation4_spill] sm:$0xff] }
 0x304   : > { %v2226_v22 = vadd.f32 %v2225_v23, %v1376_v45  ;;  %v2313_v61 = vadd.f32 %v5047_v41, %v5568_v5 }
 0x305   : > { %v3075_v2 = vmax.f32 %v2947_v3, 0.0  ;;  %3809 = vmatmul.msk.bf16.gmra.mxu0 %vm972_vm2, %v4345_v37  ;;  %4227 = vmatmul.msk.bf16.gmra.mxu3 %vm972_vm2, %v4363_v58  ;;  %v2915_v30 = vadd.f32 %v5315_v21, %v2783_v31 }
 0x306   : > { %4133 = vmatmul.msk.bf16.gmra.mxu1 %vm972_vm2, %v5307_v43 }
 0x307   : > { %v3203_v12 = vpack.c.bf16 %v3075_v2, %v3075_v2  ;;  %v3043_v57 = vmax.f32 %v2915_v30, 0.0  ;;  %4211 = vmatmul.msk.bf16.gmra.mxu2 %vm972_vm2, %v4402_v53 }
 0x308   : > { %v2661_v38 = vpop.f32.mrf.mxu3 }
 0x309   : > { %3332 = vst.msk [vmem:[%s4592_s25 + $0x1b4] sm:$0xf] %vm3222_vm3, %v3203_v12  ;;  %v2816_v52 = vadd.f32 %v2661_v38, %v2306_v1  ;;  %v3171_v50 = vpack.c.bf16 %v3043_v57, %v3043_v57  ;;  %v5569_v38 = vld [vmem:[#allocation5_spill] sm:$0xff] }
 0x30a   : > { %v1378_v33 = vpop.f32.mrf.mxu0  ;;  %v2581_v54 = vpop.f32.mrf.mxu2 }
 0x30b   : > { %v2948_v8 = vadd.f32 %v5315_v21, %v2816_v52  ;;  %3300 = vst.msk [vmem:[%s4592_s25 + $0x134] sm:$0xf] %vm3222_vm3, %v3171_v50  ;;  %v2784_v18 = vadd.f32 %v2581_v54, %v2226_v22  ;;  %v2227_v40 = vpop.f32.mrf.mxu1  ;;  %v5570_v52 = vld [vmem:[#allocation20_spill] sm:$0xff] }
 0x30c   : > { %v2228_v47 = vadd.f32 %v2227_v40, %v1378_v33  ;;  %v2316_v50 = vadd.f32 %v5570_v52, %v5569_v38 }
 0x30d   : > { %v3076_v51 = vmax.f32 %v2948_v8, 0.0  ;;  %v2916_v43 = vadd.f32 %v5315_v21, %v2784_v18 }
 0x30f   : > { %v3204_v7 = vpack.c.bf16 %v3076_v51, %v3076_v51  ;;  %v3044_v60 = vmax.f32 %v2916_v43, 0.0 }
 0x310   : > { %v2663_v32 = vpop.f32.mrf.mxu3 }
 0x311   : > { %3333 = vst.msk [vmem:[%s4592_s25 + $0x1b8] sm:$0xf] %vm3222_vm3, %v3204_v7  ;;  %v2817_v39 = vadd.f32 %v2663_v32, %v2308_v9  ;;  %v3172_v10 = vpack.c.bf16 %v3044_v60, %v3044_v60 }
 0x312   : > { %v1381_v17 = vpop.f32.mrf.mxu0  ;;  %v2583_v15 = vpop.f32.mrf.mxu2 }
 0x313   : > { %v2949_v28 = vadd.f32 %v5315_v21, %v2817_v39  ;;  %3301 = vst.msk [vmem:[%s4592_s25 + $0x138] sm:$0xf] %vm3222_vm3, %v3172_v10  ;;  %v2785_v19 = vadd.f32 %v2583_v15, %v2228_v47  ;;  %v2230_v34 = vpop.f32.mrf.mxu1  ;;  %v5571_v10 = vld [vmem:[#allocation6_spill] sm:$0xff] }
 0x314   : > { %v2231_v27 = vadd.f32 %v2230_v34, %v1381_v17  ;;  %v2318_v47 = vadd.f32 %v5064_v6, %v5571_v10 }
 0x315   : > { %v3077_v4 = vmax.f32 %v2949_v28, 0.0  ;;  %v2917_v42 = vadd.f32 %v5315_v21, %v2785_v19 }
 0x317   : > { %v3205_v56 = vpack.c.bf16 %v3077_v4, %v3077_v4  ;;  %v3045_v24 = vmax.f32 %v2917_v42, 0.0 }
 0x318   : > { %v2666_v14 = vpop.f32.mrf.mxu3 }
 0x319   : > { %3334 = vst.msk [vmem:[%s4592_s25 + $0x1bc] sm:$0xf] %vm3222_vm3, %v3205_v56  ;;  %v2818_v55 = vadd.f32 %v2666_v14, %v2311_v26  ;;  %v3173_v25 = vpack.c.bf16 %v3045_v24, %v3045_v24  ;;  %v5573_v14 = vld [vmem:[#allocation21_spill] sm:$0xff] }
 0x31a   : > { %v1383_v35 = vpop.f32.mrf.mxu0  ;;  %v2586_v0 = vpop.f32.mrf.mxu2 }
 0x31b   : > { %v2950_v16 = vadd.f32 %v5315_v21, %v2818_v55  ;;  %3302 = vst.msk [vmem:[%s4592_s25 + $0x13c] sm:$0xf] %vm3222_vm3, %v3173_v25  ;;  %v2786_v48 = vadd.f32 %v2586_v0, %v2231_v27  ;;  %v2232_v37 = vpop.f32.mrf.mxu1  ;;  %v5572_v27 = vld [vmem:[#allocation7_spill] sm:$0xff] }
 0x31c   : > { %v2233_v23 = vadd.f32 %v2232_v37, %v1383_v35  ;;  %v2321_v55 = vadd.f32 %v5573_v14, %v5572_v27 }
 0x31d   : > { %v3078_v11 = vmax.f32 %v2950_v16, 0.0  ;;  %v2918_v58 = vadd.f32 %v5315_v21, %v2786_v48 }
 0x31f   : > { %v3206_v45 = vpack.c.bf16 %v3078_v11, %v3078_v11  ;;  %v3046_v3 = vmax.f32 %v2918_v58, 0.0 }
 0x320   : > { %v2668_v59 = vpop.f32.mrf.mxu3 }
 0x321   : > { %3335 = vst.msk [vmem:[%s4592_s25 + $0x1c0] sm:$0xf] %vm3222_vm3, %v3206_v45  ;;  %v2819_v31 = vadd.f32 %v2668_v59, %v2313_v61  ;;  %v3174_v2 = vpack.c.bf16 %v3046_v3, %v3046_v3 }
 0x322   : > { %v1386_v30 = vpop.f32.mrf.mxu0  ;;  %v2588_v12 = vpop.f32.mrf.mxu2 }
 0x323   : > { %v2951_v1 = vadd.f32 %v5315_v21, %v2819_v31  ;;  %3303 = vst.msk [vmem:[%s4592_s25 + $0x140] sm:$0xf] %vm3222_vm3, %v3174_v2  ;;  %v2787_v57 = vadd.f32 %v2588_v12, %v2233_v23  ;;  %v2235_v53 = vpop.f32.mrf.mxu1  ;;  %v5574_v31 = vld [vmem:[#allocation8_spill] sm:$0xff] }
 0x324   : > { %v2236_v54 = vadd.f32 %v2235_v53, %v1386_v30  ;;  %v2323_v2 = vadd.f32 %v5081_v36, %v5574_v31 }
 0x325   : > { %v3079_v22 = vmax.f32 %v2951_v1, 0.0  ;;  %v2919_v41 = vadd.f32 %v5315_v21, %v2787_v57 }
 0x327   : > { %v3207_v33 = vpack.c.bf16 %v3079_v22, %v3079_v22  ;;  %v3047_v8 = vmax.f32 %v2919_v41, 0.0 }
 0x328   : > { %v2671_v18 = vpop.f32.mrf.mxu3 }
 0x329   : > { %3336 = vst.msk [vmem:[%s4592_s25 + $0x1c4] sm:$0xf] %vm3222_vm3, %v3207_v33  ;;  %v2820_v51 = vadd.f32 %v2671_v18, %v2316_v50  ;;  %v3175_v40 = vpack.c.bf16 %v3047_v8, %v3047_v8  ;;  %v5575_v8 = vld [vmem:[#allocation9_spill] sm:$0xff] }
 0x32a   : > { %v1388_v43 = vpop.f32.mrf.mxu0  ;;  %v2591_v9 = vpop.f32.mrf.mxu2 }
 0x32b   : > { %v2952_v29 = vadd.f32 %v5315_v21, %v2820_v51  ;;  %3304 = vst.msk [vmem:[%s4592_s25 + $0x144] sm:$0xf] %vm3222_vm3, %v3175_v40  ;;  %v2788_v7 = vadd.f32 %v2591_v9, %v2236_v54  ;;  %v2237_v32 = vpop.f32.mrf.mxu1  ;;  %v5576_v54 = vld [vmem:[#allocation22_spill] sm:$0xff] }
 0x32c   : > { %v2238_v34 = vadd.f32 %v2237_v32, %v1388_v43  ;;  %v2326_v18 = vadd.f32 %v5576_v54, %v5575_v8 }
 0x32d   : > { %v3080_v60 = vmax.f32 %v2952_v29, 0.0  ;;  %v2920_v39 = vadd.f32 %v5315_v21, %v2788_v7 }
 0x32f   : > { %v3208_v17 = vpack.c.bf16 %v3080_v60, %v3080_v60  ;;  %v3048_v28 = vmax.f32 %v2920_v39, 0.0 }
 0x330   : > { %v2673_v15 = vpop.f32.mrf.mxu3 }
 0x331   : > { %3337 = vst.msk [vmem:[%s4592_s25 + $0x1c8] sm:$0xf] %vm3222_vm3, %v3208_v17  ;;  %v2821_v19 = vadd.f32 %v2673_v15, %v2318_v47  ;;  %v3176_v4 = vpack.c.bf16 %v3048_v28, %v3048_v28  ;;  %v5577_v15 = vld [vmem:[#allocation10_spill] sm:$0xff] }
 0x332   : > { %v1391_v42 = vpop.f32.mrf.mxu0  ;;  %v2593_v44 = vpop.f32.mrf.mxu2 }
 0x333   : > { %v2953_v46 = vadd.f32 %v5315_v21, %v2821_v19  ;;  %3305 = vst.msk [vmem:[%s4592_s25 + $0x148] sm:$0xf] %vm3222_vm3, %v3176_v4  ;;  %v2789_v26 = vadd.f32 %v2593_v44, %v2238_v34  ;;  %v2240_v24 = vpop.f32.mrf.mxu1  ;;  %v2328_v19 = vadd.f32 %v5098_v49, %v5577_v15 }
 0x334   : > { %v2241_v16 = vadd.f32 %v2240_v24, %v1391_v42 }
 0x335   : > { %v3081_v56 = vmax.f32 %v2953_v46, 0.0  ;;  %v2921_v6 = vadd.f32 %v5315_v21, %v2789_v26 }
 0x337   : > { %v3209_v25 = vpack.c.bf16 %v3081_v56, %v3081_v56  ;;  %v3049_v35 = vmax.f32 %v2921_v6, 0.0 }
 0x338   : > { %v2676_v0 = vpop.f32.mrf.mxu3 }
 0x339   : > { %3338 = vst.msk [vmem:[%s4592_s25 + $0x1cc] sm:$0xf] %vm3222_vm3, %v3209_v25  ;;  %v2822_v48 = vadd.f32 %v2676_v0, %v2321_v55  ;;  %v3177_v11 = vpack.c.bf16 %v3049_v35, %v3049_v35  ;;  %v5578_v25 = vld [vmem:[#allocation11_spill] sm:$0xff] }
 0x33a   : > { %v1393_v37 = vpop.f32.mrf.mxu0  ;;  %v2596_v5 = vpop.f32.mrf.mxu2  ;;  %v5579_v35 = vld [vmem:[#allocation23_spill] sm:$0xff] }
 0x33b   : > { %v2954_v58 = vadd.f32 %v5315_v21, %v2822_v48  ;;  %3306 = vst.msk [vmem:[%s4592_s25 + $0x14c] sm:$0xf] %vm3222_vm3, %v3177_v11  ;;  %v2790_v61 = vadd.f32 %v2596_v5, %v2241_v16  ;;  %v2242_v3 = vpop.f32.mrf.mxu1  ;;  %v2331_v16 = vadd.f32 %v5579_v35, %v5578_v25  ;;  %v5584_v35 = vld [vmem:[#allocation15_spill] sm:$0xff] }
 0x33c   : > { %v2243_v22 = vadd.f32 %v2242_v3, %v1393_v37 }
 0x33d   : > { %v3082_v45 = vmax.f32 %v2954_v58, 0.0  ;;  %v2922_v59 = vadd.f32 %v5315_v21, %v2790_v61 }
 0x33f   : > { %v3210_v23 = vpack.c.bf16 %v3082_v45, %v3082_v45  ;;  %v3050_v30 = vmax.f32 %v2922_v59, 0.0 }
 0x340   : > { %v2678_v1 = vpop.f32.mrf.mxu3 }
 0x341   : > { %3339 = vst.msk [vmem:[%s4592_s25 + $0x1d0] sm:$0xf] %vm3222_vm3, %v3210_v23  ;;  %v2823_v12 = vadd.f32 %v2678_v1, %v2323_v2  ;;  %v3178_v57 = vpack.c.bf16 %v3050_v30, %v3050_v30  ;;  %v5580_v30 = vld [vmem:[#allocation12_spill] sm:$0xff] }
 0x342   : > { %v1396_v53 = vpop.f32.mrf.mxu0  ;;  %v2598_v38 = vpop.f32.mrf.mxu2  ;;  %v2333_v1 = vadd.f32 %v5115_v63, %v5580_v30 }
 0x343   : > { %v2955_v41 = vadd.f32 %v5315_v21, %v2823_v12  ;;  %3307 = vst.msk [vmem:[%s4592_s25 + $0x150] sm:$0xf] %vm3222_vm3, %v3178_v57  ;;  %v2791_v52 = vadd.f32 %v2598_v38, %v2243_v22  ;;  %v2245_v33 = vpop.f32.mrf.mxu1 }
 0x344   : > { %v2246_v43 = vadd.f32 %v2245_v33, %v1396_v53 }
 0x345   : > { %v3083_v50 = vmax.f32 %v2955_v41, 0.0  ;;  %v2923_v36 = vadd.f32 %v5315_v21, %v2791_v52 }
 0x347   : > { %v3211_v51 = vpack.c.bf16 %v3083_v50, %v3083_v50  ;;  %v3051_v40 = vmax.f32 %v2923_v36, 0.0 }
 0x348   : > { %v2681_v29 = vpop.f32.mrf.mxu3 }
 0x349   : > { %3340 = vst.msk [vmem:[%s4592_s25 + $0x1d4] sm:$0xf] %vm3222_vm3, %v3211_v51  ;;  %v2824_v9 = vadd.f32 %v2681_v29, %v2326_v18  ;;  %v3179_v7 = vpack.c.bf16 %v3051_v40, %v3051_v40  ;;  %v5581_v18 = vld [vmem:[#allocation13_spill] sm:$0xff]  ;;  %v5582_v51 = vld [vmem:[#allocation24_spill] sm:$0xff] }
 0x34a   : > { %v1398_v60 = vpop.f32.mrf.mxu0  ;;  %v2601_v39 = vpop.f32.mrf.mxu2  ;;  %v2336_v40 = vadd.f32 %v5582_v51, %v5581_v18  ;;  %v5587_v18 = vld [vmem:[#allocation17_spill] sm:$0xff]  ;;  %v5588_v51 = vld [vmem:[#allocation26_spill] sm:$0xff] }
 0x34b   : > { %v2956_v32 = vadd.f32 %v5315_v21, %v2824_v9  ;;  %3308 = vst.msk [vmem:[%s4592_s25 + $0x154] sm:$0xf] %vm3222_vm3, %v3179_v7  ;;  %v2792_v10 = vadd.f32 %v2601_v39, %v2246_v43  ;;  %v2247_v17 = vpop.f32.mrf.mxu1 }
 0x34c   : > { %v2248_v26 = vadd.f32 %v2247_v17, %v1398_v60 }
 0x34d   : > { %v3084_v47 = vmax.f32 %v2956_v32, 0.0  ;;  %v2924_v28 = vadd.f32 %v5315_v21, %v2792_v10 }
 0x34f   : > { %v3212_v4 = vpack.c.bf16 %v3084_v47, %v3084_v47  ;;  %v3052_v34 = vmax.f32 %v2924_v28, 0.0 }
 0x350   : > { %v2683_v42 = vpop.f32.mrf.mxu3 }
 0x351   : > { %3341 = vst.msk [vmem:[%s4592_s25 + $0x1d8] sm:$0xf] %vm3222_vm3, %v3212_v4  ;;  %v2825_v46 = vadd.f32 %v2683_v42, %v2328_v19  ;;  %v3180_v44 = vpack.c.bf16 %v3052_v34, %v3052_v34  ;;  %v5583_v4 = vld [vmem:[#allocation14_spill] sm:$0xff] }
 0x352   : > { %v1401_v56 = vpop.f32.mrf.mxu0  ;;  %v2603_v6 = vpop.f32.mrf.mxu2  ;;  %v2338_v34 = vadd.f32 %v5132_v13, %v5583_v4 }
 0x353   : > { %v2957_v24 = vadd.f32 %v5315_v21, %v2825_v46  ;;  %3309 = vst.msk [vmem:[%s4592_s25 + $0x158] sm:$0xf] %vm3222_vm3, %v3180_v44  ;;  %v2793_v27 = vadd.f32 %v2603_v6, %v2248_v26  ;;  %v2250_v55 = vpop.f32.mrf.mxu1 }
 0x354   : > { %v2251_v11 = vadd.f32 %v2250_v55, %v1401_v56 }
 0x355   : > { %v3085_v14 = vmax.f32 %v2957_v24, 0.0  ;;  %v2925_v49 = vadd.f32 %v5315_v21, %v2793_v27 }
 0x357   : > { %v3213_v0 = vpack.c.bf16 %v3085_v14, %v3085_v14  ;;  %v3053_v48 = vmax.f32 %v2925_v49, 0.0 }
 0x358   : > { %v2686_v37 = vpop.f32.mrf.mxu3 }
 0x359   : > { %3342 = vst.msk [vmem:[%s4592_s25 + $0x1dc] sm:$0xf] %vm3222_vm3, %v3213_v0  ;;  %v2826_v58 = vadd.f32 %v2686_v37, %v2331_v16  ;;  %v3181_v5 = vpack.c.bf16 %v3053_v48, %v3053_v48  ;;  %v5585_v16 = vld [vmem:[#allocation25_spill] sm:$0xff] }
 0x35a   : > { %v1403_v61 = vpop.f32.mrf.mxu0  ;;  %v2606_v3 = vpop.f32.mrf.mxu2  ;;  %v2341_v0 = vadd.f32 %v5585_v16, %v5584_v35 }
 0x35b   : > { %v2958_v45 = vadd.f32 %v5315_v21, %v2826_v58  ;;  %3310 = vst.msk [vmem:[%s4592_s25 + $0x15c] sm:$0xf] %vm3222_vm3, %v3181_v5  ;;  %v2794_v59 = vadd.f32 %v2606_v3, %v2251_v11  ;;  %v2252_v2 = vpop.f32.mrf.mxu1 }
 0x35c   : > { %v2253_v38 = vadd.f32 %v2252_v2, %v1403_v61 }
 0x35d   : > { %v3086_v31 = vmax.f32 %v2958_v45, 0.0  ;;  %v2926_v23 = vadd.f32 %v5315_v21, %v2794_v59 }
 0x35f   : > { %v3214_v12 = vpack.c.bf16 %v3086_v31, %v3086_v31  ;;  %v3054_v57 = vmax.f32 %v2926_v23, 0.0 }
 0x360   : > { %v2688_v22 = vpop.f32.mrf.mxu3 }
 0x361   : > { %3343 = vst.msk [vmem:[%s4592_s25 + $0x1e0] sm:$0xf] %vm3222_vm3, %v3214_v12  ;;  %v2827_v53 = vadd.f32 %v2688_v22, %v2333_v1  ;;  %v3182_v41 = vpack.c.bf16 %v3054_v57, %v3054_v57  ;;  %v5586_v1 = vld [vmem:[#allocation16_spill] sm:$0xff] }
 0x362   : > { %v1406_v52 = vpop.f32.mrf.mxu0  ;;  %v2608_v33 = vpop.f32.mrf.mxu2  ;;  %v2343_v12 = vadd.f32 %v5149_v20, %v5586_v1 }
 0x363   : > { %v2959_v50 = vadd.f32 %v5315_v21, %v2827_v53  ;;  %3311 = vst.msk [vmem:[%s4592_s25 + $0x160] sm:$0xf] %vm3222_vm3, %v3182_v41  ;;  %v2795_v36 = vadd.f32 %v2608_v33, %v2253_v38  ;;  %v2255_v54 = vpop.f32.mrf.mxu1 }
 0x364   : > { %v2256_v9 = vadd.f32 %v2255_v54, %v1406_v52 }
 0x365   : > { %v3087_v8 = vmax.f32 %v2959_v50, 0.0  ;;  %v2927_v63 = vadd.f32 %v5315_v21, %v2795_v36 }
 0x367   : > { %v3215_v43 = vpack.c.bf16 %v3087_v8, %v3087_v8  ;;  %v3055_v29 = vmax.f32 %v2927_v63, 0.0 }
 0x368   : > { %v2691_v7 = vpop.f32.mrf.mxu3 }
 0x369   : > { %3344 = vst.msk [vmem:[%s4592_s25 + $0x1e4] sm:$0xf] %vm3222_vm3, %v3215_v43  ;;  %v2828_v60 = vadd.f32 %v2691_v7, %v2336_v40  ;;  %v3183_v32 = vpack.c.bf16 %v3055_v29, %v3055_v29  ;;  %v2346_v40 = vadd.f32 %v5588_v51, %v5587_v18 }
 0x36a   : > { %v1408_v39 = vpop.f32.mrf.mxu0  ;;  %v2611_v47 = vpop.f32.mrf.mxu2 }
 0x36b   : > { %v2960_v10 = vadd.f32 %v5315_v21, %v2828_v60  ;;  %3312 = vst.msk [vmem:[%s4592_s25 + $0x164] sm:$0xf] %vm3222_vm3, %v3183_v32  ;;  %v2796_v17 = vadd.f32 %v2611_v47, %v2256_v9  ;;  %v2257_v15 = vpop.f32.mrf.mxu1 }
 0x36c   : > { %v2258_v24 = vadd.f32 %v2257_v15, %v1408_v39  ;;  %v5589_v15 = vld [vmem:[#allocation18_spill] sm:$0xff] }
 0x36d   : > { %v3088_v28 = vmax.f32 %v2960_v10, 0.0  ;;  %v2928_v19 = vadd.f32 %v5315_v21, %v2796_v17 }
 0x36f   : > { %v3216_v42 = vpack.c.bf16 %v3088_v28, %v3088_v28  ;;  %v3056_v46 = vmax.f32 %v2928_v19, 0.0  ;;  %v2348_v19 = vadd.f32 %v5169_v62, %v5589_v15 }
 0x370   : > { %v2693_v44 = vpop.f32.mrf.mxu3 }
 0x371   : > { %3345 = vst.msk [vmem:[%s4592_s25 + $0x1e8] sm:$0xf] %vm3222_vm3, %v3216_v42  ;;  %v2829_v26 = vadd.f32 %v2693_v44, %v2338_v34  ;;  %v3184_v56 = vpack.c.bf16 %v3056_v46, %v3056_v46 }
 0x372   : > { %v1411_v6 = vpop.f32.mrf.mxu0  ;;  %v2613_v14 = vpop.f32.mrf.mxu2 }
 0x373   : > { %v2961_v27 = vadd.f32 %v5315_v21, %v2829_v26  ;;  %3313 = vst.msk [vmem:[%s4592_s25 + $0x168] sm:$0xf] %vm3222_vm3, %v3184_v56  ;;  %v2797_v55 = vadd.f32 %v2613_v14, %v2258_v24  ;;  %v2260_v25 = vpop.f32.mrf.mxu1 }
 0x374   : > { %v2261_v37 = vadd.f32 %v2260_v25, %v1411_v6 }
 0x375   : > { %v3089_v49 = vmax.f32 %v2961_v27, 0.0  ;;  %v2929_v13 = vadd.f32 %v5315_v21, %v2797_v55 }
 0x377   : > { %v3217_v48 = vpack.c.bf16 %v3089_v49, %v3089_v49  ;;  %v3057_v11 = vmax.f32 %v2929_v13, 0.0 }
 0x378   : > { %v2696_v58 = vpop.f32.mrf.mxu3 }
 0x379   : > { %3346 = vst.msk [vmem:[%s4592_s25 + $0x1ec] sm:$0xf] %vm3222_vm3, %v3217_v48  ;;  %v2830_v5 = vadd.f32 %v2696_v58, %v2341_v0  ;;  %v3185_v61 = vpack.c.bf16 %v3057_v11, %v3057_v11 }
 0x37a   : > { %v2616_v3 = vpop.f32.mrf.mxu2  ;;  %v1413_v59 = vpop.f32.mrf.mxu0 }
 0x37b   : > { %v2962_v45 = vadd.f32 %v5315_v21, %v2830_v5  ;;  %3314 = vst.msk [vmem:[%s4592_s25 + $0x16c] sm:$0xf] %vm3222_vm3, %v3185_v61  ;;  %v2798_v31 = vadd.f32 %v2616_v3, %v2261_v37  ;;  %v2262_v23 = vpop.f32.mrf.mxu1 }
 0x37c   : > { %v2263_v52 = vadd.f32 %v2262_v23, %v1413_v59 }
 0x37d   : > { %v3090_v2 = vmax.f32 %v2962_v45, 0.0  ;;  %v2930_v30 = vadd.f32 %v5315_v21, %v2798_v31 }
 0x37f   : > { %v3218_v57 = vpack.c.bf16 %v3090_v2, %v3090_v2  ;;  %v3058_v22 = vmax.f32 %v2930_v30, 0.0 }
 0x380   : > { %v2698_v53 = vpop.f32.mrf.mxu3 }
 0x381   : > { %3347 = vst.msk [vmem:[%s4592_s25 + $0x1f0] sm:$0xf] %vm3222_vm3, %v3218_v57  ;;  %v2831_v41 = vadd.f32 %v2698_v53, %v2343_v12  ;;  %v3186_v38 = vpack.c.bf16 %v3058_v22, %v3058_v22 }
 0x382   : > { %v2618_v33 = vpop.f32.mrf.mxu2  ;;  %v1416_v54 = vpop.f32.mrf.mxu0 }
 0x383   : > { %v2963_v50 = vadd.f32 %v5315_v21, %v2831_v41  ;;  %3315 = vst.msk [vmem:[%s4592_s25 + $0x170] sm:$0xf] %vm3222_vm3, %v3186_v38  ;;  %v2799_v36 = vadd.f32 %v2618_v33, %v2263_v52  ;;  %v2265_v63 = vpop.f32.mrf.mxu1 }
 0x384   : > { %v2266_v9 = vadd.f32 %v2265_v63, %v1416_v54 }
 0x385   : > { %v3091_v8 = vmax.f32 %v2963_v50, 0.0  ;;  %v2931_v20 = vadd.f32 %v5315_v21, %v2799_v36 }
 0x387   : > { %v3219_v43 = vpack.c.bf16 %v3091_v8, %v3091_v8  ;;  %v3059_v29 = vmax.f32 %v2931_v20, 0.0 }
 0x388   : > { %v2701_v7 = vpop.f32.mrf.mxu3 }
 0x389   : > { %3348 = vst.msk [vmem:[%s4592_s25 + $0x1f4] sm:$0xf] %vm3222_vm3, %v3219_v43  ;;  %v2832_v60 = vadd.f32 %v2701_v7, %v2346_v40  ;;  %v3187_v32 = vpack.c.bf16 %v3059_v29, %v3059_v29 }
 0x38a   : > { %v2621_v10 = vpop.f32.mrf.mxu2  ;;  %v1418_v34 = vpop.f32.mrf.mxu0 }
 0x38b   : > { %v2964_v39 = vadd.f32 %v5315_v21, %v2832_v60  ;;  %3316 = vst.msk [vmem:[%s4592_s25 + $0x174] sm:$0xf] %vm3222_vm3, %v3187_v32  ;;  %v2800_v47 = vadd.f32 %v2621_v10, %v2266_v9  ;;  %v2267_v42 = vpop.f32.mrf.mxu1 }
 0x38c   : > { %v2268_v24 = vadd.f32 %v2267_v42, %v1418_v34 }
 0x38d   : > { %v3092_v17 = vmax.f32 %v2964_v39, 0.0  ;;  %v2932_v28 = vadd.f32 %v5315_v21, %v2800_v47 }
 0x38f   : > { %v3220_v4 = vpack.c.bf16 %v3092_v17, %v3092_v17  ;;  %v3060_v46 = vmax.f32 %v2932_v28, 0.0 }
 0x390   : > { %v2703_v44 = vpop.f32.mrf.mxu3 }
 0x391   : > { %3349 = vst.msk [vmem:[%s4592_s25 + $0x1f8] sm:$0xf] %vm3222_vm3, %v3220_v4  ;;  %v2833_v26 = vadd.f32 %v2703_v44, %v2348_v19  ;;  %v3188_v56 = vpack.c.bf16 %v3060_v46, %v3060_v46 }
 0x392   : > { %v2623_v27 = vpop.f32.mrf.mxu2 }
 0x393   : > { %v2965_v6 = vadd.f32 %v5315_v21, %v2833_v26  ;;  %3317 = vst.msk [vmem:[%s4592_s25 + $0x178] sm:$0xf] %vm3222_vm3, %v3188_v56  ;;  %v2801_v14 = vadd.f32 %v2623_v27, %v2268_v24 }
 0x395   : > { %v3093_v55 = vmax.f32 %v2965_v6, 0.0  ;;  %v2933_v62 = vadd.f32 %v5315_v21, %v2801_v14 }
 0x397   : > { %v3221_v49 = vpack.c.bf16 %v3093_v55, %v3093_v55  ;;  %v3061_v25 = vmax.f32 %v2933_v62, 0.0 }
 0x399   : > { %3350 = vst.msk [vmem:[%s4592_s25 + $0x1fc] sm:$0xf] %vm3222_vm3, %v3221_v49  ;;  %v3189_v13 = vpack.c.bf16 %v3061_v25, %v3061_v25 }
 0x39b   : > { %3318 = vst.msk [vmem:[%s4592_s25 + $0x17c] sm:$0xf] %vm3222_vm3, %v3189_v13 }
 0x39c PF: > { %s15_s20 = sadd.s32 1, %s4425_s20   ;;  %s5590_s18 = smov %s4421_s19 }
 0x39d   : > { %p12_p5 = scmp.ge.s32.totalorder %s15_s20, 4   ;;  %s5591_s19 = smov %s5593_s21 }
 0x39f   :  { %14 = sbr.rel (!%p12_p5) target bundleno = 2 (0x2), region = 78 }

// kernel: drnseg_inference_forward.6
= control target key start
LH: loop header
LB: loop body
LE: loop exit
PB: predicated region body
PF: predicated region fallthrough
CT: control target
= control target key end

     0   :  { %s1670_s18 = smov 0   ;;  %s1672_s19 = smov 0   ;;  %s1982_s0 = inlined_call_operand.vmem [shape: bf16[2,17,16,24], index: 0, kind: input, shape index: {}, may-alias: {0,1}]   ;;  %s1983_s1 = inlined_call_operand.vmem [shape: bf16[2,17,16,24], index: 1, kind: input, shape index: {}, may-alias: {0,1}]   ;;  %s1984_s2 = inlined_call_operand.vmem [shape: bf16[2,16,16,24], index: 2, kind: input, shape index: {}]   ;;  %s1985_s3 = inlined_call_operand.vmem [shape: bf16[3,24,16], index: 3, kind: input, shape index: {}]   ;;  %s1986_s4 = inlined_call_operand.vmem [shape: f32[1,16], index: 4, kind: input, shape index: {}]   ;;  %s1987_s5 = inlined_call_operand.vmem [shape: bf16[2,16,16,16], index: 5, kind: output, shape index: {}]  }
   0x1   :  { %s1674_s20 = smov 0  }
   0x2 LB: > { %s27_s21 = sadd.s32 1, %s1634_s19  ;;  %p1335_p0 = scmp.ge.s32.totalorder %s1638_s20, 1  ;;  %s1638_s20 = sphi %s1674_s20, %s15_s20   ;;  %s1634_s19 = sphi %s1672_s19, %s1989_s19   ;;  %s1630_s18 = sphi %s1670_s18, %s1988_s18  }
   0x3   : > { %p29_p1 = scmp.ge.s32.totalorder %s27_s21, 2  ;;  %p261_p2 = scmp.lt.s32.totalorder %s1638_s20, 3 }
   0x5   : > { %s1991_s21 = smov (%p29_p1, %s27_s21), 0  ;;  %p262_p3 = pnand %p1335_p0, %p261_p2 }
   0x6   : > { %p331_p4 = scmp.lt.s32.totalorder (!%p262_p3), %s1630_s18, 1 }
   0x7   : > { %265 = sbr.rel (%p262_p3) target bundleno = 352 (0x160), region = 40 }
   0xc   : > { %v1344_v0 = vld [vmem:[%s1985_s3 + $0x14] sm:$0xf]  ;;  %v450_v1 = vld [vmem:[%s1985_s3 + $0x8] sm:$0xf]  ;;  %v1515_v4 = vld [vmem:[%s1985_s3 + $0x20] sm:$0xf] }
   0xd   : > { %v540_v2 = vunpack.c.l.b16 %v1344_v0  ;;  %v771_v3 = vunpack.c.l.b16 %v450_v1  ;;  %vm593_vm0 = vcmask 1043456   ;;  %v929_v5 = vunpack.c.l.b16 %v1515_v4  ;;  %s1993_s18 = smov (!%p331_p4, %s1630_s18), 1  ;;  %v1580_v12 = vld [vmem:[%s1985_s3 + $0xc] sm:$0xff]  ;;  %v1579_v13 = vld [vmem:[%s1985_s3] sm:$0xff]  ;;  %v1581_v14 = vld [vmem:[%s1985_s3 + $0x18] sm:$0xff] }
   0xe   : > { %s1544_s28 = sshll.u32 %s1993_s18, 7  ;;  %s1588_s13 = smul.u32 136, %s1993_s18  ;;  %vm544_vm1 = vcmask 195584   ;;  %v1798_v46 = vld [vmem:[%s1986_s4] ss:$0 sm:$0xff]  ;;  %vm1160_vm2 = vcmask 125952  }
   0xf   : > { %v542_v6 = vpack.c.b16 %v540_v2, %v540_v2  ;;  %v773_v7 = vpack.c.b16 %v771_v3, %v771_v3  ;;  %v931_v8 = vpack.c.b16 %v929_v5, %v929_v5  ;;  %s1708_s8 = scalar_lea.vmem %s1984_s2, %s1544_s28  ;;  %s1806_s25 = scalar_lea.vmem %s1987_s5, %s1544_s28 }
  0x10   : > { %v1562_v15 = vld [vmem:[%s1708_s8] sm:$0xff]  ;;  %s1724_s16 = scalar_lea.vmem %s1982_s0, %s1588_s13  ;;  %v1563_v19 = vld [vmem:[%s1708_s8 + $0x8] sm:$0xff]  ;;  %v1564_v22 = vld [vmem:[%s1708_s8 + $0x10] sm:$0xff]  ;;  %s1543_s26 = sadd.s32 128, %s1588_s13 }
  0x11   : > { %v595_v9 = vsel %vm593_vm0, %v542_v6, 0  ;;  %v824_v10 = vsel %vm593_vm0, %v773_v7, 0  ;;  %v937_v11 = vsel %vm593_vm0, %v931_v8, 0  ;;  %v1574_v16 = vld [vmem:[%s1708_s8 + $0x60] sm:$0xff]  ;;  %v1547_v18 = vld [vmem:[%s1724_s16 + $0x8] sm:$0xff]  ;;  %v1548_v21 = vld [vmem:[%s1724_s16 + $0x10] sm:$0xff]  ;;  %s356_s29 = scalar_lea.vmem %s1983_s1, %s1543_s26 }
  0x12   : > { %603 = vmatpush.bf16.msra.mxu0 %v595_v9  ;;  %1582 = vmatpush.bf16.msra.mxu3 %v595_v9  ;;  %v1546_v17 = vld [vmem:[%s1724_s16] sm:$0xff]  ;;  %v1575_v20 = vld [vmem:[%s1708_s8 + $0x68] sm:$0xff]  ;;  %v1576_v23 = vld [vmem:[%s1708_s8 + $0x70] sm:$0xff] }
  0x13   : > { %832 = vmatpush.bf16.msra.mxu1 %v824_v10  ;;  %945 = vmatpush.bf16.msra.mxu2 %v937_v11  ;;  %v1549_v24 = vld [vmem:[%s1724_s16 + $0x18] sm:$0xff]  ;;  %v1550_v27 = vld [vmem:[%s1724_s16 + $0x20] sm:$0xff]  ;;  %v1551_v30 = vld [vmem:[%s1724_s16 + $0x28] sm:$0xff] }
  0x14   : > { %v1565_v25 = vld [vmem:[%s1708_s8 + $0x18] sm:$0xff]  ;;  %v1566_v28 = vld [vmem:[%s1708_s8 + $0x20] sm:$0xff]  ;;  %v1567_v31 = vld [vmem:[%s1708_s8 + $0x28] sm:$0xff] }
  0x15   : > { %v1577_v26 = vld [vmem:[%s1708_s8 + $0x78] sm:$0xff]  ;;  %v1755_v29 = vld [vmem:[%s1724_s16 + $0x60] sm:$0xff]  ;;  %v1559_v32 = vld [vmem:[%s1724_s16 + $0x68] sm:$0xff] }
  0x16   : > { %604 = vmatpush.bf16.msra.mxu0 %v1580_v12  ;;  %1583 = vmatpush.bf16.msra.mxu3 %v1580_v12  ;;  %v1552_v33 = vld [vmem:[%s1724_s16 + $0x30] sm:$0xff]  ;;  %v1553_v36 = vld [vmem:[%s1724_s16 + $0x38] sm:$0xff]  ;;  %v1554_v39 = vld [vmem:[%s1724_s16 + $0x40] sm:$0xff] }
  0x17   : > { %833 = vmatpush.bf16.msra.mxu1 %v1579_v13  ;;  %946 = vmatpush.bf16.msra.mxu2 %v1581_v14  ;;  %v1568_v34 = vld [vmem:[%s1708_s8 + $0x30] sm:$0xff]  ;;  %v1569_v37 = vld [vmem:[%s1708_s8 + $0x38] sm:$0xff]  ;;  %v1570_v40 = vld [vmem:[%s1708_s8 + $0x40] sm:$0xff] }
  0x18   : > { %v1560_v35 = vld [vmem:[%s1724_s16 + $0x70] sm:$0xff]  ;;  %v1779_v38 = vld [vmem:[%s1724_s16 + $0x78] sm:$0xff]  ;;  %v1555_v42 = vld [vmem:[%s1724_s16 + $0x48] sm:$0xff] }
  0x19   : > { %1413 = vmatmul.msk.bf16.vlgmr.msra.gmra.mxu0 %vm544_vm1, %v1562_v15  ;;  %1425 = vmatmul.msk.bf16.vlgmr.msra.gmra.mxu3 %vm544_vm1, %v1574_v16  ;;  %v1571_v57 = vld [vmem:[%s1708_s8 + $0x48] sm:$0xff]  ;;  %v1556_v60 = vld [vmem:[%s1724_s16 + $0x50] sm:$0xff]  ;;  %v1557_v16 = vld [vmem:[%s1724_s16 + $0x58] sm:$0xff] }
  0x1a   : > { %1584 = vmatpush.bf16.msrb.mxu3 %v824_v10  ;;  %1497 = vmatmul.msk.bf16.vlgmr.msra.gmra.mxu1 %vm544_vm1, %v1546_v17 }
  0x1b   : > { %1524 = vmatmul.msk.bf16.vlgmr.msra.gmra.mxu2 %vm544_vm1, %v1547_v18 }
  0x1e   : > { %1585 = vmatpush.bf16.msrb.mxu3 %v1579_v13  ;;  %v1572_v13 = vld [vmem:[%s1708_s8 + $0x50] sm:$0xff] }
  0x22   : > { %1586 = vmatpush.bf16.msra.mxu3 %v937_v11 }
  0x26   : > { %1587 = vmatpush.bf16.msra.mxu3 %v1581_v14 }
  0x29   : > { %1414 = vmatmul.msk.bf16.gmra.mxu0 %vm544_vm1, %v1563_v19  ;;  %1426 = vmatmul.msk.bf16.gmra.mxu3 %vm544_vm1, %v1575_v20 }
  0x2a   : > { %1498 = vmatmul.msk.bf16.gmra.mxu1 %vm544_vm1, %v1547_v18 }
  0x2b   : > { %1525 = vmatmul.msk.bf16.gmra.mxu2 %vm544_vm1, %v1548_v21 }
  0x39   : > { %1415 = vmatmul.msk.bf16.gmra.mxu0 %vm544_vm1, %v1564_v22  ;;  %1427 = vmatmul.msk.bf16.gmra.mxu3 %vm544_vm1, %v1576_v23 }
  0x3a   : > { %1499 = vmatmul.msk.bf16.gmra.mxu1 %vm544_vm1, %v1548_v21 }
  0x3b   : > { %1526 = vmatmul.msk.bf16.gmra.mxu2 %vm544_vm1, %v1549_v24 }
  0x49   : > { %1416 = vmatmul.msk.bf16.gmra.mxu0 %vm544_vm1, %v1565_v25  ;;  %1428 = vmatmul.msk.bf16.gmra.mxu3 %vm544_vm1, %v1577_v26 }
  0x4a   : > { %1500 = vmatmul.msk.bf16.gmra.mxu1 %vm544_vm1, %v1549_v24 }
  0x4b   : > { %1527 = vmatmul.msk.bf16.gmra.mxu2 %vm544_vm1, %v1550_v27 }
  0x59   : > { %1417 = vmatmul.msk.bf16.gmra.mxu0 %vm544_vm1, %v1566_v28  ;;  %1509 = vmatmul.msk.bf16.vlgmr.msrb.gmra.mxu3 %vm544_vm1, %v1755_v29 }
  0x5a   : > { %1501 = vmatmul.msk.bf16.gmra.mxu1 %vm544_vm1, %v1550_v27 }
  0x5b   : > { %1528 = vmatmul.msk.bf16.gmra.mxu2 %vm544_vm1, %v1551_v30 }
  0x69   : > { %1418 = vmatmul.msk.bf16.gmra.mxu0 %vm544_vm1, %v1567_v31  ;;  %1510 = vmatmul.msk.bf16.gmra.mxu3 %vm544_vm1, %v1559_v32 }
  0x6a   : > { %1502 = vmatmul.msk.bf16.gmra.mxu1 %vm544_vm1, %v1551_v30 }
  0x6b   : > { %1529 = vmatmul.msk.bf16.gmra.mxu2 %vm544_vm1, %v1552_v33 }
  0x79   : > { %1419 = vmatmul.msk.bf16.gmra.mxu0 %vm544_vm1, %v1568_v34  ;;  %1511 = vmatmul.msk.bf16.gmra.mxu3 %vm544_vm1, %v1560_v35  ;;  %v1573_v34 = vld [vmem:[%s1708_s8 + $0x58] sm:$0xff] }
  0x7a   : > { %1503 = vmatmul.msk.bf16.gmra.mxu1 %vm544_vm1, %v1552_v33 }
  0x7b   : > { %1530 = vmatmul.msk.bf16.gmra.mxu2 %vm544_vm1, %v1553_v36 }
  0x89   : > { %1420 = vmatmul.msk.bf16.gmra.mxu0 %vm544_vm1, %v1569_v37  ;;  %1512 = vmatmul.msk.bf16.gmra.mxu3 %vm544_vm1, %v1779_v38 }
  0x8a   : > { %1504 = vmatmul.msk.bf16.gmra.mxu1 %vm544_vm1, %v1553_v36 }
  0x8b   : > { %1531 = vmatmul.msk.bf16.gmra.mxu2 %vm544_vm1, %v1554_v39 }
  0x96   : > { %v606_v41 = vpop.f32.mrf.mxu0 }
  0x97   : > { %v835_v43 = vpop.f32.mrf.mxu1 }
  0x98   : > { %v836_v44 = vadd.f32 %v835_v43, %v606_v41 }
  0x99   : > { %1421 = vmatmul.msk.bf16.gmra.mxu0 %vm544_vm1, %v1570_v40  ;;  %1536 = vmatmul.msk.bf16.vlgmr.msra.gmra.mxu3 %vm544_vm1, %v1559_v32 }
  0x9a   : > { %1505 = vmatmul.msk.bf16.gmra.mxu1 %vm544_vm1, %v1554_v39 }
  0x9b   : > { %1532 = vmatmul.msk.bf16.gmra.mxu2 %vm544_vm1, %v1555_v42 }
  0x9c   : > { %v1793_v45 = vpop.f32.mrf.mxu3 }
  0x9e   : > { %v948_v47 = vpop.f32.mrf.mxu2  ;;  %v608_v49 = vpop.f32.mrf.mxu0 }
  0x9f   : > { %v1028_v48 = vadd.f32 %v948_v47, %v836_v44  ;;  %v837_v50 = vpop.f32.mrf.mxu1 }
  0xa0   : > { %v838_v54 = vadd.f32 %v837_v50, %v608_v49 }
  0xa1   : > { %v1064_v51 = vadd.f32 %v1798_v46, %v1028_v48 }
  0xa3   : > { %v1096_v52 = vmax.f32 %v1064_v51, 0.0 }
  0xa4   : > { %v1808_v55 = vpop.f32.mrf.mxu3 }
  0xa5   : > { %v1128_v53 = vpack.c.bf16 %v1096_v52, %v1096_v52 }
  0xa6   : > { %v950_v56 = vpop.f32.mrf.mxu2  ;;  %v611_v59 = vpop.f32.mrf.mxu0 }
  0xa7   : > { %1161 = vst.msk [vmem:[%s1806_s25] sm:$0xf] %vm1160_vm2, %v1128_v53  ;;  %v1029_v58 = vadd.f32 %v950_v56, %v838_v54  ;;  %v840_v61 = vpop.f32.mrf.mxu1 }
  0xa8   : > { %v841_v0 = vadd.f32 %v840_v61, %v611_v59 }
  0xa9   : > { %v1065_v62 = vadd.f32 %v1798_v46, %v1029_v58  ;;  %1422 = vmatmul.msk.bf16.gmra.mxu0 %vm544_vm1, %v1571_v57  ;;  %1537 = vmatmul.msk.bf16.gmra.mxu3 %vm544_vm1, %v1560_v35  ;;  %v1578_v35 = vld [vmem:[%s356_s29] sm:$0xff] }
  0xaa   : > { %1506 = vmatmul.msk.bf16.gmra.mxu1 %vm544_vm1, %v1555_v42 }
  0xab   : > { %v1097_v63 = vmax.f32 %v1065_v62, 0.0  ;;  %1533 = vmatmul.msk.bf16.gmra.mxu2 %vm544_vm1, %v1556_v60 }
  0xac   : > { %v1819_v2 = vpop.f32.mrf.mxu3 }
  0xad   : > { %v1129_v1 = vpack.c.bf16 %v1097_v63, %v1097_v63 }
  0xae   : > { %v953_v3 = vpop.f32.mrf.mxu2  ;;  %v613_v5 = vpop.f32.mrf.mxu0 }
  0xaf   : > { %1162 = vst.msk [vmem:[%s1806_s25 + $0x4] sm:$0xf] %vm1160_vm2, %v1129_v1  ;;  %v1030_v4 = vadd.f32 %v953_v3, %v841_v0  ;;  %v842_v6 = vpop.f32.mrf.mxu1 }
  0xb0   : > { %v843_v10 = vadd.f32 %v842_v6, %v613_v5 }
  0xb1   : > { %v1066_v7 = vadd.f32 %v1798_v46, %v1030_v4 }
  0xb3   : > { %v1098_v8 = vmax.f32 %v1066_v7, 0.0 }
  0xb4   : > { %v1824_v11 = vpop.f32.mrf.mxu3 }
  0xb5   : > { %v1130_v9 = vpack.c.bf16 %v1098_v8, %v1098_v8 }
  0xb6   : > { %v955_v12 = vpop.f32.mrf.mxu2  ;;  %v616_v15 = vpop.f32.mrf.mxu0 }
  0xb7   : > { %1163 = vst.msk [vmem:[%s1806_s25 + $0x8] sm:$0xf] %vm1160_vm2, %v1130_v9  ;;  %v1031_v14 = vadd.f32 %v955_v12, %v843_v10  ;;  %v845_v17 = vpop.f32.mrf.mxu1 }
  0xb8   : > { %v846_v20 = vadd.f32 %v845_v17, %v616_v15 }
  0xb9   : > { %v1067_v18 = vadd.f32 %v1798_v46, %v1031_v14  ;;  %1423 = vmatmul.msk.bf16.gmra.mxu0 %vm544_vm1, %v1572_v13  ;;  %1538 = vmatmul.msk.bf16.gmra.mxu3 %vm544_vm1, %v1779_v38 }
  0xba   : > { %1507 = vmatmul.msk.bf16.gmra.mxu1 %vm544_vm1, %v1556_v60 }
  0xbb   : > { %v1099_v19 = vmax.f32 %v1067_v18, 0.0  ;;  %1534 = vmatmul.msk.bf16.gmra.mxu2 %vm544_vm1, %v1557_v16 }
  0xbc   : > { %v1836_v22 = vpop.f32.mrf.mxu3 }
  0xbd   : > { %v1131_v21 = vpack.c.bf16 %v1099_v19, %v1099_v19 }
  0xbe   : > { %v958_v23 = vpop.f32.mrf.mxu2  ;;  %v618_v25 = vpop.f32.mrf.mxu0 }
  0xbf   : > { %1164 = vst.msk [vmem:[%s1806_s25 + $0xc] sm:$0xf] %vm1160_vm2, %v1131_v21  ;;  %v1032_v24 = vadd.f32 %v958_v23, %v846_v20  ;;  %v847_v26 = vpop.f32.mrf.mxu1 }
  0xc0   : > { %v848_v31 = vadd.f32 %v847_v26, %v618_v25 }
  0xc1   : > { %v1068_v27 = vadd.f32 %v1798_v46, %v1032_v24 }
  0xc3   : > { %v1100_v28 = vmax.f32 %v1068_v27, 0.0 }
  0xc4   : > { %v1846_v32 = vpop.f32.mrf.mxu3 }
  0xc5   : > { %v1132_v30 = vpack.c.bf16 %v1100_v28, %v1100_v28 }
  0xc6   : > { %v960_v33 = vpop.f32.mrf.mxu2  ;;  %v621_v37 = vpop.f32.mrf.mxu0 }
  0xc7   : > { %1165 = vst.msk [vmem:[%s1806_s25 + $0x10] sm:$0xf] %vm1160_vm2, %v1132_v30  ;;  %v1033_v36 = vadd.f32 %v960_v33, %v848_v31  ;;  %v850_v38 = vpop.f32.mrf.mxu1 }
  0xc8   : > { %v851_v41 = vadd.f32 %v850_v38, %v621_v37 }
  0xc9   : > { %v1069_v39 = vadd.f32 %v1798_v46, %v1033_v36  ;;  %1424 = vmatmul.msk.bf16.gmra.mxu0 %vm544_vm1, %v1573_v34  ;;  %1539 = vmatmul.msk.bf16.gmra.mxu3 %vm544_vm1, %v1578_v35 }
  0xca   : > { %1508 = vmatmul.msk.bf16.gmra.mxu1 %vm544_vm1, %v1557_v16 }
  0xcb   : > { %v1101_v40 = vmax.f32 %v1069_v39, 0.0  ;;  %1535 = vmatmul.msk.bf16.gmra.mxu2 %vm544_vm1, %v1755_v29 }
  0xcc   : > { %v1857_v43 = vpop.f32.mrf.mxu3 }
  0xcd   : > { %v1133_v42 = vpack.c.bf16 %v1101_v40, %v1101_v40 }
  0xce   : > { %v963_v44 = vpop.f32.mrf.mxu2  ;;  %v623_v48 = vpop.f32.mrf.mxu0 }
  0xcf   : > { %1166 = vst.msk [vmem:[%s1806_s25 + $0x14] sm:$0xf] %vm1160_vm2, %v1133_v42  ;;  %v1034_v47 = vadd.f32 %v963_v44, %v851_v41  ;;  %v852_v49 = vpop.f32.mrf.mxu1 }
  0xd0   : > { %v853_v53 = vadd.f32 %v852_v49, %v623_v48 }
  0xd1   : > { %v1070_v50 = vadd.f32 %v1798_v46, %v1034_v47 }
  0xd3   : > { %v1102_v51 = vmax.f32 %v1070_v50, 0.0 }
  0xd4   : > { %v1862_v54 = vpop.f32.mrf.mxu3 }
  0xd5   : > { %v1134_v52 = vpack.c.bf16 %v1102_v51, %v1102_v51 }
  0xd6   : > { %v965_v56 = vpop.f32.mrf.mxu2  ;;  %v626_v57 = vpop.f32.mrf.mxu0 }
  0xd7   : > { %1167 = vst.msk [vmem:[%s1806_s25 + $0x18] sm:$0xf] %vm1160_vm2, %v1134_v52  ;;  %v1035_v29 = vadd.f32 %v965_v56, %v853_v53  ;;  %v855_v58 = vpop.f32.mrf.mxu1 }
  0xd8   : > { %v856_v61 = vadd.f32 %v855_v58, %v626_v57 }
  0xd9   : > { %v1071_v59 = vadd.f32 %v1798_v46, %v1035_v29 }
  0xdb   : > { %v1103_v60 = vmax.f32 %v1071_v59, 0.0 }
  0xdc   : > { %v1867_v63 = vpop.f32.mrf.mxu3 }
  0xdd   : > { %v1135_v62 = vpack.c.bf16 %v1103_v60, %v1103_v60 }
  0xde   : > { %v968_v0 = vpop.f32.mrf.mxu2  ;;  %v628_v3 = vpop.f32.mrf.mxu0 }
  0xdf   : > { %1168 = vst.msk [vmem:[%s1806_s25 + $0x1c] sm:$0xf] %vm1160_vm2, %v1135_v62  ;;  %v1036_v1 = vadd.f32 %v968_v0, %v856_v61  ;;  %v857_v4 = vpop.f32.mrf.mxu1 }
  0xe0   : > { %v858_v8 = vadd.f32 %v857_v4, %v628_v3 }
  0xe1   : > { %v1072_v5 = vadd.f32 %v1798_v46, %v1036_v1 }
  0xe3   : > { %v1104_v6 = vmax.f32 %v1072_v5, 0.0 }
  0xe4   : > { %v1872_v9 = vpop.f32.mrf.mxu3 }
  0xe5   : > { %v1136_v7 = vpack.c.bf16 %v1104_v6, %v1104_v6 }
  0xe6   : > { %v970_v10 = vpop.f32.mrf.mxu2  ;;  %v631_v13 = vpop.f32.mrf.mxu0 }
  0xe7   : > { %1169 = vst.msk [vmem:[%s1806_s25 + $0x20] sm:$0xf] %vm1160_vm2, %v1136_v7  ;;  %v1037_v12 = vadd.f32 %v970_v10, %v858_v8  ;;  %v860_v14 = vpop.f32.mrf.mxu1 }
  0xe8   : > { %v861_v17 = vadd.f32 %v860_v14, %v631_v13 }
  0xe9   : > { %v1073_v15 = vadd.f32 %v1798_v46, %v1037_v12 }
  0xeb   : > { %v1105_v16 = vmax.f32 %v1073_v15, 0.0 }
  0xec   : > { %v1877_v19 = vpop.f32.mrf.mxu3 }
  0xed   : > { %v1137_v18 = vpack.c.bf16 %v1105_v16, %v1105_v16 }
  0xee   : > { %v973_v20 = vpop.f32.mrf.mxu2  ;;  %v633_v23 = vpop.f32.mrf.mxu0 }
  0xef   : > { %1170 = vst.msk [vmem:[%s1806_s25 + $0x24] sm:$0xf] %vm1160_vm2, %v1137_v18  ;;  %v1038_v21 = vadd.f32 %v973_v20, %v861_v17  ;;  %v862_v24 = vpop.f32.mrf.mxu1  ;;  %v896_v20 = vadd.f32 %v1867_v63, %v1793_v45  ;;  %v898_v45 = vadd.f32 %v1872_v9, %v1808_v55 }
  0xf0   : > { %v863_v28 = vadd.f32 %v862_v24, %v633_v23 }
  0xf1   : > { %v1074_v25 = vadd.f32 %v1798_v46, %v1038_v21 }
  0xf3   : > { %v1106_v26 = vmax.f32 %v1074_v25, 0.0 }
  0xf4   : > { %v1882_v30 = vpop.f32.mrf.mxu3 }
  0xf5   : > { %v1138_v27 = vpack.c.bf16 %v1106_v26, %v1106_v26 }
  0xf6   : > { %v975_v31 = vpop.f32.mrf.mxu2  ;;  %v636_v34 = vpop.f32.mrf.mxu0 }
  0xf7   : > { %1171 = vst.msk [vmem:[%s1806_s25 + $0x28] sm:$0xf] %vm1160_vm2, %v1138_v27  ;;  %v1039_v33 = vadd.f32 %v975_v31, %v863_v28  ;;  %v865_v35 = vpop.f32.mrf.mxu1 }
  0xf8   : > { %v866_v38 = vadd.f32 %v865_v35, %v636_v34 }
  0xf9   : > { %v1075_v36 = vadd.f32 %v1798_v46, %v1039_v33 }
  0xfb   : > { %v1107_v37 = vmax.f32 %v1075_v36, 0.0 }
  0xfc   : > { %v1887_v40 = vpop.f32.mrf.mxu3 }
  0xfd   : > { %v1139_v39 = vpack.c.bf16 %v1107_v37, %v1107_v37 }
  0xfe   : > { %v978_v41 = vpop.f32.mrf.mxu2  ;;  %v638_v44 = vpop.f32.mrf.mxu0 }
  0xff   : > { %1172 = vst.msk [vmem:[%s1806_s25 + $0x2c] sm:$0xf] %vm1160_vm2, %v1139_v39  ;;  %v1040_v42 = vadd.f32 %v978_v41, %v866_v38  ;;  %v867_v47 = vpop.f32.mrf.mxu1 }
 0x100   : > { %v868_v51 = vadd.f32 %v867_v47, %v638_v44 }
 0x101   : > { %v1076_v48 = vadd.f32 %v1798_v46, %v1040_v42 }
 0x103   : > { %v1108_v49 = vmax.f32 %v1076_v48, 0.0 }
 0x104   : > { %v1892_v52 = vpop.f32.mrf.mxu3 }
 0x105   : > { %v1140_v50 = vpack.c.bf16 %v1108_v49, %v1108_v49 }
 0x106   : > { %v980_v53 = vpop.f32.mrf.mxu2  ;;  %v641_v29 = vpop.f32.mrf.mxu0 }
 0x107   : > { %1173 = vst.msk [vmem:[%s1806_s25 + $0x30] sm:$0xf] %vm1160_vm2, %v1140_v50  ;;  %v1041_v56 = vadd.f32 %v980_v53, %v868_v51  ;;  %v870_v57 = vpop.f32.mrf.mxu1  ;;  %v901_v51 = vadd.f32 %v1877_v19, %v1819_v2  ;;  %v903_v19 = vadd.f32 %v1882_v30, %v1824_v11 }
 0x108   : > { %v871_v60 = vadd.f32 %v870_v57, %v641_v29 }
 0x109   : > { %v1077_v58 = vadd.f32 %v1798_v46, %v1041_v56 }
 0x10b   : > { %v1109_v59 = vmax.f32 %v1077_v58, 0.0 }
 0x10c   : > { %v1897_v62 = vpop.f32.mrf.mxu3 }
 0x10d   : > { %v1141_v61 = vpack.c.bf16 %v1109_v59, %v1109_v59 }
 0x10e   : > { %v983_v0 = vpop.f32.mrf.mxu2  ;;  %v643_v3 = vpop.f32.mrf.mxu0 }
 0x10f   : > { %1174 = vst.msk [vmem:[%s1806_s25 + $0x34] sm:$0xf] %vm1160_vm2, %v1141_v61  ;;  %v1042_v1 = vadd.f32 %v983_v0, %v871_v60  ;;  %v872_v4 = vpop.f32.mrf.mxu1 }
 0x110   : > { %v873_v8 = vadd.f32 %v872_v4, %v643_v3 }
 0x111   : > { %v1078_v5 = vadd.f32 %v1798_v46, %v1042_v1 }
 0x113   : > { %v1110_v6 = vmax.f32 %v1078_v5, 0.0 }
 0x114   : > { %v1902_v10 = vpop.f32.mrf.mxu3 }
 0x115   : > { %v1142_v7 = vpack.c.bf16 %v1110_v6, %v1110_v6 }
 0x116   : > { %v985_v12 = vpop.f32.mrf.mxu2  ;;  %v646_v14 = vpop.f32.mrf.mxu0 }
 0x117   : > { %1175 = vst.msk [vmem:[%s1806_s25 + $0x38] sm:$0xf] %vm1160_vm2, %v1142_v7  ;;  %v1043_v13 = vadd.f32 %v985_v12, %v873_v8  ;;  %v875_v15 = vpop.f32.mrf.mxu1 }
 0x118   : > { %v876_v18 = vadd.f32 %v875_v15, %v646_v14 }
 0x119   : > { %v1079_v16 = vadd.f32 %v1798_v46, %v1043_v13 }
 0x11b   : > { %v1111_v17 = vmax.f32 %v1079_v16, 0.0 }
 0x11c   : > { %v1008_v23 = vpop.f32.mrf.mxu3 }
 0x11d   : > { %v1143_v21 = vpack.c.bf16 %v1111_v17, %v1111_v17  ;;  %v1052_v25 = vadd.f32 %v1008_v23, %v896_v20  ;;  %v906_v20 = vadd.f32 %v1887_v40, %v1836_v22  ;;  %v908_v40 = vadd.f32 %v1892_v52, %v1846_v32 }
 0x11e   : > { %v988_v24 = vpop.f32.mrf.mxu2  ;;  %v648_v27 = vpop.f32.mrf.mxu0 }
 0x11f   : > { %1176 = vst.msk [vmem:[%s1806_s25 + $0x3c] sm:$0xf] %vm1160_vm2, %v1143_v21  ;;  %v1044_v26 = vadd.f32 %v988_v24, %v876_v18  ;;  %v1088_v28 = vadd.f32 %v1798_v46, %v1052_v25  ;;  %v877_v31 = vpop.f32.mrf.mxu1 }
 0x120   : > { %v878_v37 = vadd.f32 %v877_v31, %v648_v27 }
 0x121   : > { %v1080_v33 = vadd.f32 %v1798_v46, %v1044_v26  ;;  %v1120_v34 = vmax.f32 %v1088_v28, 0.0 }
 0x123   : > { %v1112_v35 = vmax.f32 %v1080_v33, 0.0  ;;  %v1152_v63 = vpack.c.bf16 %v1120_v34, %v1120_v34 }
 0x124   : > { %v1010_v38 = vpop.f32.mrf.mxu3 }
 0x125   : > { %v1144_v36 = vpack.c.bf16 %v1112_v35, %v1112_v35  ;;  %1185 = vst.msk [vmem:[%s1806_s25 + $0x60] sm:$0xf] %vm1160_vm2, %v1152_v63  ;;  %v1053_v41 = vadd.f32 %v1010_v38, %v898_v45 }
 0x126   : > { %v990_v39 = vpop.f32.mrf.mxu2  ;;  %v651_v44 = vpop.f32.mrf.mxu0 }
 0x127   : > { %1177 = vst.msk [vmem:[%s1806_s25 + $0x40] sm:$0xf] %vm1160_vm2, %v1144_v36  ;;  %v1045_v42 = vadd.f32 %v990_v39, %v878_v37  ;;  %v1089_v47 = vadd.f32 %v1798_v46, %v1053_v41  ;;  %v880_v48 = vpop.f32.mrf.mxu1 }
 0x128   : > { %v881_v50 = vadd.f32 %v880_v48, %v651_v44 }
 0x129   : > { %v1081_v49 = vadd.f32 %v1798_v46, %v1045_v42  ;;  %v1121_v55 = vmax.f32 %v1089_v47, 0.0 }
 0x12b   : > { %v1113_v9 = vmax.f32 %v1081_v49, 0.0  ;;  %v1153_v53 = vpack.c.bf16 %v1121_v55, %v1121_v55  ;;  %v911_v55 = vadd.f32 %v1897_v62, %v1857_v43  ;;  %v913_v62 = vadd.f32 %v1902_v10, %v1862_v54 }
 0x12c   : > { %v1013_v29 = vpop.f32.mrf.mxu3 }
 0x12d   : > { %v1145_v56 = vpack.c.bf16 %v1113_v9, %v1113_v9  ;;  %1186 = vst.msk [vmem:[%s1806_s25 + $0x64] sm:$0xf] %vm1160_vm2, %v1153_v53  ;;  %v1054_v58 = vadd.f32 %v1013_v29, %v901_v51 }
 0x12e   : > { %v993_v57 = vpop.f32.mrf.mxu2  ;;  %v653_v60 = vpop.f32.mrf.mxu0 }
 0x12f   : > { %1178 = vst.msk [vmem:[%s1806_s25 + $0x44] sm:$0xf] %vm1160_vm2, %v1145_v56  ;;  %v1046_v59 = vadd.f32 %v993_v57, %v881_v50  ;;  %v1090_v61 = vadd.f32 %v1798_v46, %v1054_v58  ;;  %v882_v0 = vpop.f32.mrf.mxu1 }
 0x130   : > { %v883_v6 = vadd.f32 %v882_v0, %v653_v60 }
 0x131   : > { %v1082_v1 = vadd.f32 %v1798_v46, %v1046_v59  ;;  %v1122_v3 = vmax.f32 %v1090_v61, 0.0 }
 0x133   : > { %v1114_v2 = vmax.f32 %v1082_v1, 0.0  ;;  %v1154_v4 = vpack.c.bf16 %v1122_v3, %v1122_v3 }
 0x134   : > { %v1015_v7 = vpop.f32.mrf.mxu3 }
 0x135   : > { %v1146_v5 = vpack.c.bf16 %v1114_v2, %v1114_v2  ;;  %1187 = vst.msk [vmem:[%s1806_s25 + $0x68] sm:$0xf] %vm1160_vm2, %v1154_v4  ;;  %v1055_v12 = vadd.f32 %v1015_v7, %v903_v19 }
 0x136   : > { %v995_v8 = vpop.f32.mrf.mxu2  ;;  %v656_v14 = vpop.f32.mrf.mxu0 }
 0x137   : > { %1179 = vst.msk [vmem:[%s1806_s25 + $0x48] sm:$0xf] %vm1160_vm2, %v1146_v5  ;;  %v1047_v13 = vadd.f32 %v995_v8, %v883_v6  ;;  %v1091_v15 = vadd.f32 %v1798_v46, %v1055_v12  ;;  %v885_v16 = vpop.f32.mrf.mxu1 }
 0x138   : > { %v886_v18 = vadd.f32 %v885_v16, %v656_v14 }
 0x139   : > { %v1083_v17 = vadd.f32 %v1798_v46, %v1047_v13  ;;  %v1123_v11 = vmax.f32 %v1091_v15, 0.0 }
 0x13b   : > { %v1115_v30 = vmax.f32 %v1083_v17, 0.0  ;;  %v1155_v21 = vpack.c.bf16 %v1123_v11, %v1123_v11 }
 0x13c   : > { %v1018_v24 = vpop.f32.mrf.mxu3 }
 0x13d   : > { %v1147_v23 = vpack.c.bf16 %v1115_v30, %v1115_v30  ;;  %1188 = vst.msk [vmem:[%s1806_s25 + $0x6c] sm:$0xf] %vm1160_vm2, %v1155_v21  ;;  %v1056_v26 = vadd.f32 %v1018_v24, %v906_v20 }
 0x13e   : > { %v998_v25 = vpop.f32.mrf.mxu2  ;;  %v658_v28 = vpop.f32.mrf.mxu0 }
 0x13f   : > { %1180 = vst.msk [vmem:[%s1806_s25 + $0x4c] sm:$0xf] %vm1160_vm2, %v1147_v23  ;;  %v1048_v27 = vadd.f32 %v998_v25, %v886_v18  ;;  %v1092_v31 = vadd.f32 %v1798_v46, %v1056_v26  ;;  %v887_v33 = vpop.f32.mrf.mxu1 }
 0x140   : > { %v888_v36 = vadd.f32 %v887_v33, %v658_v28 }
 0x141   : > { %v1084_v34 = vadd.f32 %v1798_v46, %v1048_v27  ;;  %v1124_v35 = vmax.f32 %v1092_v31, 0.0 }
 0x143   : > { %v1116_v22 = vmax.f32 %v1084_v34, 0.0  ;;  %v1156_v45 = vpack.c.bf16 %v1124_v35, %v1124_v35 }
 0x144   : > { %v1020_v37 = vpop.f32.mrf.mxu3 }
 0x145   : > { %v1148_v63 = vpack.c.bf16 %v1116_v22, %v1116_v22  ;;  %1189 = vst.msk [vmem:[%s1806_s25 + $0x70] sm:$0xf] %vm1160_vm2, %v1156_v45  ;;  %v1057_v39 = vadd.f32 %v1020_v37, %v908_v40 }
 0x146   : > { %v1000_v38 = vpop.f32.mrf.mxu2  ;;  %v661_v44 = vpop.f32.mrf.mxu0 }
 0x147   : > { %1181 = vst.msk [vmem:[%s1806_s25 + $0x50] sm:$0xf] %vm1160_vm2, %v1148_v63  ;;  %v1049_v41 = vadd.f32 %v1000_v38, %v888_v36  ;;  %v1093_v42 = vadd.f32 %v1798_v46, %v1057_v39  ;;  %v890_v47 = vpop.f32.mrf.mxu1 }
 0x148   : > { %v891_v49 = vadd.f32 %v890_v47, %v661_v44 }
 0x149   : > { %v1085_v48 = vadd.f32 %v1798_v46, %v1049_v41  ;;  %v1125_v32 = vmax.f32 %v1093_v42, 0.0 }
 0x14b   : > { %v1117_v52 = vmax.f32 %v1085_v48, 0.0  ;;  %v1157_v9 = vpack.c.bf16 %v1125_v32, %v1125_v32 }
 0x14c   : > { %v1023_v51 = vpop.f32.mrf.mxu3 }
 0x14d   : > { %v1149_v50 = vpack.c.bf16 %v1117_v52, %v1117_v52  ;;  %1190 = vst.msk [vmem:[%s1806_s25 + $0x74] sm:$0xf] %vm1160_vm2, %v1157_v9  ;;  %v1058_v56 = vadd.f32 %v1023_v51, %v911_v55 }
 0x14e   : > { %v1003_v53 = vpop.f32.mrf.mxu2  ;;  %v663_v60 = vpop.f32.mrf.mxu0 }
 0x14f   : > { %1182 = vst.msk [vmem:[%s1806_s25 + $0x54] sm:$0xf] %vm1160_vm2, %v1149_v50  ;;  %v1050_v29 = vadd.f32 %v1003_v53, %v891_v49  ;;  %v1094_v57 = vadd.f32 %v1798_v46, %v1058_v56  ;;  %v892_v61 = vpop.f32.mrf.mxu1 }
 0x150   : > { %v893_v3 = vadd.f32 %v892_v61, %v663_v60 }
 0x151   : > { %v1086_v58 = vadd.f32 %v1798_v46, %v1050_v29  ;;  %v1126_v59 = vmax.f32 %v1094_v57, 0.0 }
 0x153   : > { %v1118_v43 = vmax.f32 %v1086_v58, 0.0  ;;  %v1158_v0 = vpack.c.bf16 %v1126_v59, %v1126_v59 }
 0x154   : > { %v1025_v2 = vpop.f32.mrf.mxu3 }
 0x155   : > { %v1150_v1 = vpack.c.bf16 %v1118_v43, %v1118_v43  ;;  %1191 = vst.msk [vmem:[%s1806_s25 + $0x78] sm:$0xf] %vm1160_vm2, %v1158_v0  ;;  %v1059_v4 = vadd.f32 %v1025_v2, %v913_v62 }
 0x156   : > { %v1005_v19 = vpop.f32.mrf.mxu2 }
 0x157   : > { %1183 = vst.msk [vmem:[%s1806_s25 + $0x58] sm:$0xf] %vm1160_vm2, %v1150_v1  ;;  %v1051_v5 = vadd.f32 %v1005_v19, %v893_v3  ;;  %v1095_v6 = vadd.f32 %v1798_v46, %v1059_v4 }
 0x159   : > { %v1087_v7 = vadd.f32 %v1798_v46, %v1051_v5  ;;  %v1127_v8 = vmax.f32 %v1095_v6, 0.0 }
 0x15b   : > { %v1119_v12 = vmax.f32 %v1087_v7, 0.0  ;;  %v1159_v54 = vpack.c.bf16 %v1127_v8, %v1127_v8 }
 0x15d   : > { %v1151_v10 = vpack.c.bf16 %v1119_v12, %v1119_v12  ;;  %1192 = vst.msk [vmem:[%s1806_s25 + $0x7c] sm:$0xf] %vm1160_vm2, %v1159_v54 }
 0x15f   : > { %1184 = vst.msk [vmem:[%s1806_s25 + $0x5c] sm:$0xf] %vm1160_vm2, %v1151_v10 }
 0x160 PF: > { %s15_s20 = sadd.s32 1, %s1638_s20   ;;  %s1988_s18 = smov %s1634_s19 }
 0x161   : > { %p12_p5 = scmp.ge.s32.totalorder %s15_s20, 4   ;;  %s1989_s19 = smov %s1991_s21 }
 0x163   :  { %14 = sbr.rel (!%p12_p5) target bundleno = 2 (0x2), region = 78 }

// kernel: drnseg_inference_forward.8
= control target key start
LH: loop header
LB: loop body
LE: loop exit
PB: predicated region body
PF: predicated region fallthrough
CT: control target
= control target key end

     0   :  { %s395_s9 = smov 0   ;;  %s397_s10 = smov 0   ;;  %s443_s0 = inlined_call_operand.vmem [shape: f32[2,6,8,8], index: 0, kind: input, shape index: {}]   ;;  %s444_s1 = inlined_call_operand.vmem [shape: f32[8,64], index: 1, kind: input, shape index: {}]   ;;  %s445_s2 = inlined_call_operand.vmem [shape: f32[2,6,8,64], index: 2, kind: output, shape index: {}]  }
   0x1   :  { %s399_s11 = smov 0   ;;  %s401_s12 = smov 0  }
   0x2   :  { %s403_s13 = smov 0  }
   0x3 LB: > { %s21_s14 = sadd.s32 1, %s370_s11  ;;  %s24_s15 = sadd.s32 1, %s374_s12  ;;  %s378_s13 = sphi %s403_s13, %s12_s13   ;;  %s374_s12 = sphi %s401_s12, %s449_s12   ;;  %s370_s11 = sphi %s399_s11, %s448_s11   ;;  %s366_s10 = sphi %s397_s10, %s447_s10   ;;  %s362_s9 = sphi %s395_s9, %s446_s9  }
   0x4   : > { %p22_p0 = scmp.ge.s32.totalorder %s21_s14, 6  ;;  %p293_p1 = scmp.ge.s32.totalorder %s378_s13, 1 }
   0x5   : > { %p131_p2 = scmp.lt.s32.totalorder %s378_s13, 13 }
   0x6   : > { %s451_s14 = smov (%p22_p0, %s21_s14), 0  ;;  %s453_s15 = smov (!%p22_p0, %s24_s15), %s374_s12 }
   0x7   : > { %p132_p3 = pnand %p293_p1, %p131_p2  ;;  %p26_p4 = scmp.ge.s32.totalorder %s453_s15, 2 }
   0x8   : > { %p159_p5 = scmp.lt.s32.totalorder (!%p132_p3), %s366_s10, 1  ;;  %p161_p6 = scmp.lt.s32.totalorder (!%p132_p3), %s362_s9, 5 }
   0x9   : > { %s455_s15 = smov (%p26_p4, %s453_s15), 0  ;;  %135 = sbr.rel (%p132_p3) target bundleno = 148 (0x94), region = 28 }
   0xe   : > { %v176_v0 = vld [vmem:[%s444_s1] sm:$0xff]  ;;  %s457_s10 = smov (!%p159_p5, %s366_s10), 1  ;;  %s459_s9 = smov (!%p161_p6, %s362_s9), 5  ;;  %vm177_vm0 = vcmask 64512   ;;  %vm201_vm1 = vcmask 523264  }
   0xf   : > { %196 = vmatpush.msra.mxu0 %v176_v0  ;;  %s299_s18 = smul.u32 6, %s457_s10 }
  0x11   : > { %s164_s19 = sadd.s32 %s299_s18, %s459_s9 }
  0x12   : > { %s294_s20 = sshll.u32 %s164_s19, 3 }
  0x13   : > { %s166_s23 = scalar_lea.vmem %s443_s0, %s294_s20  ;;  %s174_s26 = scalar_lea.vmem %s445_s2, %s294_s20 }
  0x14   : > { %v175_v1 = vld [vmem:[%s166_s23] sm:$0xff] }
  0x15   : > { %296 = vmatmul.msk.f32.vlgmr.msra.gmra.mxu0 %vm177_vm0, %v175_v1 }
  0x92   : > { %v198_v2 = vpop.f32.mrf.mxu0 }
  0x93   : > { %202 = vst.msk [vmem:[%s174_s26] sm:$0xff] %vm201_vm1, %v198_v2 }
  0x94 PF: > { %s12_s13 = sadd.s32 1, %s378_s13   ;;  %s446_s9 = smov %s370_s11 }
  0x95   : > { %p9_p7 = scmp.ge.s32.totalorder %s12_s13, 14   ;;  %s447_s10 = smov %s374_s12 }
  0x96   : > { %s448_s11 = smov %s451_s14  ;;  %s449_s12 = smov %s455_s15 }
  0x97   :  { %11 = sbr.rel (!%p9_p7) target bundleno = 3 (0x3), region = 58 }

// kernel: drnseg_inference_forward.7
= control target key start
LH: loop header
LB: loop body
LE: loop exit
PB: predicated region body
PF: predicated region fallthrough
CT: control target
= control target key end

     0   :  { %s1169_s24 = smov 0   ;;  %s1171_s25 = smov 0   ;;  %s1296_s0 = inlined_call_operand.vmem [shape: bf16[2,9,8,48], index: 0, kind: input, shape index: {}, may-alias: {0,1}]   ;;  %s1297_s1 = inlined_call_operand.vmem [shape: bf16[2,9,8,48], index: 1, kind: input, shape index: {}, may-alias: {0,1}]   ;;  %s1298_s2 = inlined_call_operand.vmem [shape: bf16[2,8,8,48], index: 2, kind: input, shape index: {}]   ;;  %s1299_s3 = inlined_call_operand.vmem [shape: bf16[3,48,32], index: 3, kind: input, shape index: {}]   ;;  %s1300_s4 = inlined_call_operand.vmem [shape: f32[1,32], index: 4, kind: input, shape index: {}]   ;;  %s1301_s5 = inlined_call_operand.vmem [shape: f32[32,6], index: 5, kind: input, shape index: {}]   ;;  %s1302_s6 = inlined_call_operand.vmem [shape: f32[1,6], index: 6, kind: input, shape index: {}]   ;;  %s1303_s7 = inlined_call_operand.vmem [shape: f32[2,8,8,6], index: 7, kind: output, shape index: {}]  }
   0x1   :  { %s1173_s26 = smov 0  }
   0x2 LB: > { %s29_s27 = sadd.s32 1, %s1123_s25  ;;  %p919_p0 = scmp.ge.s32.totalorder %s1127_s26, 1  ;;  %s1127_s26 = sphi %s1173_s26, %s17_s26   ;;  %s1123_s25 = sphi %s1171_s25, %s1305_s25   ;;  %s1119_s24 = sphi %s1169_s24, %s1304_s24  }
   0x3   : > { %p31_p1 = scmp.ge.s32.totalorder %s29_s27, 2  ;;  %p306_p2 = scmp.lt.s32.totalorder %s1127_s26, 3 }
   0x5   : > { %s1307_s27 = smov (%p31_p1, %s29_s27), 0  ;;  %p307_p3 = pnand %p919_p0, %p306_p2 }
   0x6   : > { %p374_p4 = scmp.lt.s32.totalorder (!%p307_p3), %s1119_s24, 1 }
   0x7   : > { %310 = sbr.rel (%p307_p3) target bundleno = 354 (0x162), region = 48 }
   0xc   : > { %v1025_v0 = vld [vmem:[%s1299_s3 + $0x28] sm:$0xff]  ;;  %v1022_v1 = vld [vmem:[%s1299_s3 + $0x10] sm:$0xff]  ;;  %v1028_v2 = vld [vmem:[%s1299_s3 + $0x40] sm:$0xff]  ;;  %s1309_s24 = smov (!%p374_p4, %s1119_s24), 1  ;;  %vm488_vm0 = vcmask 392192   ;;  %vm717_vm1 = vcmask 261120  }
   0xd   : > { %506 = vmatpush.bf16.msra.mxu0 %v1025_v0  ;;  %585 = vmatpush.bf16.msra.mxu1 %v1022_v1  ;;  %v1024_v3 = vld [vmem:[%s1299_s3 + $0x20] sm:$0xff]  ;;  %v1021_v4 = vld [vmem:[%s1299_s3 + $0x8] sm:$0xff]  ;;  %v1027_v5 = vld [vmem:[%s1299_s3 + $0x38] sm:$0xff]  ;;  %s1014_s17 = sshll.u32 %s1309_s24, 5  ;;  %s1076_s18 = smul.u32 36, %s1309_s24  ;;  %vm783_vm2 = vcmask 48128  }
   0xe   : > { %657 = vmatpush.bf16.msra.mxu2 %v1028_v2  ;;  %v1023_v6 = vld [vmem:[%s1299_s3 + $0x18] sm:$0xff]  ;;  %v1020_v7 = vld [vmem:[%s1299_s3] sm:$0xff]  ;;  %s1218_s29 = scalar_lea.vmem %s1298_s2, %s1014_s17  ;;  %v1026_v8 = vld [vmem:[%s1299_s3 + $0x30] sm:$0xff]  ;;  %s1015_s30 = sshll.u32 %s1309_s24, 6 }
   0xf   : > { %s381_s11 = scalar_lea.vmem %s1296_s0, %s1076_s18  ;;  %v1016_v9 = vld [vmem:[%s1218_s29] sm:$0xff]  ;;  %v1017_v12 = vld [vmem:[%s1218_s29 + $0x8] sm:$0xff]  ;;  %v1018_v15 = vld [vmem:[%s1218_s29 + $0x10] sm:$0xff]  ;;  %s1013_s12 = sadd.s32 32, %s1076_s18 }
  0x10   : > { %v1030_v10 = vld [vmem:[%s381_s11] sm:$0xff]   ;;  %v1045_v13 = vld [vmem:[%s381_s11 + $0x8] sm:$0xff]   ;;  %v1046_v16 = vld [vmem:[%s381_s11 + $0x10] sm:$0xff]   ;;  %s396_s15 = scalar_lea.vmem %s1297_s1, %s1013_s12  ;;  %s417_s12 = scalar_lea.vmem %s1303_s7, %s1015_s30 }
  0x11   : > { %507 = vmatpush.bf16.msra.mxu0 %v1024_v3  ;;  %586 = vmatpush.bf16.msra.mxu1 %v1021_v4  ;;  %v1070_v11 = vld [vmem:[%s381_s11 + $0x4] sm:$0xff]   ;;  %v1072_v14 = vld [vmem:[%s381_s11 + $0xc] sm:$0xff]   ;;  %v1074_v17 = vld [vmem:[%s381_s11 + $0x14] sm:$0xff]  }
  0x12   : > { %658 = vmatpush.bf16.msra.mxu2 %v1027_v5  ;;  %v1073_v18 = vld [vmem:[%s381_s11 + $0x1c] sm:$0xf]  ;;  %v1075_v19 = vld [vmem:[%s396_s15 - $0x4] sm:$0xf0]  ;;  %v711_v24 = vld [vmem:[%s1301_s5 + $0x10] sm:$0xff] }
  0x13   : > { %v1019_v20 = vld [vmem:[%s1218_s29 + $0x18] sm:$0xff]  ;;  %v1067_v22 = vor.u32 %v1075_v19, %v1073_v18  ;;  %v710_v25 = vld [vmem:[%s1301_s5 + $0x8] sm:$0xff]  ;;  %v709_v26 = vld [vmem:[%s1301_s5] sm:$0xff] }
  0x14   : > { %v1047_v21 = vld [vmem:[%s381_s11 + $0x18] sm:$0xff]   ;;  %v1103_v30 = vld [vmem:[%s1300_s4] ss:$0 sm:$0xff] }
  0x15   : > { %508 = vmatpush.bf16.msra.mxu0 %v1023_v6  ;;  %587 = vmatpush.bf16.msra.mxu1 %v1020_v7  ;;  %v712_v23 = vld [vmem:[%s1301_s5 + $0x18] sm:$0xff] }
  0x16   : > { %659 = vmatpush.bf16.msra.mxu2 %v1026_v8  ;;  %754 = vmatpush.msra.mxu3 %v712_v23 }
  0x18   : > { %960 = vmatmul.msk.bf16.vlgmr.msra.gmra.mxu0 %vm488_vm0, %v1016_v9  ;;  %976 = vmatmul.msk.bf16.vlgmr.msra.gmra.mxu1 %vm488_vm0, %v1030_v10 }
  0x19   : > { %998 = vmatmul.msk.bf16.vlgmr.msra.gmra.mxu2 %vm488_vm0, %v1070_v11  ;;  %755 = vmatpush.msra.mxu3 %v711_v24 }
  0x1b   : > { %756 = vmatpush.msra.mxu3 %v710_v25 }
  0x1d   : > { %757 = vmatpush.msra.mxu3 %v709_v26 }
  0x28   : > { %961 = vmatmul.msk.bf16.gmra.mxu0 %vm488_vm0, %v1017_v12  ;;  %977 = vmatmul.msk.bf16.gmra.mxu1 %vm488_vm0, %v1045_v13 }
  0x29   : > { %999 = vmatmul.msk.bf16.gmra.mxu2 %vm488_vm0, %v1072_v14 }
  0x38   : > { %962 = vmatmul.msk.bf16.gmra.mxu0 %vm488_vm0, %v1018_v15  ;;  %978 = vmatmul.msk.bf16.gmra.mxu1 %vm488_vm0, %v1046_v16 }
  0x39   : > { %1000 = vmatmul.msk.bf16.gmra.mxu2 %vm488_vm0, %v1074_v17 }
  0x48   : > { %963 = vmatmul.msk.bf16.gmra.mxu0 %vm488_vm0, %v1019_v20  ;;  %979 = vmatmul.msk.bf16.gmra.mxu1 %vm488_vm0, %v1047_v21  ;;  %v1104_v20 = vld [vmem:[%s1302_s6] ss:$0 sm:$0xff] }
  0x49   : > { %1001 = vmatmul.msk.bf16.gmra.mxu2 %vm488_vm0, %v1067_v22 }
  0x95   : > { %v510_v27 = vpop.f32.mrf.mxu0  ;;  %v589_v28 = vpop.f32.mrf.mxu1 }
  0x96   : > { %v590_v29 = vadd.f32 %v589_v28, %v510_v27 }
  0x9c   : > { %v661_v31 = vpop.f32.mrf.mxu2 }
  0x9d   : > { %v681_v32 = vadd.f32 %v661_v31, %v590_v29  ;;  %v512_v33 = vpop.f32.mrf.mxu0  ;;  %v591_v34 = vpop.f32.mrf.mxu1 }
  0x9e   : > { %v592_v37 = vadd.f32 %v591_v34, %v512_v33 }
  0x9f   : > { %v693_v35 = vadd.f32 %v1103_v30, %v681_v32 }
  0xa1   : > { %v701_v36 = vmax.f32 %v693_v35, 0.0 }
  0xa3   : > { %1002 = vmatmul.msk.f32.vlgmr.msra.gmra.mxu3 %vm717_vm1, %v701_v36 }
  0xa4   : > { %v663_v38 = vpop.f32.mrf.mxu2 }
  0xa5   : > { %v682_v39 = vadd.f32 %v663_v38, %v592_v37  ;;  %v515_v40 = vpop.f32.mrf.mxu0  ;;  %v594_v41 = vpop.f32.mrf.mxu1 }
  0xa6   : > { %v595_v44 = vadd.f32 %v594_v41, %v515_v40 }
  0xa7   : > { %v694_v42 = vadd.f32 %v1103_v30, %v682_v39 }
  0xa9   : > { %v702_v43 = vmax.f32 %v694_v42, 0.0 }
  0xab   : > { %1003 = vmatmul.msk.f32.gmra.mxu3 %vm717_vm1, %v702_v43 }
  0xac   : > { %v666_v45 = vpop.f32.mrf.mxu2 }
  0xad   : > { %v683_v46 = vadd.f32 %v666_v45, %v595_v44  ;;  %v517_v47 = vpop.f32.mrf.mxu0  ;;  %v596_v48 = vpop.f32.mrf.mxu1 }
  0xae   : > { %v597_v51 = vadd.f32 %v596_v48, %v517_v47 }
  0xaf   : > { %v695_v49 = vadd.f32 %v1103_v30, %v683_v46 }
  0xb1   : > { %v703_v50 = vmax.f32 %v695_v49, 0.0 }
  0xb3   : > { %1004 = vmatmul.msk.f32.gmra.mxu3 %vm717_vm1, %v703_v50 }
  0xb4   : > { %v668_v52 = vpop.f32.mrf.mxu2 }
  0xb5   : > { %v684_v53 = vadd.f32 %v668_v52, %v597_v51  ;;  %v520_v54 = vpop.f32.mrf.mxu0  ;;  %v599_v55 = vpop.f32.mrf.mxu1 }
  0xb6   : > { %v600_v58 = vadd.f32 %v599_v55, %v520_v54 }
  0xb7   : > { %v696_v56 = vadd.f32 %v1103_v30, %v684_v53 }
  0xb9   : > { %v704_v57 = vmax.f32 %v696_v56, 0.0 }
  0xbb   : > { %1005 = vmatmul.msk.f32.gmra.mxu3 %vm717_vm1, %v704_v57 }
  0xbc   : > { %v671_v59 = vpop.f32.mrf.mxu2 }
  0xbd   : > { %v685_v60 = vadd.f32 %v671_v59, %v600_v58  ;;  %v522_v61 = vpop.f32.mrf.mxu0  ;;  %v601_v62 = vpop.f32.mrf.mxu1 }
  0xbe   : > { %v602_v1 = vadd.f32 %v601_v62, %v522_v61 }
  0xbf   : > { %v697_v63 = vadd.f32 %v1103_v30, %v685_v60 }
  0xc1   : > { %v705_v0 = vmax.f32 %v697_v63, 0.0 }
  0xc3   : > { %1006 = vmatmul.msk.f32.gmra.mxu3 %vm717_vm1, %v705_v0 }
  0xc4   : > { %v673_v2 = vpop.f32.mrf.mxu2 }
  0xc5   : > { %v686_v3 = vadd.f32 %v673_v2, %v602_v1  ;;  %v525_v4 = vpop.f32.mrf.mxu0  ;;  %v604_v5 = vpop.f32.mrf.mxu1 }
  0xc6   : > { %v605_v8 = vadd.f32 %v604_v5, %v525_v4 }
  0xc7   : > { %v698_v6 = vadd.f32 %v1103_v30, %v686_v3 }
  0xc9   : > { %v706_v7 = vmax.f32 %v698_v6, 0.0 }
  0xcb   : > { %1007 = vmatmul.msk.f32.gmra.mxu3 %vm717_vm1, %v706_v7 }
  0xcc   : > { %v676_v9 = vpop.f32.mrf.mxu2 }
  0xcd   : > { %v687_v10 = vadd.f32 %v676_v9, %v605_v8  ;;  %v527_v12 = vpop.f32.mrf.mxu0  ;;  %v606_v13 = vpop.f32.mrf.mxu1 }
  0xce   : > { %v607_v15 = vadd.f32 %v606_v13, %v527_v12 }
  0xcf   : > { %v699_v11 = vadd.f32 %v1103_v30, %v687_v10 }
  0xd1   : > { %v707_v14 = vmax.f32 %v699_v11, 0.0 }
  0xd3   : > { %1008 = vmatmul.msk.f32.gmra.mxu3 %vm717_vm1, %v707_v14 }
  0xd4   : > { %v678_v16 = vpop.f32.mrf.mxu2 }
  0xd5   : > { %v688_v17 = vadd.f32 %v678_v16, %v607_v15 }
  0xd7   : > { %v700_v18 = vadd.f32 %v1103_v30, %v688_v17 }
  0xd9   : > { %v708_v19 = vmax.f32 %v700_v18, 0.0 }
  0xdb   : > { %1009 = vmatmul.msk.f32.gmra.mxu3 %vm717_vm1, %v708_v19 }
 0x126   : > { %v759_v21 = vpop.f32.mrf.mxu3 }
 0x127   : > { %v760_v22 = vadd.f32 %v1104_v20, %v759_v21 }
 0x129   : > { %784 = vst.msk [vmem:[%s417_s12] sm:$0xff] %vm783_vm2, %v760_v22 }
 0x12e   : > { %v762_v23 = vpop.f32.mrf.mxu3 }
 0x12f   : > { %v763_v24 = vadd.f32 %v1104_v20, %v762_v23 }
 0x131   : > { %785 = vst.msk [vmem:[%s417_s12 + $0x8] sm:$0xff] %vm783_vm2, %v763_v24 }
 0x136   : > { %v765_v25 = vpop.f32.mrf.mxu3 }
 0x137   : > { %v766_v26 = vadd.f32 %v1104_v20, %v765_v25 }
 0x139   : > { %786 = vst.msk [vmem:[%s417_s12 + $0x10] sm:$0xff] %vm783_vm2, %v766_v26 }
 0x13e   : > { %v768_v27 = vpop.f32.mrf.mxu3 }
 0x13f   : > { %v769_v28 = vadd.f32 %v1104_v20, %v768_v27 }
 0x141   : > { %787 = vst.msk [vmem:[%s417_s12 + $0x18] sm:$0xff] %vm783_vm2, %v769_v28 }
 0x146   : > { %v771_v29 = vpop.f32.mrf.mxu3 }
 0x147   : > { %v772_v30 = vadd.f32 %v1104_v20, %v771_v29 }
 0x149   : > { %788 = vst.msk [vmem:[%s417_s12 + $0x20] sm:$0xff] %vm783_vm2, %v772_v30 }
 0x14e   : > { %v774_v31 = vpop.f32.mrf.mxu3 }
 0x14f   : > { %v775_v32 = vadd.f32 %v1104_v20, %v774_v31 }
 0x151   : > { %789 = vst.msk [vmem:[%s417_s12 + $0x28] sm:$0xff] %vm783_vm2, %v775_v32 }
 0x156   : > { %v777_v33 = vpop.f32.mrf.mxu3 }
 0x157   : > { %v778_v34 = vadd.f32 %v1104_v20, %v777_v33 }
 0x159   : > { %790 = vst.msk [vmem:[%s417_s12 + $0x30] sm:$0xff] %vm783_vm2, %v778_v34 }
 0x15e   : > { %v780_v35 = vpop.f32.mrf.mxu3 }
 0x15f   : > { %v781_v36 = vadd.f32 %v1104_v20, %v780_v35 }
 0x161   : > { %791 = vst.msk [vmem:[%s417_s12 + $0x38] sm:$0xff] %vm783_vm2, %v781_v36 }
 0x162 PF: > { %s17_s26 = sadd.s32 1, %s1127_s26   ;;  %s1304_s24 = smov %s1123_s25 }
 0x163   : > { %p14_p5 = scmp.ge.s32.totalorder %s17_s26, 4   ;;  %s1305_s25 = smov %s1307_s27 }
 0x165   :  { %16 = sbr.rel (!%p14_p5) target bundleno = 2 (0x2), region = 86 }

// kernel: drnseg_inference_forward.9
= control target key start
LH: loop header
LB: loop body
LE: loop exit
PB: predicated region body
PF: predicated region fallthrough
CT: control target
= control target key end

     0   :  { %7 = vsyncpa [#allocation3], 0  ;;  %s2335_s0 = inlined_call_operand.vmem [shape: f32[2,6,8,64], index: 0, kind: input, shape index: {}]   ;;  %s2336_s1 = inlined_call_operand.vmem [shape: f32[64,8], index: 1, kind: input, shape index: {}]   ;;  %s2337_s2 = inlined_call_operand.hbm [shape: f32[2,6,64,64], index: 2, kind: output, shape index: {}]  }
   0x1   :  { %9 = vsyncpa [#allocation3 + $0x1], 0  ;;  %s1563_s9 = smov 0   ;;  %s1565_s10 = smov 0  }
   0x2   :  { %s1567_s11 = smov 0   ;;  %s1569_s12 = smov 0  }
   0x3   :  { %s1571_s13 = smov 0   ;;  %s1573_s14 = smov 0  }
   0x4 LB: > { %s1069_s15 = sadd.s32 4294967295, %s1544_s14   ;;  %s1070_s16 = sadd.s32 4294967294, %s1544_s14   ;;  %s1544_s14 = sphi %s1573_s14, %s15_s14   ;;  %s1540_s13 = sphi %s1571_s13, %s2344_s13   ;;  %s1536_s12 = sphi %s1569_s12, %s2343_s12   ;;  %s1532_s11 = sphi %s1567_s11, %s2342_s11   ;;  %s1528_s10 = sphi %s1565_s10, %s2341_s10   ;;  %s1524_s9 = sphi %s1563_s9, %s2340_s9  }
   0x5   : > { %s27_s17 = sadd.s32 1, %s1540_s13  ;;  %s88_s18 = sadd.s32 1, %s1532_s11 }
   0x6   : > { %p29_p0 = scmp.ge.s32.totalorder %s27_s17, 2  ;;  %p98_p1 = scmp.ne.s32.totalorder %s1532_s11, %s1528_s10 }
   0x7   : > { %p99_p2 = scmp.eq.s32.totalorder %s1069_s15, 1  ;;  %p104_p3 = scmp.ne.s32.totalorder %s1528_s10, %s1524_s9 }
   0x8   : > { %s2346_s17 = smov (%p29_p0, %s27_s17), 0  ;;  %p105_p5 = scmp.eq.s32.totalorder %s1070_s16, 1 }
   0x9   : > { %p1603_p4 = por %p99_p2, %p98_p1  ;;  %s83_s20 = ssub.s32 %s1540_s13, %s2346_s17 }
   0xa   : > { %p1074_p6 = scmp.ge.s32.totalorder %s1544_s14, 1  ;;  %p86_p7 = scmp.eq.s32.totalorder %s83_s20, 0 }
   0xb   : > { %p1610_p8 = por %p105_p5, %p104_p3  ;;  %p140_p9 = scmp.lt.s32.totalorder %s1544_s14, 3 }
   0xc   : > { %s1616_s22 = scalar_select %p86_p7, %s1532_s11, %s88_s18  }
   0xd   : > { %p141_p10 = pnand %p1074_p6, %p140_p9 }
   0xe   : > { %p167_p11 = scmp.lt.s32.totalorder (!%p141_p10), %s1536_s12, 1  ;;  %s164_s26 = sand.u32 (!%p141_p10), 1, %s1528_s10  }
   0xf   : > { %144 = sbr.rel (%p141_p10) target bundleno = 311 (0x137), region = 28  ;;  %s964_s6 = scalar_lea.sflag (!%p141_p10), [#allocation3], %s164_s26 }
  0x10   : > { %s1296_s29 = smul.u32 (!%p141_p10), 384, %s1536_s12  ;;  %s1486_s18 = scalar_lea.hbm (!%p141_p10), %s2337_s2, 768 }
  0x12   : > { %s977_s4 = scalar_lea.hbm (!%p141_p10), %s2337_s2, %s1296_s29 }
  0x13   : > { %s980_s5 = sshll.u32 (!%p141_p10), %s977_s4, 4  ;;  %s981_s5 = int_to_ptr.hbm [resolvable:$true] %s980_s5 }
  0x14   : > { %s168_s23 = scalar_select %p167_p11, %s1536_s12, 1  ;;  %v183_v0 = vld [vmem:[%s2336_s1 + $0x20] sm:$0xff]  ;;  %vm188_vm0 = vcmask 64512   ;;  %v184_v8 = vld [vmem:[%s2336_s1 + $0x28] sm:$0xff]  ;;  %v185_v10 = vld [vmem:[%s2336_s1 + $0x30] sm:$0xff]  ;;  %vm254_vm1 = vcmask 523264  }
  0x15   : > { %v179_v5 = vld [vmem:[%s2336_s1] sm:$0xff]  ;;  %v180_v9 = vld [vmem:[%s2336_s1 + $0x8] sm:$0xff]  ;;  %v181_v11 = vld [vmem:[%s2336_s1 + $0x10] sm:$0xff]  ;;  %s1480_s7 = sshra.s32 %s981_s5, 4  ;;  %s1481_s7 = int_to_ptr.hbm [resolvable:$true] %s1480_s7 }
  0x16   : > { %s1295_s24 = smul.u32 48, %s168_s23  ;;  %v186_v12 = vld [vmem:[%s2336_s1 + $0x38] sm:$0xff]  ;;  %s1482_s8 = scalar_lea.hbm %s1481_s7, 384 }
  0x17   : > { %v182_v13 = vld [vmem:[%s2336_s1 + $0x18] sm:$0xff]  ;;  %p1483_p12 = scmp.ne.s32.totalorder %s1481_s7, %s1482_s8  ;;  %p1487_p1 = scmp.lt.s32.totalorder %s1481_s7, %s2337_s2 }
  0x18   : > { %s171_s27 = scalar_lea.vmem %s2335_s0, %s1295_s24  ;;  %p1488_p2 = scmp.lt.s32.totalorder %s1486_s18, %s1482_s8 }
  0x19   : > { %v187_v1 = vld [vmem:[%s171_s27] sm:$0xff]  ;;  %v1084_v2 = vld [vmem:[%s171_s27 + $0x8] sm:$0xff]  ;;  %v1101_v3 = vld [vmem:[%s171_s27 + $0x10] sm:$0xff]  ;;  %p1484_p13 = pnand %p1483_p12, %p1603_p4 }
  0x1a   : > { %1292 = vmatpush.msra.mxu2 %v187_v1  ;;  %1293 = vmatpush.msra.mxu3 %v1084_v2  ;;  %v1118_v4 = vld [vmem:[%s171_s27 + $0x18] sm:$0xff]  ;;  %v1135_v6 = vld [vmem:[%s171_s27 + $0x20] sm:$0xff]  ;;  %v1152_v7 = vld [vmem:[%s171_s27 + $0x28] sm:$0xff]  ;;  %s1294_s27 = smul.u32 384, %s164_s26  ;;  %p1489_p3 = por %p1488_p2, %p1487_p1 }
  0x1b   : > { %1080 = vmatmul.msk.f32.vlgmr.msra.gmra.mxu2 %vm188_vm0, %v183_v0  ;;  %1089 = vmatmul.msk.f32.vlgmr.msra.gmra.mxu3 %vm188_vm0, %v183_v0  ;;  %p1485_p0 = pneg %p1484_p13 }
  0x1c   : > { %340 = vmatpush.msrb.mxu2 %v1101_v3  ;;  %400 = vmatpush.msrb.mxu3 %v1118_v4  ;;  %s1698_s28 = scalar_lea.vmem [#allocation2], %s1294_s27 }
  0x1d   : > { %228 = vmatpush.msra.mxu0 %v187_v1  ;;  %280 = vmatpush.msra.mxu1 %v1084_v2  ;;  %s978_s12 = sshll.u32 %s1698_s28, 4  ;;  %p1490_p5 = pnand %p1489_p3, %p1485_p0  ;;  %s979_s12 = int_to_ptr.vmem [resolvable:$true] %s978_s12 }
  0x1e   : > { %1076 = vmatmul.msk.f32.vlgmr.msra.gmra.mxu0 %vm188_vm0, %v179_v5  ;;  %1085 = vmatmul.msk.f32.vlgmr.msra.gmra.mxu1 %vm188_vm0, %v179_v5 }
  0x1f   : > { %460 = vmatpush.msrb.mxu0 %v1135_v6  ;;  %520 = vmatpush.msrb.mxu1 %v1152_v7 }
  0x23   : > { %1081 = vmatmul.msk.f32.gmra.mxu2 %vm188_vm0, %v184_v8  ;;  %1090 = vmatmul.msk.f32.gmra.mxu3 %vm188_vm0, %v184_v8 }
  0x26   : > { %1077 = vmatmul.msk.f32.gmra.mxu0 %vm188_vm0, %v180_v9  ;;  %1086 = vmatmul.msk.f32.gmra.mxu1 %vm188_vm0, %v180_v9 }
  0x2b   : > { %1082 = vmatmul.msk.f32.gmra.mxu2 %vm188_vm0, %v185_v10  ;;  %1091 = vmatmul.msk.f32.gmra.mxu3 %vm188_vm0, %v185_v10 }
  0x2e   : > { %1078 = vmatmul.msk.f32.gmra.mxu0 %vm188_vm0, %v181_v11  ;;  %1087 = vmatmul.msk.f32.gmra.mxu1 %vm188_vm0, %v181_v11 }
  0x33   : > { %1083 = vmatmul.msk.f32.gmra.mxu2 %vm188_vm0, %v186_v12  ;;  %1092 = vmatmul.msk.f32.gmra.mxu3 %vm188_vm0, %v186_v12 }
  0x36   : > { %1079 = vmatmul.msk.f32.gmra.mxu0 %vm188_vm0, %v182_v13  ;;  %1088 = vmatmul.msk.f32.gmra.mxu1 %vm188_vm0, %v182_v13 }
  0x3b   : > { %1102 = vmatmul.msk.f32.vlgmr.msrb.gmra.mxu2 %vm188_vm0, %v179_v5  ;;  %1119 = vmatmul.msk.f32.vlgmr.msrb.gmra.mxu3 %vm188_vm0, %v179_v5 }
  0x3e   : > { %1136 = vmatmul.msk.f32.vlgmr.msrb.gmra.mxu0 %vm188_vm0, %v179_v5  ;;  %1153 = vmatmul.msk.f32.vlgmr.msrb.gmra.mxu1 %vm188_vm0, %v179_v5 }
  0x43   : > { %1103 = vmatmul.msk.f32.gmra.mxu2 %vm188_vm0, %v180_v9  ;;  %1120 = vmatmul.msk.f32.gmra.mxu3 %vm188_vm0, %v180_v9 }
  0x46   : > { %1137 = vmatmul.msk.f32.gmra.mxu0 %vm188_vm0, %v180_v9  ;;  %1154 = vmatmul.msk.f32.gmra.mxu1 %vm188_vm0, %v180_v9 }
  0x4b   : > { %1104 = vmatmul.msk.f32.gmra.mxu2 %vm188_vm0, %v181_v11  ;;  %1121 = vmatmul.msk.f32.gmra.mxu3 %vm188_vm0, %v181_v11 }
  0x4e   : > { %1138 = vmatmul.msk.f32.gmra.mxu0 %vm188_vm0, %v181_v11  ;;  %1155 = vmatmul.msk.f32.gmra.mxu1 %vm188_vm0, %v181_v11 }
  0x53   : > { %1105 = vmatmul.msk.f32.gmra.mxu2 %vm188_vm0, %v182_v13  ;;  %1122 = vmatmul.msk.f32.gmra.mxu3 %vm188_vm0, %v182_v13 }
  0x56   : > { %1139 = vmatmul.msk.f32.gmra.mxu0 %vm188_vm0, %v182_v13  ;;  %1156 = vmatmul.msk.f32.gmra.mxu1 %vm188_vm0, %v182_v13 }
  0x5b   : > { %1106 = vmatmul.msk.f32.gmra.mxu2 %vm188_vm0, %v183_v0  ;;  %1123 = vmatmul.msk.f32.gmra.mxu3 %vm188_vm0, %v183_v0 }
  0x5e   : > { %1140 = vmatmul.msk.f32.gmra.mxu0 %vm188_vm0, %v183_v0  ;;  %1157 = vmatmul.msk.f32.gmra.mxu1 %vm188_vm0, %v183_v0 }
  0x63   : > { %1107 = vmatmul.msk.f32.gmra.mxu2 %vm188_vm0, %v184_v8  ;;  %1124 = vmatmul.msk.f32.gmra.mxu3 %vm188_vm0, %v184_v8 }
  0x66   : > { %1141 = vmatmul.msk.f32.gmra.mxu0 %vm188_vm0, %v184_v8  ;;  %1158 = vmatmul.msk.f32.gmra.mxu1 %vm188_vm0, %v184_v8 }
  0x6b   : > { %1108 = vmatmul.msk.f32.gmra.mxu2 %vm188_vm0, %v185_v10  ;;  %1125 = vmatmul.msk.f32.gmra.mxu3 %vm188_vm0, %v185_v10 }
  0x6e   : > { %1142 = vmatmul.msk.f32.gmra.mxu0 %vm188_vm0, %v185_v10  ;;  %1159 = vmatmul.msk.f32.gmra.mxu1 %vm188_vm0, %v185_v10 }
  0x73   : > { %1109 = vmatmul.msk.f32.gmra.mxu2 %vm188_vm0, %v186_v12  ;;  %1126 = vmatmul.msk.f32.gmra.mxu3 %vm188_vm0, %v186_v12 }
  0x76   : > { %1143 = vmatmul.msk.f32.gmra.mxu0 %vm188_vm0, %v186_v12  ;;  %1160 = vmatmul.msk.f32.gmra.mxu1 %vm188_vm0, %v186_v12 }
  0x9b   : > { %v230_v14 = vpop.f32.mrf.mxu0  ;;  %v282_v15 = vpop.f32.mrf.mxu1 }
  0x9c   : > { %255 = vst.msk [vmem:[%s1698_s28] sm:$0xff] %vm254_vm1, %v230_v14  ;;  %v315_v36 = vmax.f32 %v230_v14, %v282_v15 }
  0x9d   : > { %1093 = vst.msk [vmem:[%s1698_s28 + $0x40] sm:$0xff] %vm254_vm1, %v282_v15 }
  0x9e   : > { %v1704_v16 = vpop.f32.mrf.mxu2  ;;  %v1706_v17 = vpop.f32.mrf.mxu3 }
  0x9f   : > { %259 = vst.msk [vmem:[%s1698_s28 + $0x20] sm:$0xff] %vm254_vm1, %v1704_v16  ;;  %v319_v18 = vmax.f32 %v1704_v16, %v1706_v17 }
  0xa0   : > { %1097 = vst.msk [vmem:[%s1698_s28 + $0x60] sm:$0xff] %vm254_vm1, %v1706_v17 }
  0xa3   : > { %v233_v19 = vpop.f32.mrf.mxu0  ;;  %v285_v20 = vpop.f32.mrf.mxu1  ;;  %v1797_v48 = vld [vmem:[%s1698_s28] sm:$0xff] }
  0xa4   : > { %256 = vst.msk [vmem:[%s1698_s28 + $0x8] sm:$0xff] %vm254_vm1, %v233_v19  ;;  %v1791_v45 = vld [vmem:[%s1698_s28 + $0x40] sm:$0xff]  ;;  %v316_v46 = vmax.f32 %v233_v19, %v285_v20 }
  0xa5   : > { %1094 = vst.msk [vmem:[%s1698_s28 + $0x48] sm:$0xff] %vm254_vm1, %v285_v20 }
  0xa6   : > { %v1720_v21 = vpop.f32.mrf.mxu2  ;;  %v1722_v22 = vpop.f32.mrf.mxu3 }
  0xa7   : > { %260 = vst.msk [vmem:[%s1698_s28 + $0x28] sm:$0xff] %vm254_vm1, %v1720_v21  ;;  %v320_v23 = vmax.f32 %v1720_v21, %v1722_v22 }
  0xa8   : > { %1098 = vst.msk [vmem:[%s1698_s28 + $0x68] sm:$0xff] %vm254_vm1, %v1722_v22 }
  0xab   : > { %v1732_v24 = vpop.f32.mrf.mxu0  ;;  %v1734_v25 = vpop.f32.mrf.mxu1  ;;  %v1836_v9 = vld [vmem:[%s1698_s28 + $0x8] sm:$0xff] }
  0xac   : > { %257 = vst.msk [vmem:[%s1698_s28 + $0x10] sm:$0xff] %vm254_vm1, %v1732_v24  ;;  %v317_v5 = vmax.f32 %v1732_v24, %v1734_v25  ;;  %v1839_v12 = vld [vmem:[%s1698_s28 + $0x48] sm:$0xff] }
  0xad   : > { %1095 = vst.msk [vmem:[%s1698_s28 + $0x50] sm:$0xff] %vm254_vm1, %v1734_v25 }
  0xae   : > { %v1742_v26 = vpop.f32.mrf.mxu2  ;;  %v1744_v27 = vpop.f32.mrf.mxu3 }
  0xaf   : > { %261 = vst.msk [vmem:[%s1698_s28 + $0x30] sm:$0xff] %vm254_vm1, %v1742_v26  ;;  %v321_v28 = vmax.f32 %v1742_v26, %v1744_v27 }
  0xb0   : > { %1099 = vst.msk [vmem:[%s1698_s28 + $0x70] sm:$0xff] %vm254_vm1, %v1744_v27 }
  0xb3   : > { %v1754_v29 = vpop.f32.mrf.mxu0  ;;  %v1756_v30 = vpop.f32.mrf.mxu1 }
  0xb4   : > { %258 = vst.msk [vmem:[%s1698_s28 + $0x18] sm:$0xff] %vm254_vm1, %v1754_v29 }
  0xb5   : > { %1096 = vst.msk [vmem:[%s1698_s28 + $0x58] sm:$0xff] %vm254_vm1, %v1756_v30 }
  0xb6   : > { %v1764_v31 = vpop.f32.mrf.mxu2  ;;  %v1766_v32 = vpop.f32.mrf.mxu3 }
  0xb7   : > { %262 = vst.msk [vmem:[%s1698_s28 + $0x38] sm:$0xff] %vm254_vm1, %v1764_v31  ;;  %v322_v33 = vmax.f32 %v1764_v31, %v1766_v32 }
  0xb8   : > { %1100 = vst.msk [vmem:[%s1698_s28 + $0x78] sm:$0xff] %vm254_vm1, %v1766_v32  ;;  %v2139_v32 = vld [vmem:[%s1698_s28 + $0x30] sm:$0xff] }
  0xbb   : > { %v462_v34 = vpop.f32.mrf.mxu0  ;;  %v522_v35 = vpop.f32.mrf.mxu1 }
  0xbc   : > { %1144 = vst.msk [vmem:[%s1698_s28 + $0x100] sm:$0xff] %vm254_vm1, %v462_v34 }
  0xbd   : > { %1161 = vst.msk [vmem:[%s1698_s28 + $0x140] sm:$0xff] %vm254_vm1, %v522_v35 }
  0xbe   : > { %v342_v37 = vpop.f32.mrf.mxu2  ;;  %v402_v38 = vpop.f32.mrf.mxu3 }
  0xbf   : > { %1110 = vst.msk [vmem:[%s1698_s28 + $0x80] sm:$0xff] %vm254_vm1, %v342_v37  ;;  %v375_v39 = vmax.f32 %v315_v36, %v342_v37 }
  0xc0   : > { %1127 = vst.msk [vmem:[%s1698_s28 + $0xc0] sm:$0xff] %vm254_vm1, %v402_v38 }
  0xc1   : > { %v435_v40 = vmax.f32 %v375_v39, %v402_v38 }
  0xc3   : > { %v495_v41 = vmax.f32 %v435_v40, %v462_v34  ;;  %v465_v42 = vpop.f32.mrf.mxu0  ;;  %v525_v43 = vpop.f32.mrf.mxu1  ;;  %v1803_v52 = vld [vmem:[%s1698_s28 + $0x100] sm:$0xff] }
  0xc4   : > { %1145 = vst.msk [vmem:[%s1698_s28 + $0x108] sm:$0xff] %vm254_vm1, %v465_v42  ;;  %v1816_v57 = vld [vmem:[%s1698_s28 + $0x140] sm:$0xff] }
  0xc5   : > { %v1786_v44 = vmax.f32 %v495_v41, %v522_v35  ;;  %1162 = vst.msk [vmem:[%s1698_s28 + $0x148] sm:$0xff] %vm254_vm1, %v525_v43 }
  0xc6   : > { %v1794_v47 = vld [vmem:[%s1698_s28 + $0x80] sm:$0xff]  ;;  %v345_v49 = vpop.f32.mrf.mxu2  ;;  %v405_v50 = vpop.f32.mrf.mxu3 }
  0xc7   : > { %v1800_v51 = vld [vmem:[%s1698_s28 + $0xc0] sm:$0xff]  ;;  %v571_v53 = vsub.f32 %v1797_v48, %v1786_v44  ;;  %v611_v54 = vsub.f32 %v1791_v45, %v1786_v44  ;;  %v651_v55 = vsub.f32 %v1794_v47, %v1786_v44  ;;  %1111 = vst.msk [vmem:[%s1698_s28 + $0x88] sm:$0xff] %vm254_vm1, %v345_v49  ;;  %v376_v58 = vmax.f32 %v316_v46, %v345_v49 }
  0xc8   : > { %v691_v56 = vsub.f32 %v1800_v51, %v1786_v44  ;;  %1128 = vst.msk [vmem:[%s1698_s28 + $0xc8] sm:$0xff] %vm254_vm1, %v405_v50  ;;  %v731_v62 = vsub.f32 %v1803_v52, %v1786_v44  ;;  %v771_v0 = vsub.f32 %v1816_v57, %v1786_v44 }
  0xc9   : > { %v579_v59 = vmul.f32 1.442695, %v571_v53  ;;  %v619_v60 = vmul.f32 1.442695, %v611_v54  ;;  %v659_v61 = vmul.f32 1.442695, %v651_v55  ;;  %v436_v63 = vmax.f32 %v376_v58, %v405_v50 }
  0xca   : > { %v699_v3 = vmul.f32 1.442695, %v691_v56  ;;  %v739_v6 = vmul.f32 1.442695, %v731_v62  ;;  %v779_v13 = vmul.f32 1.442695, %v771_v0  ;;  %v318_v55 = vmax.f32 %v1754_v29, %v1756_v30 }
  0xcb   : > { %1354 = vpow2.f32 %v579_v59  ;;  %v468_v1 = vpop.f32.mrf.mxu0  ;;  %v528_v2 = vpop.f32.mrf.mxu1  ;;  %v496_v4 = vmax.f32 %v436_v63, %v465_v42  ;;  %v1845_v15 = vld [vmem:[%s1698_s28 + $0x108] sm:$0xff]  ;;  %v1881_v63 = vld [vmem:[%s1698_s28 + $0x10] sm:$0xff] }
  0xcc   : > { %1356 = vpow2.f32 %v619_v60  ;;  %1146 = vst.msk [vmem:[%s1698_s28 + $0x110] sm:$0xff] %vm254_vm1, %v468_v1  ;;  %v1856_v34 = vld [vmem:[%s1698_s28 + $0x148] sm:$0xff]  ;;  %v1884_v0 = vld [vmem:[%s1698_s28 + $0x50] sm:$0xff] }
  0xcd   : > { %1163 = vst.msk [vmem:[%s1698_s28 + $0x150] sm:$0xff] %vm254_vm1, %v528_v2  ;;  %1358 = vpow2.f32 %v659_v61  ;;  %v1833_v8 = vmax.f32 %v496_v4, %v525_v43 }
  0xce   : > { %v1831_v7 = vld [vmem:[%s1698_s28 + $0x88] sm:$0xff]  ;;  %v348_v10 = vpop.f32.mrf.mxu2  ;;  %v408_v11 = vpop.f32.mrf.mxu3  ;;  %1360 = vpow2.f32 %v699_v3 }
  0xcf   : > { %v1842_v14 = vld [vmem:[%s1698_s28 + $0xc8] sm:$0xff]  ;;  %1112 = vst.msk [vmem:[%s1698_s28 + $0x90] sm:$0xff] %vm254_vm1, %v348_v10  ;;  %v377_v19 = vmax.f32 %v317_v5, %v348_v10  ;;  %v572_v20 = vsub.f32 %v1836_v9, %v1833_v8  ;;  %v612_v24 = vsub.f32 %v1839_v12, %v1833_v8  ;;  %v652_v25 = vsub.f32 %v1831_v7, %v1833_v8 }
  0xd0   : > { %1129 = vst.msk [vmem:[%s1698_s28 + $0xd0] sm:$0xff] %vm254_vm1, %v408_v11  ;;  %v692_v36 = vsub.f32 %v1842_v14, %v1833_v8  ;;  %1362 = vpow2.f32 %v739_v6  ;;  %v732_v41 = vsub.f32 %v1845_v15, %v1833_v8  ;;  %v772_v46 = vsub.f32 %v1856_v34, %v1833_v8 }
  0xd1   : > { %v1355_v35 = vpop.eup %1354  ;;  %v437_v37 = vmax.f32 %v377_v19, %v408_v11  ;;  %v581_v39 = vmul.f32 1.442695, %v572_v20  ;;  %v621_v40 = vmul.f32 1.442695, %v612_v24  ;;  %1364 = vpow2.f32 %v779_v13 }
  0xd2   : > { %v1357_v38 = vpop.eup %1356  ;;  %v661_v43 = vmul.f32 1.442695, %v652_v25  ;;  %v701_v58 = vmul.f32 1.442695, %v692_v36  ;;  %v741_v60 = vmul.f32 1.442695, %v732_v41 }
  0xd3   : > { %v635_v42 = vadd.f32 %v1357_v38, %v1355_v35  ;;  %v471_v49 = vpop.f32.mrf.mxu0  ;;  %v1866_v50 = vpop.f32.mrf.mxu1  ;;  %1366 = vpow2.f32 %v581_v39  ;;  %v497_v54 = vmax.f32 %v437_v37, %v468_v1  ;;  %v781_v3 = vmul.f32 1.442695, %v772_v46  ;;  %v1890_v5 = vld [vmem:[%s1698_s28 + $0x110] sm:$0xff] }
  0xd4   : > { %v1359_v53 = vpop.eup %1358  ;;  %1147 = vst.msk [vmem:[%s1698_s28 + $0x118] sm:$0xff] %vm254_vm1, %v471_v49  ;;  %1368 = vpow2.f32 %v621_v40  ;;  %v1901_v19 = vld [vmem:[%s1698_s28 + $0x150] sm:$0xff] }
  0xd5   : > { %v675_v56 = vadd.f32 %v1359_v53, %v635_v42  ;;  %1164 = vst.msk [vmem:[%s1698_s28 + $0x158] sm:$0xff] %vm254_vm1, %v1866_v50  ;;  %v1361_v59 = vpop.eup %1360  ;;  %v1878_v62 = vmax.f32 %v497_v54, %v528_v2  ;;  %1370 = vpow2.f32 %v661_v43 }
  0xd6   : > { %v1876_v61 = vld [vmem:[%s1698_s28 + $0x90] sm:$0xff]  ;;  %v351_v29 = vpop.f32.mrf.mxu2  ;;  %v411_v30 = vpop.f32.mrf.mxu3  ;;  %1372 = vpow2.f32 %v701_v58 }
  0xd7   : > { %v715_v1 = vadd.f32 %v1361_v59, %v675_v56  ;;  %v1887_v4 = vld [vmem:[%s1698_s28 + $0xd0] sm:$0xff]  ;;  %1113 = vst.msk [vmem:[%s1698_s28 + $0x98] sm:$0xff] %vm254_vm1, %v351_v29  ;;  %v378_v6 = vmax.f32 %v318_v55, %v351_v29  ;;  %v1363_v2 = vpop.eup %1362  ;;  %v573_v10 = vsub.f32 %v1881_v63, %v1878_v62  ;;  %v613_v11 = vsub.f32 %v1884_v0, %v1878_v62 }
  0xd8   : > { %v653_v13 = vsub.f32 %v1876_v61, %v1878_v62  ;;  %1130 = vst.msk [vmem:[%s1698_s28 + $0xd8] sm:$0xff] %vm254_vm1, %v411_v30  ;;  %v1365_v20 = vpop.eup %1364  ;;  %v693_v25 = vsub.f32 %v1887_v4, %v1878_v62  ;;  %1374 = vpow2.f32 %v741_v60  ;;  %v733_v38 = vsub.f32 %v1890_v5, %v1878_v62 }
  0xd9   : > { %v755_v24 = vadd.f32 %v1363_v2, %v715_v1  ;;  %v1367_v35 = vpop.eup %1366  ;;  %v583_v36 = vmul.f32 1.442695, %v573_v10  ;;  %v623_v37 = vmul.f32 1.442695, %v613_v11  ;;  %1376 = vpow2.f32 %v781_v3  ;;  %v1930_v10 = vld [vmem:[%s1698_s28 + $0x58] sm:$0xff] }
  0xda   : > { %v1369_v39 = vpop.eup %1368  ;;  %v773_v41 = vsub.f32 %v1901_v19, %v1878_v62  ;;  %v438_v42 = vmax.f32 %v378_v6, %v411_v30  ;;  %v663_v54 = vmul.f32 1.442695, %v653_v13  ;;  %v703_v56 = vmul.f32 1.442695, %v693_v25 }
  0xdb   : > { %v795_v40 = vadd.f32 %v1365_v20, %v755_v24  ;;  %v1911_v43 = vpop.f32.mrf.mxu0  ;;  %v1913_v46 = vpop.f32.mrf.mxu1  ;;  %v636_v53 = vadd.f32 %v1369_v39, %v1367_v35  ;;  %1378 = vpow2.f32 %v583_v36  ;;  %v743_v60 = vmul.f32 1.442695, %v733_v38  ;;  %v1936_v20 = vld [vmem:[%s1698_s28 + $0x18] sm:$0xff] }
  0xdc   : > { %1148 = vst.msk [vmem:[%s1698_s28 + $0x120] sm:$0xff] %vm254_vm1, %v1911_v43  ;;  %v1371_v55 = vpop.eup %1370  ;;  %v498_v58 = vmax.f32 %v438_v42, %v471_v49  ;;  %v783_v6 = vmul.f32 1.442695, %v773_v41  ;;  %v1944_v25 = vld [vmem:[%s1698_s28 + $0x118] sm:$0xff] }
  0xdd   : > { %1380 = vlog2.f32 %v795_v40  ;;  %1165 = vst.msk [vmem:[%s1698_s28 + $0x160] sm:$0xff] %vm254_vm1, %v1913_v46  ;;  %v676_v59 = vadd.f32 %v1371_v55, %v636_v53  ;;  %v1373_v3 = vpop.eup %1372  ;;  %v1953_v16 = vld [vmem:[%s1698_s28 + $0x158] sm:$0xff] }
  0xde   : > { %1382 = vpow2.f32 %v623_v37  ;;  %v1922_v29 = vld [vmem:[%s1698_s28 + $0x98] sm:$0xff]  ;;  %v354_v30 = vpop.f32.mrf.mxu2  ;;  %v414_v1 = vpop.f32.mrf.mxu3  ;;  %v1925_v2 = vmax.f32 %v498_v58, %v1866_v50 }
  0xdf   : > { %1114 = vst.msk [vmem:[%s1698_s28 + $0xa0] sm:$0xff] %vm254_vm1, %v354_v30  ;;  %v1375_v49 = vpop.eup %1374  ;;  %v716_v11 = vadd.f32 %v1373_v3, %v676_v59  ;;  %1384 = vpow2.f32 %v663_v54  ;;  %v1933_v13 = vld [vmem:[%s1698_s28 + $0xd8] sm:$0xff]  ;;  %v379_v24 = vmax.f32 %v319_v18, %v354_v30 }
  0xe0   : > { %1131 = vst.msk [vmem:[%s1698_s28 + $0xe0] sm:$0xff] %vm254_vm1, %v414_v1  ;;  %v1377_v50 = vpop.eup %1376  ;;  %1386 = vpow2.f32 %v703_v56  ;;  %v574_v35 = vsub.f32 %v1936_v20, %v1925_v2  ;;  %v614_v36 = vsub.f32 %v1930_v10, %v1925_v2  ;;  %v654_v37 = vsub.f32 %v1922_v29, %v1925_v2 }
  0xe1   : > { %v1379_v38 = vpop.eup %1378  ;;  %v756_v39 = vadd.f32 %v1375_v49, %v716_v11  ;;  %1388 = vpow2.f32 %v743_v60  ;;  %v694_v41 = vsub.f32 %v1933_v13, %v1925_v2  ;;  %v734_v59 = vsub.f32 %v1944_v25, %v1925_v2 }
  0xe2   : > { %1390 = vpow2.f32 %v783_v6  ;;  %v585_v18 = vmul.f32 1.442695, %v574_v35  ;;  %v625_v40 = vmul.f32 1.442695, %v614_v36  ;;  %v665_v58 = vmul.f32 1.442695, %v654_v37 }
  0xe3   : > { %v1381_v17 = vpop.eup %1380  ;;  %v1957_v42 = vpop.f32.mrf.mxu0  ;;  %v796_v56 = vadd.f32 %v1377_v50, %v756_v39  ;;  %v774_v30 = vsub.f32 %v1953_v16, %v1925_v2  ;;  %v439_v3 = vmax.f32 %v379_v24, %v414_v1  ;;  %v705_v1 = vmul.f32 1.442695, %v694_v41 }
  0xe4   : > { %v1959_v53 = vpop.f32.mrf.mxu1  ;;  %v1383_v54 = vpop.eup %1382  ;;  %v804_v55 = vmul.f32 0.6931472, %v1381_v17  ;;  %1392 = vpow2.f32 %v585_v18  ;;  %1149 = vst.msk [vmem:[%s1698_s28 + $0x128] sm:$0xff] %vm254_vm1, %v1957_v42  ;;  %v745_v17 = vmul.f32 1.442695, %v734_v59  ;;  %v2003_v59 = vld [vmem:[%s1698_s28 + $0x120] sm:$0xff] }
  0xe5   : > { %v637_v60 = vadd.f32 %v1383_v54, %v1379_v38  ;;  %v1385_v6 = vpop.eup %1384  ;;  %1394 = vlog2.f32 %v796_v56  ;;  %1166 = vst.msk [vmem:[%s1698_s28 + $0x168] sm:$0xff] %vm254_vm1, %v1959_v53  ;;  %v499_v24 = vmax.f32 %v439_v3, %v1911_v43  ;;  %v785_v41 = vmul.f32 1.442695, %v774_v30  ;;  %v1997_v56 = vld [vmem:[%s1698_s28 + $0x60] sm:$0xff] }
  0xe6   : > { %v819_v49 = vadd.f32 %v804_v55, %v1786_v44  ;;  %v357_v11 = vpop.f32.mrf.mxu2  ;;  %v1969_v50 = vpop.f32.mrf.mxu3  ;;  %1396 = vpow2.f32 %v625_v40 }
  0xe7   : > { %v1387_v35 = vpop.eup %1386  ;;  %v677_v36 = vadd.f32 %v1385_v6, %v637_v60  ;;  %1115 = vst.msk [vmem:[%s1698_s28 + $0xa8] sm:$0xff] %vm254_vm1, %v357_v11  ;;  %1398 = vpow2.f32 %v665_v58  ;;  %v1994_v54 = vmax.f32 %v499_v24, %v1913_v46  ;;  %v380_v46 = vmax.f32 %v320_v23, %v357_v11  ;;  %v2020_v6 = vld [vmem:[%s1698_s28 + $0x160] sm:$0xff] }
  0xe8   : > { %v1389_v44 = vpop.eup %1388  ;;  %v827_v37 = vsub.f32 %v1797_v48, %v819_v49  ;;  %v851_v38 = vsub.f32 %v1791_v45, %v819_v49  ;;  %v875_v39 = vsub.f32 %v1794_v47, %v819_v49  ;;  %1132 = vst.msk [vmem:[%s1698_s28 + $0xe8] sm:$0xff] %vm254_vm1, %v1969_v50  ;;  %v899_v43 = vsub.f32 %v1800_v51, %v819_v49  ;;  %v1985_v48 = vld [vmem:[%s1698_s28 + $0xa0] sm:$0xff] }
  0xe9   : > { %v1391_v18 = vpop.eup %1390  ;;  %v717_v40 = vadd.f32 %v1387_v35, %v677_v36  ;;  %v923_v45 = vsub.f32 %v1803_v52, %v819_v49  ;;  %v1991_v47 = vld [vmem:[%s1698_s28 + $0xe0] sm:$0xff]  ;;  %v947_v51 = vsub.f32 %v1816_v57, %v819_v49  ;;  %1400 = vpow2.f32 %v705_v1 }
  0xea   : > { %835 = vst.msk [vmem:[%s1698_s28] sm:$0xff] %vm254_vm1, %v827_v37  ;;  %v1393_v55 = vpop.eup %1392  ;;  %v2006_v52 = vld [vmem:[%s1698_s28 + $0x20] sm:$0xff]  ;;  %1402 = vpow2.f32 %v745_v17  ;;  %v615_v57 = vsub.f32 %v1997_v56, %v1994_v54  ;;  %v655_v3 = vsub.f32 %v1985_v48, %v1994_v54  ;;  %v695_v23 = vsub.f32 %v1991_v47, %v1994_v54 }
  0xeb   : > { %1217 = vst.msk [vmem:[%s1698_s28 + $0x40] sm:$0xff] %vm254_vm1, %v851_v38  ;;  %v757_v58 = vadd.f32 %v1389_v44, %v717_v40  ;;  %v1395_v60 = vpop.eup %1394  ;;  %v575_v30 = vsub.f32 %v2006_v52, %v1994_v54  ;;  %1404 = vpow2.f32 %v785_v41  ;;  %v735_v1 = vsub.f32 %v2003_v59, %v1994_v54 }
  0xec   : > { %1233 = vst.msk [vmem:[%s1698_s28 + $0x80] sm:$0xff] %vm254_vm1, %v875_v39  ;;  %v1397_v49 = vpop.eup %1396  ;;  %v806_v21 = vmul.f32 0.6931472, %v1395_v60  ;;  %v627_v36 = vmul.f32 1.442695, %v615_v57  ;;  %v775_v39 = vsub.f32 %v2020_v6, %v1994_v54  ;;  %v440_v17 = vmax.f32 %v380_v46, %v1969_v50 }
  0xed   : > { %1249 = vst.msk [vmem:[%s1698_s28 + $0xc0] sm:$0xff] %vm254_vm1, %v899_v43  ;;  %v797_v22 = vadd.f32 %v1391_v18, %v757_v58  ;;  %v638_v11 = vadd.f32 %v1397_v49, %v1393_v55  ;;  %v587_v35 = vmul.f32 1.442695, %v575_v30  ;;  %v1399_v37 = vpop.eup %1398  ;;  %v2038_v18 = vpop.f32.mrf.mxu0  ;;  %v667_v40 = vmul.f32 1.442695, %v655_v3 }
  0xee   : > { %1265 = vst.msk [vmem:[%s1698_s28 + $0x100] sm:$0xff] %vm254_vm1, %v923_v45  ;;  %v360_v24 = vpop.f32.mrf.mxu2  ;;  %v2030_v44 = vpop.f32.mrf.mxu3  ;;  %v820_v38 = vadd.f32 %v806_v21, %v1833_v8  ;;  %v747_v60 = vmul.f32 1.442695, %v735_v1  ;;  %v500_v30 = vmax.f32 %v440_v17, %v1957_v42  ;;  %v2063_v49 = vld [vmem:[%s1698_s28 + $0xa8] sm:$0xff] }
  0xef   : > { %1281 = vst.msk [vmem:[%s1698_s28 + $0x140] sm:$0xff] %vm254_vm1, %v947_v51  ;;  %1406 = vlog2.f32 %v797_v22  ;;  %v678_v43 = vadd.f32 %v1399_v37, %v638_v11  ;;  %v1401_v41 = vpop.eup %1400  ;;  %v707_v51 = vmul.f32 1.442695, %v695_v23  ;;  %v2068_v42 = vld [vmem:[%s1698_s28 + $0xe8] sm:$0xff] }
  0xf0   : > { %1408 = vpow2.f32 %v587_v35  ;;  %1116 = vst.msk [vmem:[%s1698_s28 + $0xb0] sm:$0xff] %vm254_vm1, %v360_v24  ;;  %v828_v45 = vsub.f32 %v1836_v9, %v820_v38  ;;  %v852_v8 = vsub.f32 %v1839_v12, %v820_v38  ;;  %v876_v55 = vsub.f32 %v1831_v7, %v820_v38  ;;  %v1403_v50 = vpop.eup %1402  ;;  %v2071_v21 = vld [vmem:[%s1698_s28 + $0x128] sm:$0xff] }
  0xf1   : > { %1133 = vst.msk [vmem:[%s1698_s28 + $0xf0] sm:$0xff] %vm254_vm1, %v2030_v44  ;;  %v900_v58 = vsub.f32 %v1842_v14, %v820_v38  ;;  %v718_v46 = vadd.f32 %v1401_v41, %v678_v43  ;;  %1410 = vpow2.f32 %v627_v36  ;;  %v1405_v9 = vpop.eup %1404  ;;  %v924_v7 = vsub.f32 %v1845_v15, %v820_v38  ;;  %v2082_v23 = vld [vmem:[%s1698_s28 + $0x28] sm:$0xff] }
  0xf2   : > { %1150 = vst.msk [vmem:[%s1698_s28 + $0x130] sm:$0xff] %vm254_vm1, %v2038_v18  ;;  %v787_v12 = vmul.f32 1.442695, %v775_v39  ;;  %v381_v14 = vmax.f32 %v321_v28, %v360_v24  ;;  %v948_v57 = vsub.f32 %v1856_v34, %v820_v38  ;;  %1412 = vpow2.f32 %v667_v40  ;;  %v2077_v28 = vld [vmem:[%s1698_s28 + $0x68] sm:$0xff]  ;;  %v540_v24 = vpop.f32.mrf.mxu1 }
  0xf3   : > { %836 = vst.msk [vmem:[%s1698_s28 + $0x8] sm:$0xff] %vm254_vm1, %v828_v45  ;;  %v758_v3 = vadd.f32 %v1403_v50, %v718_v46  ;;  %1414 = vpow2.f32 %v707_v51  ;;  %v2074_v26 = vmax.f32 %v500_v30, %v1959_v53  ;;  %v2085_v11 = vld [vmem:[%s1698_s28 + $0x168] sm:$0xff] }
  0xf4   : > { %1218 = vst.msk [vmem:[%s1698_s28 + $0x48] sm:$0xff] %vm254_vm1, %v852_v8  ;;  %1416 = vpow2.f32 %v747_v60  ;;  %v441_v35 = vmax.f32 %v381_v14, %v2030_v44 }
  0xf5   : > { %v1407_v15 = vpop.eup %1406  ;;  %1234 = vst.msk [vmem:[%s1698_s28 + $0x88] sm:$0xff] %vm254_vm1, %v876_v55  ;;  %v798_v22 = vadd.f32 %v1405_v9, %v758_v3  ;;  %1418 = vpow2.f32 %v787_v12  ;;  %v576_v53 = vsub.f32 %v2082_v23, %v2074_v26  ;;  %v616_v36 = vsub.f32 %v2077_v28, %v2074_v26 }
  0xf6   : > { %v1409_v27 = vpop.eup %1408  ;;  %1250 = vst.msk [vmem:[%s1698_s28 + $0xc8] sm:$0xff] %vm254_vm1, %v900_v58  ;;  %v808_v34 = vmul.f32 0.6931472, %v1407_v15  ;;  %v656_v1 = vsub.f32 %v2063_v49, %v2074_v26  ;;  %v696_v44 = vsub.f32 %v2068_v42, %v2074_v26  ;;  %v736_v39 = vsub.f32 %v2071_v21, %v2074_v26  ;;  %v363_v17 = vpop.f32.mrf.mxu2  ;;  %v2131_v15 = vld [vmem:[%s1698_s28 + $0x70] sm:$0xff] }
  0xf7   : > { %1266 = vst.msk [vmem:[%s1698_s28 + $0x108] sm:$0xff] %vm254_vm1, %v924_v7  ;;  %v1411_v37 = vpop.eup %1410  ;;  %1420 = vlog2.f32 %v798_v22  ;;  %v589_v40 = vmul.f32 1.442695, %v576_v53  ;;  %v629_v41 = vmul.f32 1.442695, %v616_v36  ;;  %v776_v45 = vsub.f32 %v2085_v11, %v2074_v26 }
  0xf8   : > { %1282 = vst.msk [vmem:[%s1698_s28 + $0x148] sm:$0xff] %vm254_vm1, %v948_v57  ;;  %v821_v38 = vadd.f32 %v808_v34, %v1878_v62  ;;  %v639_v43 = vadd.f32 %v1411_v37, %v1409_v27  ;;  %v1413_v8 = vpop.eup %1412  ;;  %v669_v50 = vmul.f32 1.442695, %v656_v1  ;;  %v501_v7 = vmax.f32 %v441_v35, %v2038_v18  ;;  %v2126_v18 = vld [vmem:[%s1698_s28 + $0xb0] sm:$0xff]  ;;  %v423_v35 = vpop.f32.mrf.mxu3 }
  0xf9   : > { %1167 = vst.msk [vmem:[%s1698_s28 + $0x170] sm:$0xff] %vm254_vm1, %v540_v24  ;;  %v1415_v58 = vpop.eup %1414  ;;  %1422 = vpow2.f32 %v589_v40  ;;  %v382_v30 = vmax.f32 %v322_v33, %v363_v17  ;;  %v789_v57 = vmul.f32 1.442695, %v776_v45  ;;  %v2136_v31 = vld [vmem:[%s1698_s28 + $0xf0] sm:$0xff] }
  0xfa   : > { %v829_v55 = vsub.f32 %v1881_v63, %v821_v38  ;;  %v853_v62 = vsub.f32 %v1884_v0, %v821_v38  ;;  %v877_v51 = vsub.f32 %v1876_v61, %v821_v38  ;;  %v901_v46 = vsub.f32 %v1887_v4, %v821_v38  ;;  %1117 = vst.msk [vmem:[%s1698_s28 + $0xb8] sm:$0xff] %vm254_vm1, %v363_v17  ;;  %v1417_v63 = vpop.eup %1416  ;;  %v2144_v33 = vld [vmem:[%s1698_s28 + $0x130] sm:$0xff] }
  0xfb   : > { %v925_v60 = vsub.f32 %v1890_v5, %v821_v38  ;;  %v679_v9 = vadd.f32 %v1413_v8, %v639_v43  ;;  %1424 = vpow2.f32 %v629_v41  ;;  %v709_v61 = vmul.f32 1.442695, %v696_v44  ;;  %v1419_v12 = vpop.eup %1418  ;;  %v483_v44 = vpop.f32.mrf.mxu0  ;;  %1134 = vst.msk [vmem:[%s1698_s28 + $0xf8] sm:$0xff] %vm254_vm1, %v423_v35 }
  0xfc   : > { %837 = vst.msk [vmem:[%s1698_s28 + $0x10] sm:$0xff] %vm254_vm1, %v829_v55  ;;  %v749_v0 = vmul.f32 1.442695, %v736_v39  ;;  %v949_v4 = vsub.f32 %v1901_v19, %v821_v38  ;;  %1426 = vpow2.f32 %v669_v50  ;;  %v2128_v3 = vmax.f32 %v501_v7, %v540_v24 }
  0xfd   : > { %1219 = vst.msk [vmem:[%s1698_s28 + $0x50] sm:$0xff] %vm254_vm1, %v853_v62  ;;  %v719_v5 = vadd.f32 %v1415_v58, %v679_v9  ;;  %v1421_v14 = vpop.eup %1420  ;;  %1428 = vpow2.f32 %v709_v61  ;;  %v442_v38 = vmax.f32 %v382_v30, %v423_v35 }
  0xfe   : > { %1235 = vst.msk [vmem:[%s1698_s28 + $0x90] sm:$0xff] %vm254_vm1, %v877_v51  ;;  %v810_v19 = vmul.f32 0.6931472, %v1421_v14  ;;  %1430 = vpow2.f32 %v749_v0  ;;  %v577_v34 = vsub.f32 %v2139_v32, %v2128_v3  ;;  %v617_v22 = vsub.f32 %v2131_v15, %v2128_v3 }
  0xff   : > { %1251 = vst.msk [vmem:[%s1698_s28 + $0xd0] sm:$0xff] %vm254_vm1, %v901_v46  ;;  %v759_v27 = vadd.f32 %v1417_v63, %v719_v5  ;;  %v1423_v53 = vpop.eup %1422  ;;  %v657_v24 = vsub.f32 %v2126_v18, %v2128_v3  ;;  %1432 = vpow2.f32 %v789_v57  ;;  %v697_v40 = vsub.f32 %v2136_v31, %v2128_v3  ;;  %v543_v63 = vpop.f32.mrf.mxu1  ;;  %v2191_v5 = vld [vmem:[%s1698_s28 + $0x38] sm:$0xff] }
 0x100   : > { %1267 = vst.msk [vmem:[%s1698_s28 + $0x110] sm:$0xff] %vm254_vm1, %v925_v60  ;;  %v822_v36 = vadd.f32 %v810_v19, %v1925_v2  ;;  %v2156_v37 = vld [vmem:[%s1698_s28 + $0x170] sm:$0xff]  ;;  %v591_v17 = vmul.f32 1.442695, %v577_v34  ;;  %v631_v43 = vmul.f32 1.442695, %v617_v22  ;;  %v737_v8 = vsub.f32 %v2144_v33, %v2128_v3 }
 0x101   : > { %1283 = vst.msk [vmem:[%s1698_s28 + $0x150] sm:$0xff] %vm254_vm1, %v949_v4  ;;  %v799_v1 = vadd.f32 %v1419_v12, %v759_v27  ;;  %v1425_v39 = vpop.eup %1424  ;;  %v777_v50 = vsub.f32 %v2156_v37, %v2128_v3  ;;  %v502_v58 = vmax.f32 %v442_v38, %v483_v44  ;;  %v711_v9 = vmul.f32 1.442695, %v697_v40  ;;  %v2181_v61 = vld [vmem:[%s1698_s28 + $0xb8] sm:$0xff] }
 0x102   : > { %v830_v41 = vsub.f32 %v1936_v20, %v822_v36  ;;  %v854_v2 = vsub.f32 %v1930_v10, %v822_v36  ;;  %v878_v45 = vsub.f32 %v1922_v29, %v822_v36  ;;  %v1427_v55 = vpop.eup %1426  ;;  %v902_v62 = vsub.f32 %v1933_v13, %v822_v36  ;;  %1151 = vst.msk [vmem:[%s1698_s28 + $0x138] sm:$0xff] %vm254_vm1, %v483_v44  ;;  %v2186_v12 = vld [vmem:[%s1698_s28 + $0x78] sm:$0xff] }
 0x103   : > { %1434 = vlog2.f32 %v799_v1  ;;  %v640_v51 = vadd.f32 %v1425_v39, %v1423_v53  ;;  %v1429_v10 = vpop.eup %1428  ;;  %v926_v29 = vsub.f32 %v1944_v25, %v822_v36  ;;  %v671_v20 = vmul.f32 1.442695, %v657_v24  ;;  %v2202_v27 = vld [vmem:[%s1698_s28 + $0xf8] sm:$0xff]  ;;  %1168 = vst.msk [vmem:[%s1698_s28 + $0x178] sm:$0xff] %vm254_vm1, %v543_v63 }
 0x104   : > { %838 = vst.msk [vmem:[%s1698_s28 + $0x18] sm:$0xff] %vm254_vm1, %v830_v41  ;;  %1436 = vpow2.f32 %v591_v17  ;;  %v1431_v13 = vpop.eup %1430  ;;  %v950_v46 = vsub.f32 %v1953_v16, %v822_v36  ;;  %v751_v25 = vmul.f32 1.442695, %v737_v8  ;;  %v2183_v0 = vmax.f32 %v502_v58, %v543_v63 }
 0x105   : > { %1220 = vst.msk [vmem:[%s1698_s28 + $0x58] sm:$0xff] %vm254_vm1, %v854_v2  ;;  %v680_v60 = vadd.f32 %v1427_v55, %v640_v51  ;;  %1438 = vpow2.f32 %v631_v43  ;;  %v1433_v7 = vpop.eup %1432  ;;  %v791_v16 = vmul.f32 1.442695, %v777_v50 }
 0x106   : > { %1236 = vst.msk [vmem:[%s1698_s28 + $0x98] sm:$0xff] %vm254_vm1, %v878_v45  ;;  %1440 = vpow2.f32 %v671_v20  ;;  %v578_v30 = vsub.f32 %v2191_v5, %v2183_v0  ;;  %v618_v14 = vsub.f32 %v2186_v12, %v2183_v0  ;;  %v658_v34 = vsub.f32 %v2181_v61, %v2183_v0 }
 0x107   : > { %1252 = vst.msk [vmem:[%s1698_s28 + $0xd8] sm:$0xff] %vm254_vm1, %v902_v62  ;;  %v720_v4 = vadd.f32 %v1429_v10, %v680_v60  ;;  %1442 = vpow2.f32 %v711_v9  ;;  %v698_v17 = vsub.f32 %v2202_v27, %v2183_v0 }
 0x108   : > { %1268 = vst.msk [vmem:[%s1698_s28 + $0x118] sm:$0xff] %vm254_vm1, %v926_v29  ;;  %1444 = vpow2.f32 %v751_v25  ;;  %v593_v53 = vmul.f32 1.442695, %v578_v30  ;;  %v633_v38 = vmul.f32 1.442695, %v618_v14 }
 0x109   : > { %v1435_v57 = vpop.eup %1434  ;;  %1284 = vst.msk [vmem:[%s1698_s28 + $0x158] sm:$0xff] %vm254_vm1, %v950_v46  ;;  %v760_v19 = vadd.f32 %v1431_v13, %v720_v4  ;;  %1446 = vpow2.f32 %v791_v16  ;;  %v2209_v24 = vld [vmem:[%s1698_s28 + $0x138] sm:$0xff]  ;;  %v673_v43 = vmul.f32 1.442695, %v658_v34  ;;  %v713_v50 = vmul.f32 1.442695, %v698_v17 }
 0x10a   : > { %v1437_v22 = vpop.eup %1436  ;;  %v812_v35 = vmul.f32 0.6931472, %v1435_v57  ;;  %1448 = vpow2.f32 %v593_v53  ;;  %v2227_v29 = vld [vmem:[%s1698_s28 + $0x178] sm:$0xff] }
 0x10b   : > { %v1439_v36 = vpop.eup %1438  ;;  %v800_v1 = vadd.f32 %v1433_v7, %v760_v19  ;;  %v778_v58 = vsub.f32 %v2227_v29, %v2183_v0 }
 0x10c   : > { %v823_v44 = vadd.f32 %v812_v35, %v1994_v54  ;;  %v641_v39 = vadd.f32 %v1439_v36, %v1437_v22  ;;  %v1441_v40 = vpop.eup %1440  ;;  %v738_v54 = vsub.f32 %v2209_v24, %v2183_v0 }
 0x10d   : > { %1450 = vlog2.f32 %v800_v1  ;;  %v1443_v8 = vpop.eup %1442 }
 0x10e   : > { %v831_v41 = vsub.f32 %v2006_v52, %v823_v44  ;;  %v855_v2 = vsub.f32 %v1997_v56, %v823_v44  ;;  %v879_v45 = vsub.f32 %v1985_v48, %v823_v44  ;;  %v903_v55 = vsub.f32 %v1991_v47, %v823_v44  ;;  %v1445_v51 = vpop.eup %1444 }
 0x10f   : > { %v681_v62 = vadd.f32 %v1441_v40, %v641_v39  ;;  %1452 = vpow2.f32 %v633_v38  ;;  %v927_v52 = vsub.f32 %v2003_v59, %v823_v44  ;;  %v1447_v56 = vpop.eup %1446  ;;  %v951_v48 = vsub.f32 %v2020_v6, %v823_v44 }
 0x110   : > { %839 = vst.msk [vmem:[%s1698_s28 + $0x20] sm:$0xff] %vm254_vm1, %v831_v41  ;;  %v1449_v47 = vpop.eup %1448  ;;  %1454 = vpow2.f32 %v673_v43  ;;  %v753_v20 = vmul.f32 1.442695, %v738_v54  ;;  %v793_v6 = vmul.f32 1.442695, %v778_v58 }
 0x111   : > { %1221 = vst.msk [vmem:[%s1698_s28 + $0x60] sm:$0xff] %vm254_vm1, %v855_v2  ;;  %v721_v10 = vadd.f32 %v1443_v8, %v681_v62  ;;  %1456 = vpow2.f32 %v713_v50 }
 0x112   : > { %1237 = vst.msk [vmem:[%s1698_s28 + $0xa0] sm:$0xff] %vm254_vm1, %v879_v45  ;;  %1458 = vpow2.f32 %v753_v20 }
 0x113   : > { %v1451_v13 = vpop.eup %1450  ;;  %1253 = vst.msk [vmem:[%s1698_s28 + $0xe0] sm:$0xff] %vm254_vm1, %v903_v55  ;;  %v761_v59 = vadd.f32 %v1445_v51, %v721_v10 }
 0x114   : > { %1269 = vst.msk [vmem:[%s1698_s28 + $0x120] sm:$0xff] %vm254_vm1, %v927_v52  ;;  %v814_v46 = vmul.f32 0.6931472, %v1451_v13 }
 0x115   : > { %v1453_v60 = vpop.eup %1452  ;;  %1285 = vst.msk [vmem:[%s1698_s28 + $0x160] sm:$0xff] %vm254_vm1, %v951_v48  ;;  %v801_v9 = vadd.f32 %v1447_v56, %v761_v59 }
 0x116   : > { %v824_v63 = vadd.f32 %v814_v46, %v2074_v26  ;;  %v642_v25 = vadd.f32 %v1453_v60, %v1449_v47  ;;  %v1455_v7 = vpop.eup %1454 }
 0x117   : > { %1460 = vlog2.f32 %v801_v9  ;;  %v1457_v19 = vpop.eup %1456 }
 0x118   : > { %v832_v4 = vsub.f32 %v2082_v23, %v824_v63  ;;  %v856_v16 = vsub.f32 %v2077_v28, %v824_v63  ;;  %v880_v30 = vsub.f32 %v2063_v49, %v824_v63  ;;  %1462 = vpow2.f32 %v793_v6  ;;  %v1459_v22 = vpop.eup %1458 }
 0x119   : > { %v904_v14 = vsub.f32 %v2068_v42, %v824_v63  ;;  %v682_v57 = vadd.f32 %v1455_v7, %v642_v25  ;;  %v928_v26 = vsub.f32 %v2071_v21, %v824_v63  ;;  %v952_v34 = vsub.f32 %v2085_v11, %v824_v63 }
 0x11a   : > { %840 = vst.msk [vmem:[%s1698_s28 + $0x28] sm:$0xff] %vm254_vm1, %v832_v4 }
 0x11b   : > { %1222 = vst.msk [vmem:[%s1698_s28 + $0x68] sm:$0xff] %vm254_vm1, %v856_v16  ;;  %v722_v23 = vadd.f32 %v1457_v19, %v682_v57 }
 0x11c   : > { %1238 = vst.msk [vmem:[%s1698_s28 + $0xa8] sm:$0xff] %vm254_vm1, %v880_v30 }
 0x11d   : > { %v1461_v49 = vpop.eup %1460  ;;  %1254 = vst.msk [vmem:[%s1698_s28 + $0xe8] sm:$0xff] %vm254_vm1, %v904_v14  ;;  %v762_v42 = vadd.f32 %v1459_v22, %v722_v23 }
 0x11e   : > { %v1463_v28 = vpop.eup %1462  ;;  %1270 = vst.msk [vmem:[%s1698_s28 + $0x128] sm:$0xff] %vm254_vm1, %v928_v26  ;;  %v816_v21 = vmul.f32 0.6931472, %v1461_v49 }
 0x11f   : > { %1286 = vst.msk [vmem:[%s1698_s28 + $0x168] sm:$0xff] %vm254_vm1, %v952_v34  ;;  %v802_v11 = vadd.f32 %v1463_v28, %v762_v42 }
 0x120   : > { %v825_v35 = vadd.f32 %v816_v21, %v2128_v3 }
 0x121   : > { %1464 = vlog2.f32 %v802_v11 }
 0x122   : > { %v833_v53 = vsub.f32 %v2139_v32, %v825_v35  ;;  %v857_v36 = vsub.f32 %v2131_v15, %v825_v35  ;;  %v881_v1 = vsub.f32 %v2126_v18, %v825_v35  ;;  %v905_v38 = vsub.f32 %v2136_v31, %v825_v35 }
 0x123   : > { %v929_v44 = vsub.f32 %v2144_v33, %v825_v35  ;;  %v953_v39 = vsub.f32 %v2156_v37, %v825_v35 }
 0x124   : > { %841 = vst.msk [vmem:[%s1698_s28 + $0x30] sm:$0xff] %vm254_vm1, %v833_v53 }
 0x125   : > { %1223 = vst.msk [vmem:[%s1698_s28 + $0x70] sm:$0xff] %vm254_vm1, %v857_v36 }
 0x126   : > { %1239 = vst.msk [vmem:[%s1698_s28 + $0xb0] sm:$0xff] %vm254_vm1, %v881_v1 }
 0x127   : > { %v1465_v3 = vpop.eup %1464  ;;  %1255 = vst.msk [vmem:[%s1698_s28 + $0xf0] sm:$0xff] %vm254_vm1, %v905_v38 }
 0x128   : > { %1271 = vst.msk [vmem:[%s1698_s28 + $0x130] sm:$0xff] %vm254_vm1, %v929_v44  ;;  %v818_v18 = vmul.f32 0.6931472, %v1465_v3 }
 0x129   : > { %1287 = vst.msk [vmem:[%s1698_s28 + $0x170] sm:$0xff] %vm254_vm1, %v953_v39 }
 0x12a   : > { %v826_v15 = vadd.f32 %v818_v18, %v2183_v0 }
 0x12c   : > { %v834_v31 = vsub.f32 %v2191_v5, %v826_v15  ;;  %v858_v32 = vsub.f32 %v2186_v12, %v826_v15  ;;  %v882_v33 = vsub.f32 %v2181_v61, %v826_v15  ;;  %v906_v37 = vsub.f32 %v2202_v27, %v826_v15 }
 0x12d   : > { %v930_v0 = vsub.f32 %v2209_v24, %v826_v15  ;;  %v954_v17 = vsub.f32 %v2227_v29, %v826_v15 }
 0x12e   : > { %842 = vst.msk [vmem:[%s1698_s28 + $0x38] sm:$0xff] %vm254_vm1, %v834_v31 }
 0x12f   : > { %1224 = vst.msk [vmem:[%s1698_s28 + $0x78] sm:$0xff] %vm254_vm1, %v858_v32 }
 0x130   : > { %1240 = vst.msk [vmem:[%s1698_s28 + $0xb8] sm:$0xff] %vm254_vm1, %v882_v33 }
 0x131   : > { %1256 = vst.msk [vmem:[%s1698_s28 + $0xf8] sm:$0xff] %vm254_vm1, %v906_v37 }
 0x132   : > { %1272 = vst.msk [vmem:[%s1698_s28 + $0x138] sm:$0xff] %vm254_vm1, %v930_v0 }
 0x133   : > { %1288 = vst.msk [vmem:[%s1698_s28 + $0x178] sm:$0xff] %vm254_vm1, %v954_v17 }
 0x134   : > { %1493 = shalt.err (!%p1490_p5)
}
 0x135   : > { %s1546_s24 = smov 128   ;;  %s1547_s25 = smov 8  }
 0x136   : > { %1297 = dma.vmem_to_hbm [thread:$0]  (%p1603_p4), %s979_s12, 6144, %s981_s5, %s964_s6, %s1546_s24, %s1546_s24, %s1547_s25  }
 0x137 PF: > { %p1303_p6 = scmp.ge.s32.totalorder %s1544_s14, 2  ;;  %s995_s26 = sand.u32 1, %s1524_s9  }
 0x138   : > { %s996_s27 = scalar_lea.sflag [#allocation3], %s995_s26 }
 0x139   : > { %p1300_p7 = pnand %p1303_p6, %p1610_p8 }
 0x13b   : > { %p1301_p9 = pneg %p1300_p7 }
 0x13d   : > { %1519 = dma.done.wait (%p1301_p9), %s996_s27, 6144  }
 0x13e   : > { %1521 = vsyncadd (%p1301_p9), %s996_s27, 4294961152  ;;  %s15_s14 = sadd.s32 1, %s1544_s14   ;;  %s2340_s9 = smov %s1528_s10 }
 0x13f   : > { %p12_p10 = scmp.ge.s32.totalorder %s15_s14, 4   ;;  %s2341_s10 = smov %s1532_s11 }
 0x140   : > { %s2342_s11 = smov %s1616_s22  ;;  %s2343_s12 = smov %s1540_s13 }
 0x141   : > { %s2344_s13 = smov %s2346_s17  ;;  %14 = sbr.rel (!%p12_p10) target bundleno = 4 (0x4), region = 76 }
 0x146   :  { %1002 = vsyncpa [#allocation3], 1 }
 0x147   :  { %1004 = vsyncpa [#allocation3 + $0x1], 1 }

</bundles_post_ra>
